<compile_context>
chip_gen: v6e
topology: v6e:2x2x1
jax: 0.10.0
libtpu: 0.0.40
codegen_flags: <defaults>
</compile_context>

<pallas_src>
from functools import partial

import jax
import jax.numpy as jnp
from jax.experimental import pallas as pl
from jax.experimental.pallas import tpu as pltpu


def _ps3d_kernel(x_ref, o_ref, *, sd, sh, sw, td_blk, H, W):
    """One grid step: shuffle `td_blk` input depths of one output-channel group.

    x_ref: (1, sd*sh*sw, td_blk, H, W)      all channels of group n, depths [dt*td_blk, ...)
    o_ref: (1, 1, td_blk*sd, H*sh, W*sw)    the corresponding output slab
    """
    f32 = jnp.float32
    H_out, W_out = H * sh, W * sw

    # One-hot scatter matrices built from 2-D iotas (cheap VPU work, hoisted out of the
    # unrolled loops).  R_iw scatters input column w -> output column w*sw+iw;
    # L_ih scatters input row h -> output row h*sh+ih.
    w_src = jax.lax.broadcasted_iota(jnp.int32, (W, W_out), 0)
    w_dst = jax.lax.broadcasted_iota(jnp.int32, (W, W_out), 1)
    h_dst = jax.lax.broadcasted_iota(jnp.int32, (H_out, H), 0)
    h_src = jax.lax.broadcasted_iota(jnp.int32, (H_out, H), 1)
    R = [jnp.where(w_dst == w_src * sw + iw, 1.0, 0.0).astype(f32) for iw in range(sw)]
    L = [jnp.where(h_dst == h_src * sh + ih, 1.0, 0.0).astype(f32) for ih in range(sh)]

    hi = jax.lax.Precision.HIGHEST
    for td in range(td_blk):
        for id_ in range(sd):
            acc = jnp.zeros((H_out, W_out), f32)
            for ih in range(sh):
                rows = jnp.zeros((H, W_out), f32)
                for iw in range(sw):
                    c = (id_ * sh + ih) * sw + iw
                    plane = x_ref[0, c, td].astype(f32)                       # (H, W)
                    rows = rows + jnp.dot(plane, R[iw], precision=hi,
                                          preferred_element_type=f32)         # (H, W_out)
                acc = acc + jnp.dot(L[ih], rows, precision=hi,
                                    preferred_element_type=f32)               # (H_out, W_out)
            o_ref[0, 0, td * sd + id_] = acc.astype(o_ref.dtype)


def _pick_depth_block(D, s3, H, W, itemsize, vmem_budget_bytes=2 << 20, max_unroll=128):
    """Largest divisor of D whose input block fits the VMEM budget with modest unroll."""
    best = 1
    for cand in range(1, D + 1):
        if D % cand:
            continue
        if cand * s3 * H * W * itemsize <= vmem_budget_bytes and cand * s3 <= max_unroll:
            best = cand
    return best


@partial(jax.jit, static_argnames=("scale_d", "scale_h", "scale_w"))
def pixel_shuffle3d(x, *, scale_d=8, scale_h=8, scale_w=8):
    B, C, D, H, W = x.shape
    sd, sh, sw = int(scale_d), int(scale_h), int(scale_w)
    s3 = sd * sh * sw
    if C % s3 != 0:
        raise ValueError(f"channels ({C}) not divisible by scale_d*scale_h*scale_w ({s3})")
    n_out = C // s3
    D_out, H_out, W_out = D * sd, H * sh, W * sw
    td_blk = _pick_depth_block(D, s3, H, W, x.dtype.itemsize)

    kernel = partial(_ps3d_kernel, sd=sd, sh=sh, sw=sw, td_blk=td_blk, H=H, W=W)
    return pl.pallas_call(
        kernel,
        out_shape=jax.ShapeDtypeStruct((B, n_out, D_out, H_out, W_out), x.dtype),
        grid=(B, n_out, D // td_blk),
        in_specs=[pl.BlockSpec((1, s3, td_blk, H, W),
                               lambda b, n, dt: (b, n, dt, 0, 0))],
        out_specs=pl.BlockSpec((1, 1, td_blk * sd, H_out, W_out),
                               lambda b, n, dt: (b, n, dt, 0, 0)),
        compiler_params=pltpu.CompilerParams(
            dimension_semantics=("parallel", "parallel", "parallel")),
    )(x)


class PixelShuffle3d:
    """Mirror of the PyTorch module interface."""

    def __init__(self, scale_d=8, scale_h=8, scale_w=8):
        self.scale_d, self.scale_h, self.scale_w = scale_d, scale_h, scale_w

    def __call__(self, x):
        return pixel_shuffle3d(x, scale_d=self.scale_d, scale_h=self.scale_h,
                               scale_w=self.scale_w)


def pixel_shuffle3d_ref(x, scale_d, scale_h, scale_w):
    """Pure-jnp reference (direct transcription of the PyTorch forward)."""
    B, C, D, H, W = x.shape
    n_out = C // (scale_d * scale_h * scale_w)
    v = x.reshape(B, n_out, scale_d, scale_h, scale_w, D, H, W)
    v = v.transpose(0, 1, 5, 2, 6, 3, 7, 4)
    return v.reshape(B, n_out, D * scale_d, H * scale_h, W * scale_w)


if __name__ == "__main__":
    key = jax.random.PRNGKey(0)
    k1, k2 = jax.random.split(key)

    # Config 1: uniform scale 2 (typical sub-pixel upsampling factor), small shapes.
    x1 = jax.random.normal(k1, (2, 16, 4, 4, 8), jnp.float32)
    m1 = PixelShuffle3d(scale_d=2, scale_h=2, scale_w=2)
    y1 = jax.block_until_ready(m1(x1))
    r1 = pixel_shuffle3d_ref(x1, 2, 2, 2)
    assert y1.shape == (2, 2, 8, 8, 16), y1.shape
    assert bool(jnp.allclose(y1, r1, rtol=1e-6, atol=1e-6))

    # Config 2: non-uniform scales and odd spatial sizes.
    x2 = jax.random.normal(k2, (1, 24, 3, 5, 7), jnp.float32)
    m2 = PixelShuffle3d(scale_d=2, scale_h=1, scale_w=3)
    y2 = jax.block_until_ready(m2(x2))
    r2 = pixel_shuffle3d_ref(x2, 2, 1, 3)
    assert y2.shape == (1, 4, 6, 5, 21), y2.shape
    assert bool(jnp.allclose(y2, r2, rtol=1e-6, atol=1e-6))

    print("KERNEL_OK")
</pallas_src>

<mosaic_0001>
module attributes {stable_mosaic.version = 11 : i64} {
  func.func @_ps3d_kernel(%arg0: i32, %arg1: i32, %arg2: i32, %arg3: memref<1x8x4x4x8xf32, #tpu.memory_space<vmem>>, %arg4: memref<1x1x8x8x16xf32, #tpu.memory_space<vmem>>) attributes {dimension_semantics = [#tpu.dimension_semantics<parallel>, #tpu.dimension_semantics<parallel>, #tpu.dimension_semantics<parallel>], iteration_bounds = array<i64: 2, 2, 1>, scalar_prefetch = 0 : i64, scratch_operands = 0 : i64, tpu.core_type = #tpu.core_type<tc>, window_params = [{transform_indices = @transform_0, window_bounds = array<i64: 1, 8, 4, 4, 8>}, {transform_indices = @transform_1, window_bounds = array<i64: 1, 1, 8, 8, 16>}]} {
    %0 = tpu.iota {dimensions = array<i32: 0>} : vector<8x16xi32>
    %1 = tpu.iota {dimensions = array<i32: 1>} : vector<8x16xi32>
    %2 = tpu.iota {dimensions = array<i32: 0>} : vector<8x4xi32>
    %3 = tpu.iota {dimensions = array<i32: 1>} : vector<8x4xi32>
    %c2_i32 = arith.constant 2 : i32
    %4 = vector.broadcast %c2_i32 : i32 to vector<8x16xi32>
    %5 = arith.muli %0, %4 : vector<8x16xi32>
    %c0_i32 = arith.constant 0 : i32
    %6 = vector.broadcast %c0_i32 : i32 to vector<8x16xi32>
    %7 = arith.addi %5, %6 : vector<8x16xi32>
    %8 = arith.cmpi eq, %1, %7 : vector<8x16xi32>
    %cst = arith.constant 1.000000e+00 : f32
    %cst_0 = arith.constant 0.000000e+00 : f32
    %9 = vector.broadcast %cst : f32 to vector<8x16xf32>
    %10 = vector.broadcast %cst_0 : f32 to vector<8x16xf32>
    %11 = arith.select %8, %9, %10 : vector<8x16xi1>, vector<8x16xf32>
    %c2_i32_1 = arith.constant 2 : i32
    %12 = vector.broadcast %c2_i32_1 : i32 to vector<8x16xi32>
    %13 = arith.muli %0, %12 : vector<8x16xi32>
    %c1_i32 = arith.constant 1 : i32
    %14 = vector.broadcast %c1_i32 : i32 to vector<8x16xi32>
    %15 = arith.addi %13, %14 : vector<8x16xi32>
    %16 = arith.cmpi eq, %1, %15 : vector<8x16xi32>
    %cst_2 = arith.constant 1.000000e+00 : f32
    %cst_3 = arith.constant 0.000000e+00 : f32
    %17 = vector.broadcast %cst_2 : f32 to vector<8x16xf32>
    %18 = vector.broadcast %cst_3 : f32 to vector<8x16xf32>
    %19 = arith.select %16, %17, %18 : vector<8x16xi1>, vector<8x16xf32>
    %c2_i32_4 = arith.constant 2 : i32
    %20 = vector.broadcast %c2_i32_4 : i32 to vector<8x4xi32>
    %21 = arith.muli %3, %20 : vector<8x4xi32>
    %c0_i32_5 = arith.constant 0 : i32
    %22 = vector.broadcast %c0_i32_5 : i32 to vector<8x4xi32>
    %23 = arith.addi %21, %22 : vector<8x4xi32>
    %24 = arith.cmpi eq, %2, %23 : vector<8x4xi32>
    %cst_6 = arith.constant 1.000000e+00 : f32
    %cst_7 = arith.constant 0.000000e+00 : f32
    %25 = vector.broadcast %cst_6 : f32 to vector<8x4xf32>
    %26 = vector.broadcast %cst_7 : f32 to vector<8x4xf32>
    %27 = arith.select %24, %25, %26 : vector<8x4xi1>, vector<8x4xf32>
    %c2_i32_8 = arith.constant 2 : i32
    %28 = vector.broadcast %c2_i32_8 : i32 to vector<8x4xi32>
    %29 = arith.muli %3, %28 : vector<8x4xi32>
    %c1_i32_9 = arith.constant 1 : i32
    %30 = vector.broadcast %c1_i32_9 : i32 to vector<8x4xi32>
    %31 = arith.addi %29, %30 : vector<8x4xi32>
    %32 = arith.cmpi eq, %2, %31 : vector<8x4xi32>
    %cst_10 = arith.constant 1.000000e+00 : f32
    %cst_11 = arith.constant 0.000000e+00 : f32
    %33 = vector.broadcast %cst_10 : f32 to vector<8x4xf32>
    %34 = vector.broadcast %cst_11 : f32 to vector<8x4xf32>
    %35 = arith.select %32, %33, %34 : vector<8x4xi1>, vector<8x4xf32>
    %cst_12 = arith.constant 0.000000e+00 : f32
    %36 = vector.broadcast %cst_12 : f32 to vector<8x16xf32>
    %cst_13 = arith.constant 0.000000e+00 : f32
    %37 = vector.broadcast %cst_13 : f32 to vector<4x16xf32>
    %c0 = arith.constant 0 : index
    %c0_14 = arith.constant 0 : index
    %c0_15 = arith.constant 0 : index
    %c0_16 = arith.constant 0 : index
    %c0_17 = arith.constant 0 : index
    %38 = vector.load %arg3[%c0, %c0_14, %c0_15, %c0_16, %c0_17] : memref<1x8x4x4x8xf32, #tpu.memory_space<vmem>>, vector<1x1x1x4x8xf32>
    %39 = vector.shape_cast %38 : vector<1x1x1x4x8xf32> to vector<4x8xf32>
    %cst_18 = arith.constant dense<0.000000e+00> : vector<4x16xf32>
    %40 = tpu.matmul %39, %11, %cst_18 {dimension_numbers = #tpu.dot_dimension_numbers<[1], [0], [0], [1], [0, 0, 1, 1], [], []>, precision = #tpu.contract_precision<fp32>} : vector<4x8xf32>, vector<8x16xf32>, vector<4x16xf32> -> vector<4x16xf32>
    %41 = arith.addf %37, %40 : vector<4x16xf32>
    %c0_19 = arith.constant 0 : index
    %c1 = arith.constant 1 : index
    %c0_20 = arith.constant 0 : index
    %c0_21 = arith.constant 0 : index
    %c0_22 = arith.constant 0 : index
    %42 = vector.load %arg3[%c0_19, %c1, %c0_20, %c0_21, %c0_22] : memref<1x8x4x4x8xf32, #tpu.memory_space<vmem>>, vector<1x1x1x4x8xf32>
    %43 = vector.shape_cast %42 : vector<1x1x1x4x8xf32> to vector<4x8xf32>
    %cst_23 = arith.constant dense<0.000000e+00> : vector<4x16xf32>
    %44 = tpu.matmul %43, %19, %cst_23 {dimension_numbers = #tpu.dot_dimension_numbers<[1], [0], [0], [1], [0, 0, 1, 1], [], []>, precision = #tpu.contract_precision<fp32>} : vector<4x8xf32>, vector<8x16xf32>, vector<4x16xf32> -> vector<4x16xf32>
    %45 = arith.addf %41, %44 : vector<4x16xf32>
    %cst_24 = arith.constant dense<0.000000e+00> : vector<8x16xf32>
    %46 = tpu.matmul %27, %45, %cst_24 {dimension_numbers = #tpu.dot_dimension_numbers<[1], [0], [0], [1], [0, 0, 1, 1], [], []>, precision = #tpu.contract_precision<fp32>} : vector<8x4xf32>, vector<4x16xf32>, vector<8x16xf32> -> vector<8x16xf32>
    %47 = arith.addf %36, %46 : vector<8x16xf32>
    %cst_25 = arith.constant 0.000000e+00 : f32
    %48 = vector.broadcast %cst_25 : f32 to vector<4x16xf32>
    %c0_26 = arith.constant 0 : index
    %c2 = arith.constant 2 : index
    %c0_27 = arith.constant 0 : index
    %c0_28 = arith.constant 0 : index
    %c0_29 = arith.constant 0 : index
    %49 = vector.load %arg3[%c0_26, %c2, %c0_27, %c0_28, %c0_29] : memref<1x8x4x4x8xf32, #tpu.memory_space<vmem>>, vector<1x1x1x4x8xf32>
    %50 = vector.shape_cast %49 : vector<1x1x1x4x8xf32> to vector<4x8xf32>
    %cst_30 = arith.constant dense<0.000000e+00> : vector<4x16xf32>
    %51 = tpu.matmul %50, %11, %cst_30 {dimension_numbers = #tpu.dot_dimension_numbers<[1], [0], [0], [1], [0, 0, 1, 1], [], []>, precision = #tpu.contract_precision<fp32>} : vector<4x8xf32>, vector<8x16xf32>, vector<4x16xf32> -> vector<4x16xf32>
    %52 = arith.addf %48, %51 : vector<4x16xf32>
    %c0_31 = arith.constant 0 : index
    %c3 = arith.constant 3 : index
    %c0_32 = arith.constant 0 : index
    %c0_33 = arith.constant 0 : index
    %c0_34 = arith.constant 0 : index
    %53 = vector.load %arg3[%c0_31, %c3, %c0_32, %c0_33, %c0_34] : memref<1x8x4x4x8xf32, #tpu.memory_space<vmem>>, vector<1x1x1x4x8xf32>
    %54 = vector.shape_cast %53 : vector<1x1x1x4x8xf32> to vector<4x8xf32>
    %cst_35 = arith.constant dense<0.000000e+00> : vector<4x16xf32>
    %55 = tpu.matmul %54, %19, %cst_35 {dimension_numbers = #tpu.dot_dimension_numbers<[1], [0], [0], [1], [0, 0, 1, 1], [], []>, precision = #tpu.contract_precision<fp32>} : vector<4x8xf32>, vector<8x16xf32>, vector<4x16xf32> -> vector<4x16xf32>
    %56 = arith.addf %52, %55 : vector<4x16xf32>
    %cst_36 = arith.constant dense<0.000000e+00> : vector<8x16xf32>
    %57 = tpu.matmul %35, %56, %cst_36 {dimension_numbers = #tpu.dot_dimension_numbers<[1], [0], [0], [1], [0, 0, 1, 1], [], []>, precision = #tpu.contract_precision<fp32>} : vector<8x4xf32>, vector<4x16xf32>, vector<8x16xf32> -> vector<8x16xf32>
    %58 = arith.addf %47, %57 : vector<8x16xf32>
    %c0_37 = arith.constant 0 : index
    %c0_38 = arith.constant 0 : index
    %c0_39 = arith.constant 0 : index
    %c0_40 = arith.constant 0 : index
    %c0_41 = arith.constant 0 : index
    %59 = vector.load %arg4[%c0_37, %c0_38, %c0_39, %c0_40, %c0_41] : memref<1x1x8x8x16xf32, #tpu.memory_space<vmem>>, vector<1x1x1x8x16xf32>
    %60 = vector.shape_cast %59 : vector<1x1x1x8x16xf32> to vector<8x16xf32>
    %61 = vector.shape_cast %58 : vector<8x16xf32> to vector<1x1x1x8x16xf32>
    tpu.vector_store %arg4[%c0_37, %c0_38, %c0_39, %c0_40, %c0_41], %61 {strides = array<i32>} : memref<1x1x8x8x16xf32, #tpu.memory_space<vmem>>, vector<1x1x1x8x16xf32>,
    %cst_42 = arith.constant 0.000000e+00 : f32
    %62 = vector.broadcast %cst_42 : f32 to vector<8x16xf32>
    %cst_43 = arith.constant 0.000000e+00 : f32
    %63 = vector.broadcast %cst_43 : f32 to vector<4x16xf32>
    %c0_44 = arith.constant 0 : index
    %c4 = arith.constant 4 : index
    %c0_45 = arith.constant 0 : index
    %c0_46 = arith.constant 0 : index
    %c0_47 = arith.constant 0 : index
    %64 = vector.load %arg3[%c0_44, %c4, %c0_45, %c0_46, %c0_47] : memref<1x8x4x4x8xf32, #tpu.memory_space<vmem>>, vector<1x1x1x4x8xf32>
    %65 = vector.shape_cast %64 : vector<1x1x1x4x8xf32> to vector<4x8xf32>
    %cst_48 = arith.constant dense<0.000000e+00> : vector<4x16xf32>
    %66 = tpu.matmul %65, %11, %cst_48 {dimension_numbers = #tpu.dot_dimension_numbers<[1], [0], [0], [1], [0, 0, 1, 1], [], []>, precision = #tpu.contract_precision<fp32>} : vector<4x8xf32>, vector<8x16xf32>, vector<4x16xf32> -> vector<4x16xf32>
    %67 = arith.addf %63, %66 : vector<4x16xf32>
    %c0_49 = arith.constant 0 : index
    %c5 = arith.constant 5 : index
    %c0_50 = arith.constant 0 : index
    %c0_51 = arith.constant 0 : index
    %c0_52 = arith.constant 0 : index
    %68 = vector.load %arg3[%c0_49, %c5, %c0_50, %c0_51, %c0_52] : memref<1x8x4x4x8xf32, #tpu.memory_space<vmem>>, vector<1x1x1x4x8xf32>
    %69 = vector.shape_cast %68 : vector<1x1x1x4x8xf32> to vector<4x8xf32>
    %cst_53 = arith.constant dense<0.000000e+00> : vector<4x16xf32>
    %70 = tpu.matmul %69, %19, %cst_53 {dimension_numbers = #tpu.dot_dimension_numbers<[1], [0], [0], [1], [0, 0, 1, 1], [], []>, precision = #tpu.contract_precision<fp32>} : vector<4x8xf32>, vector<8x16xf32>, vector<4x16xf32> -> vector<4x16xf32>
    %71 = arith.addf %67, %70 : vector<4x16xf32>
    %cst_54 = arith.constant dense<0.000000e+00> : vector<8x16xf32>
    %72 = tpu.matmul %27, %71, %cst_54 {dimension_numbers = #tpu.dot_dimension_numbers<[1], [0], [0], [1], [0, 0, 1, 1], [], []>, precision = #tpu.contract_precision<fp32>} : vector<8x4xf32>, vector<4x16xf32>, vector<8x16xf32> -> vector<8x16xf32>
    %73 = arith.addf %62, %72 : vector<8x16xf32>
    %cst_55 = arith.constant 0.000000e+00 : f32
    %74 = vector.broadcast %cst_55 : f32 to vector<4x16xf32>
    %c0_56 = arith.constant 0 : index
    %c6 = arith.constant 6 : index
    %c0_57 = arith.constant 0 : index
    %c0_58 = arith.constant 0 : index
    %c0_59 = arith.constant 0 : index
    %75 = vector.load %arg3[%c0_56, %c6, %c0_57, %c0_58, %c0_59] : memref<1x8x4x4x8xf32, #tpu.memory_space<vmem>>, vector<1x1x1x4x8xf32>
    %76 = vector.shape_cast %75 : vector<1x1x1x4x8xf32> to vector<4x8xf32>
    %cst_60 = arith.constant dense<0.000000e+00> : vector<4x16xf32>
    %77 = tpu.matmul %76, %11, %cst_60 {dimension_numbers = #tpu.dot_dimension_numbers<[1], [0], [0], [1], [0, 0, 1, 1], [], []>, precision = #tpu.contract_precision<fp32>} : vector<4x8xf32>, vector<8x16xf32>, vector<4x16xf32> -> vector<4x16xf32>
    %78 = arith.addf %74, %77 : vector<4x16xf32>
    %c0_61 = arith.constant 0 : index
    %c7 = arith.constant 7 : index
    %c0_62 = arith.constant 0 : index
    %c0_63 = arith.constant 0 : index
    %c0_64 = arith.constant 0 : index
    %79 = vector.load %arg3[%c0_61, %c7, %c0_62, %c0_63, %c0_64] : memref<1x8x4x4x8xf32, #tpu.memory_space<vmem>>, vector<1x1x1x4x8xf32>
    %80 = vector.shape_cast %79 : vector<1x1x1x4x8xf32> to vector<4x8xf32>
    %cst_65 = arith.constant dense<0.000000e+00> : vector<4x16xf32>
    %81 = tpu.matmul %80, %19, %cst_65 {dimension_numbers = #tpu.dot_dimension_numbers<[1], [0], [0], [1], [0, 0, 1, 1], [], []>, precision = #tpu.contract_precision<fp32>} : vector<4x8xf32>, vector<8x16xf32>, vector<4x16xf32> -> vector<4x16xf32>
    %82 = arith.addf %78, %81 : vector<4x16xf32>
    %cst_66 = arith.constant dense<0.000000e+00> : vector<8x16xf32>
    %83 = tpu.matmul %35, %82, %cst_66 {dimension_numbers = #tpu.dot_dimension_numbers<[1], [0], [0], [1], [0, 0, 1, 1], [], []>, precision = #tpu.contract_precision<fp32>} : vector<8x4xf32>, vector<4x16xf32>, vector<8x16xf32> -> vector<8x16xf32>
    %84 = arith.addf %73, %83 : vector<8x16xf32>
    %c0_67 = arith.constant 0 : index
    %c0_68 = arith.constant 0 : index
    %c1_69 = arith.constant 1 : index
    %c0_70 = arith.constant 0 : index
    %c0_71 = arith.constant 0 : index
    %85 = vector.load %arg4[%c0_67, %c0_68, %c1_69, %c0_70, %c0_71] : memref<1x1x8x8x16xf32, #tpu.memory_space<vmem>>, vector<1x1x1x8x16xf32>
    %86 = vector.shape_cast %85 : vector<1x1x1x8x16xf32> to vector<8x16xf32>
    %87 = vector.shape_cast %84 : vector<8x16xf32> to vector<1x1x1x8x16xf32>
    tpu.vector_store %arg4[%c0_67, %c0_68, %c1_69, %c0_70, %c0_71], %87 {strides = array<i32>} : memref<1x1x8x8x16xf32, #tpu.memory_space<vmem>>, vector<1x1x1x8x16xf32>,
    %cst_72 = arith.constant 0.000000e+00 : f32
    %88 = vector.broadcast %cst_72 : f32 to vector<8x16xf32>
    %cst_73 = arith.constant 0.000000e+00 : f32
    %89 = vector.broadcast %cst_73 : f32 to vector<4x16xf32>
    %c0_74 = arith.constant 0 : index
    %c0_75 = arith.constant 0 : index
    %c1_76 = arith.constant 1 : index
    %c0_77 = arith.constant 0 : index
    %c0_78 = arith.constant 0 : index
    %90 = vector.load %arg3[%c0_74, %c0_75, %c1_76, %c0_77, %c0_78] : memref<1x8x4x4x8xf32, #tpu.memory_space<vmem>>, vector<1x1x1x4x8xf32>
    %91 = vector.shape_cast %90 : vector<1x1x1x4x8xf32> to vector<4x8xf32>
    %cst_79 = arith.constant dense<0.000000e+00> : vector<4x16xf32>
    %92 = tpu.matmul %91, %11, %cst_79 {dimension_numbers = #tpu.dot_dimension_numbers<[1], [0], [0], [1], [0, 0, 1, 1], [], []>, precision = #tpu.contract_precision<fp32>} : vector<4x8xf32>, vector<8x16xf32>, vector<4x16xf32> -> vector<4x16xf32>
    %93 = arith.addf %89, %92 : vector<4x16xf32>
    %c0_80 = arith.constant 0 : index
    %c1_81 = arith.constant 1 : index
    %c1_82 = arith.constant 1 : index
    %c0_83 = arith.constant 0 : index
    %c0_84 = arith.constant 0 : index
    %94 = vector.load %arg3[%c0_80, %c1_81, %c1_82, %c0_83, %c0_84] : memref<1x8x4x4x8xf32, #tpu.memory_space<vmem>>, vector<1x1x1x4x8xf32>
    %95 = vector.shape_cast %94 : vector<1x1x1x4x8xf32> to vector<4x8xf32>
    %cst_85 = arith.constant dense<0.000000e+00> : vector<4x16xf32>
    %96 = tpu.matmul %95, %19, %cst_85 {dimension_numbers = #tpu.dot_dimension_numbers<[1], [0], [0], [1], [0, 0, 1, 1], [], []>, precision = #tpu.contract_precision<fp32>} : vector<4x8xf32>, vector<8x16xf32>, vector<4x16xf32> -> vector<4x16xf32>
    %97 = arith.addf %93, %96 : vector<4x16xf32>
    %cst_86 = arith.constant dense<0.000000e+00> : vector<8x16xf32>
    %98 = tpu.matmul %27, %97, %cst_86 {dimension_numbers = #tpu.dot_dimension_numbers<[1], [0], [0], [1], [0, 0, 1, 1], [], []>, precision = #tpu.contract_precision<fp32>} : vector<8x4xf32>, vector<4x16xf32>, vector<8x16xf32> -> vector<8x16xf32>
    %99 = arith.addf %88, %98 : vector<8x16xf32>
    %cst_87 = arith.constant 0.000000e+00 : f32
    %100 = vector.broadcast %cst_87 : f32 to vector<4x16xf32>
    %c0_88 = arith.constant 0 : index
    %c2_89 = arith.constant 2 : index
    %c1_90 = arith.constant 1 : index
    %c0_91 = arith.constant 0 : index
    %c0_92 = arith.constant 0 : index
    %101 = vector.load %arg3[%c0_88, %c2_89, %c1_90, %c0_91, %c0_92] : memref<1x8x4x4x8xf32, #tpu.memory_space<vmem>>, vector<1x1x1x4x8xf32>
    %102 = vector.shape_cast %101 : vector<1x1x1x4x8xf32> to vector<4x8xf32>
    %cst_93 = arith.constant dense<0.000000e+00> : vector<4x16xf32>
    %103 = tpu.matmul %102, %11, %cst_93 {dimension_numbers = #tpu.dot_dimension_numbers<[1], [0], [0], [1], [0, 0, 1, 1], [], []>, precision = #tpu.contract_precision<fp32>} : vector<4x8xf32>, vector<8x16xf32>, vector<4x16xf32> -> vector<4x16xf32>
    %104 = arith.addf %100, %103 : vector<4x16xf32>
    %c0_94 = arith.constant 0 : index
    %c3_95 = arith.constant 3 : index
    %c1_96 = arith.constant 1 : index
    %c0_97 = arith.constant 0 : index
    %c0_98 = arith.constant 0 : index
    %105 = vector.load %arg3[%c0_94, %c3_95, %c1_96, %c0_97, %c0_98] : memref<1x8x4x4x8xf32, #tpu.memory_space<vmem>>, vector<1x1x1x4x8xf32>
    %106 = vector.shape_cast %105 : vector<1x1x1x4x8xf32> to vector<4x8xf32>
    %cst_99 = arith.constant dense<0.000000e+00> : vector<4x16xf32>
    %107 = tpu.matmul %106, %19, %cst_99 {dimension_numbers = #tpu.dot_dimension_numbers<[1], [0], [0], [1], [0, 0, 1, 1], [], []>, precision = #tpu.contract_precision<fp32>} : vector<4x8xf32>, vector<8x16xf32>, vector<4x16xf32> -> vector<4x16xf32>
    %108 = arith.addf %104, %107 : vector<4x16xf32>
    %cst_100 = arith.constant dense<0.000000e+00> : vector<8x16xf32>
    %109 = tpu.matmul %35, %108, %cst_100 {dimension_numbers = #tpu.dot_dimension_numbers<[1], [0], [0], [1], [0, 0, 1, 1], [], []>, precision = #tpu.contract_precision<fp32>} : vector<8x4xf32>, vector<4x16xf32>, vector<8x16xf32> -> vector<8x16xf32>
    %110 = arith.addf %99, %109 : vector<8x16xf32>
    %c0_101 = arith.constant 0 : index
    %c0_102 = arith.constant 0 : index
    %c2_103 = arith.constant 2 : index
    %c0_104 = arith.constant 0 : index
    %c0_105 = arith.constant 0 : index
    %111 = vector.load %arg4[%c0_101, %c0_102, %c2_103, %c0_104, %c0_105] : memref<1x1x8x8x16xf32, #tpu.memory_space<vmem>>, vector<1x1x1x8x16xf32>
    %112 = vector.shape_cast %111 : vector<1x1x1x8x16xf32> to vector<8x16xf32>
    %113 = vector.shape_cast %110 : vector<8x16xf32> to vector<1x1x1x8x16xf32>
    tpu.vector_store %arg4[%c0_101, %c0_102, %c2_103, %c0_104, %c0_105], %113 {strides = array<i32>} : memref<1x1x8x8x16xf32, #tpu.memory_space<vmem>>, vector<1x1x1x8x16xf32>,
    %cst_106 = arith.constant 0.000000e+00 : f32
    %114 = vector.broadcast %cst_106 : f32 to vector<8x16xf32>
    %cst_107 = arith.constant 0.000000e+00 : f32
    %115 = vector.broadcast %cst_107 : f32 to vector<4x16xf32>
    %c0_108 = arith.constant 0 : index
    %c4_109 = arith.constant 4 : index
    %c1_110 = arith.constant 1 : index
    %c0_111 = arith.constant 0 : index
    %c0_112 = arith.constant 0 : index
    %116 = vector.load %arg3[%c0_108, %c4_109, %c1_110, %c0_111, %c0_112] : memref<1x8x4x4x8xf32, #tpu.memory_space<vmem>>, vector<1x1x1x4x8xf32>
    %117 = vector.shape_cast %116 : vector<1x1x1x4x8xf32> to vector<4x8xf32>
    %cst_113 = arith.constant dense<0.000000e+00> : vector<4x16xf32>
    %118 = tpu.matmul %117, %11, %cst_113 {dimension_numbers = #tpu.dot_dimension_numbers<[1], [0], [0], [1], [0, 0, 1, 1], [], []>, precision = #tpu.contract_precision<fp32>} : vector<4x8xf32>, vector<8x16xf32>, vector<4x16xf32> -> vector<4x16xf32>
    %119 = arith.addf %115, %118 : vector<4x16xf32>
    %c0_114 = arith.constant 0 : index
    %c5_115 = arith.constant 5 : index
    %c1_116 = arith.constant 1 : index
    %c0_117 = arith.constant 0 : index
    %c0_118 = arith.constant 0 : index
    %120 = vector.load %arg3[%c0_114, %c5_115, %c1_116, %c0_117, %c0_118] : memref<1x8x4x4x8xf32, #tpu.memory_space<vmem>>, vector<1x1x1x4x8xf32>
    %121 = vector.shape_cast %120 : vector<1x1x1x4x8xf32> to vector<4x8xf32>
    %cst_119 = arith.constant dense<0.000000e+00> : vector<4x16xf32>
    %122 = tpu.matmul %121, %19, %cst_119 {dimension_numbers = #tpu.dot_dimension_numbers<[1], [0], [0], [1], [0, 0, 1, 1], [], []>, precision = #tpu.contract_precision<fp32>} : vector<4x8xf32>, vector<8x16xf32>, vector<4x16xf32> -> vector<4x16xf32>
    %123 = arith.addf %119, %122 : vector<4x16xf32>
    %cst_120 = arith.constant dense<0.000000e+00> : vector<8x16xf32>
    %124 = tpu.matmul %27, %123, %cst_120 {dimension_numbers = #tpu.dot_dimension_numbers<[1], [0], [0], [1], [0, 0, 1, 1], [], []>, precision = #tpu.contract_precision<fp32>} : vector<8x4xf32>, vector<4x16xf32>, vector<8x16xf32> -> vector<8x16xf32>
    %125 = arith.addf %114, %124 : vector<8x16xf32>
    %cst_121 = arith.constant 0.000000e+00 : f32
    %126 = vector.broadcast %cst_121 : f32 to vector<4x16xf32>
    %c0_122 = arith.constant 0 : index
    %c6_123 = arith.constant 6 : index
    %c1_124 = arith.constant 1 : index
    %c0_125 = arith.constant 0 : index
    %c0_126 = arith.constant 0 : index
    %127 = vector.load %arg3[%c0_122, %c6_123, %c1_124, %c0_125, %c0_126] : memref<1x8x4x4x8xf32, #tpu.memory_space<vmem>>, vector<1x1x1x4x8xf32>
    %128 = vector.shape_cast %127 : vector<1x1x1x4x8xf32> to vector<4x8xf32>
    %cst_127 = arith.constant dense<0.000000e+00> : vector<4x16xf32>
    %129 = tpu.matmul %128, %11, %cst_127 {dimension_numbers = #tpu.dot_dimension_numbers<[1], [0], [0], [1], [0, 0, 1, 1], [], []>, precision = #tpu.contract_precision<fp32>} : vector<4x8xf32>, vector<8x16xf32>, vector<4x16xf32> -> vector<4x16xf32>
    %130 = arith.addf %126, %129 : vector<4x16xf32>
    %c0_128 = arith.constant 0 : index
    %c7_129 = arith.constant 7 : index
    %c1_130 = arith.constant 1 : index
    %c0_131 = arith.constant 0 : index
    %c0_132 = arith.constant 0 : index
    %131 = vector.load %arg3[%c0_128, %c7_129, %c1_130, %c0_131, %c0_132] : memref<1x8x4x4x8xf32, #tpu.memory_space<vmem>>, vector<1x1x1x4x8xf32>
    %132 = vector.shape_cast %131 : vector<1x1x1x4x8xf32> to vector<4x8xf32>
    %cst_133 = arith.constant dense<0.000000e+00> : vector<4x16xf32>
    %133 = tpu.matmul %132, %19, %cst_133 {dimension_numbers = #tpu.dot_dimension_numbers<[1], [0], [0], [1], [0, 0, 1, 1], [], []>, precision = #tpu.contract_precision<fp32>} : vector<4x8xf32>, vector<8x16xf32>, vector<4x16xf32> -> vector<4x16xf32>
    %134 = arith.addf %130, %133 : vector<4x16xf32>
    %cst_134 = arith.constant dense<0.000000e+00> : vector<8x16xf32>
    %135 = tpu.matmul %35, %134, %cst_134 {dimension_numbers = #tpu.dot_dimension_numbers<[1], [0], [0], [1], [0, 0, 1, 1], [], []>, precision = #tpu.contract_precision<fp32>} : vector<8x4xf32>, vector<4x16xf32>, vector<8x16xf32> -> vector<8x16xf32>
    %136 = arith.addf %125, %135 : vector<8x16xf32>
    %c0_135 = arith.constant 0 : index
    %c0_136 = arith.constant 0 : index
    %c3_137 = arith.constant 3 : index
    %c0_138 = arith.constant 0 : index
    %c0_139 = arith.constant 0 : index
    %137 = vector.load %arg4[%c0_135, %c0_136, %c3_137, %c0_138, %c0_139] : memref<1x1x8x8x16xf32, #tpu.memory_space<vmem>>, vector<1x1x1x8x16xf32>
    %138 = vector.shape_cast %137 : vector<1x1x1x8x16xf32> to vector<8x16xf32>
    %139 = vector.shape_cast %136 : vector<8x16xf32> to vector<1x1x1x8x16xf32>
    tpu.vector_store %arg4[%c0_135, %c0_136, %c3_137, %c0_138, %c0_139], %139 {strides = array<i32>} : memref<1x1x8x8x16xf32, #tpu.memory_space<vmem>>, vector<1x1x1x8x16xf32>,
    %cst_140 = arith.constant 0.000000e+00 : f32
    %140 = vector.broadcast %cst_140 : f32 to vector<8x16xf32>
    %cst_141 = arith.constant 0.000000e+00 : f32
    %141 = vector.broadcast %cst_141 : f32 to vector<4x16xf32>
    %c0_142 = arith.constant 0 : index
    %c0_143 = arith.constant 0 : index
    %c2_144 = arith.constant 2 : index
    %c0_145 = arith.constant 0 : index
    %c0_146 = arith.constant 0 : index
    %142 = vector.load %arg3[%c0_142, %c0_143, %c2_144, %c0_145, %c0_146] : memref<1x8x4x4x8xf32, #tpu.memory_space<vmem>>, vector<1x1x1x4x8xf32>
    %143 = vector.shape_cast %142 : vector<1x1x1x4x8xf32> to vector<4x8xf32>
    %cst_147 = arith.constant dense<0.000000e+00> : vector<4x16xf32>
    %144 = tpu.matmul %143, %11, %cst_147 {dimension_numbers = #tpu.dot_dimension_numbers<[1], [0], [0], [1], [0, 0, 1, 1], [], []>, precision = #tpu.contract_precision<fp32>} : vector<4x8xf32>, vector<8x16xf32>, vector<4x16xf32> -> vector<4x16xf32>
    %145 = arith.addf %141, %144 : vector<4x16xf32>
    %c0_148 = arith.constant 0 : index
    %c1_149 = arith.constant 1 : index
    %c2_150 = arith.constant 2 : index
    %c0_151 = arith.constant 0 : index
    %c0_152 = arith.constant 0 : index
    %146 = vector.load %arg3[%c0_148, %c1_149, %c2_150, %c0_151, %c0_152] : memref<1x8x4x4x8xf32, #tpu.memory_space<vmem>>, vector<1x1x1x4x8xf32>
    %147 = vector.shape_cast %146 : vector<1x1x1x4x8xf32> to vector<4x8xf32>
    %cst_153 = arith.constant dense<0.000000e+00> : vector<4x16xf32>
    %148 = tpu.matmul %147, %19, %cst_153 {dimension_numbers = #tpu.dot_dimension_numbers<[1], [0], [0], [1], [0, 0, 1, 1], [], []>, precision = #tpu.contract_precision<fp32>} : vector<4x8xf32>, vector<8x16xf32>, vector<4x16xf32> -> vector<4x16xf32>
    %149 = arith.addf %145, %148 : vector<4x16xf32>
    %cst_154 = arith.constant dense<0.000000e+00> : vector<8x16xf32>
    %150 = tpu.matmul %27, %149, %cst_154 {dimension_numbers = #tpu.dot_dimension_numbers<[1], [0], [0], [1], [0, 0, 1, 1], [], []>, precision = #tpu.contract_precision<fp32>} : vector<8x4xf32>, vector<4x16xf32>, vector<8x16xf32> -> vector<8x16xf32>
    %151 = arith.addf %140, %150 : vector<8x16xf32>
    %cst_155 = arith.constant 0.000000e+00 : f32
    %152 = vector.broadcast %cst_155 : f32 to vector<4x16xf32>
    %c0_156 = arith.constant 0 : index
    %c2_157 = arith.constant 2 : index
    %c2_158 = arith.constant 2 : index
    %c0_159 = arith.constant 0 : index
    %c0_160 = arith.constant 0 : index
    %153 = vector.load %arg3[%c0_156, %c2_157, %c2_158, %c0_159, %c0_160] : memref<1x8x4x4x8xf32, #tpu.memory_space<vmem>>, vector<1x1x1x4x8xf32>
    %154 = vector.shape_cast %153 : vector<1x1x1x4x8xf32> to vector<4x8xf32>
    %cst_161 = arith.constant dense<0.000000e+00> : vector<4x16xf32>
    %155 = tpu.matmul %154, %11, %cst_161 {dimension_numbers = #tpu.dot_dimension_numbers<[1], [0], [0], [1], [0, 0, 1, 1], [], []>, precision = #tpu.contract_precision<fp32>} : vector<4x8xf32>, vector<8x16xf32>, vector<4x16xf32> -> vector<4x16xf32>
    %156 = arith.addf %152, %155 : vector<4x16xf32>
    %c0_162 = arith.constant 0 : index
    %c3_163 = arith.constant 3 : index
    %c2_164 = arith.constant 2 : index
    %c0_165 = arith.constant 0 : index
    %c0_166 = arith.constant 0 : index
    %157 = vector.load %arg3[%c0_162, %c3_163, %c2_164, %c0_165, %c0_166] : memref<1x8x4x4x8xf32, #tpu.memory_space<vmem>>, vector<1x1x1x4x8xf32>
    %158 = vector.shape_cast %157 : vector<1x1x1x4x8xf32> to vector<4x8xf32>
    %cst_167 = arith.constant dense<0.000000e+00> : vector<4x16xf32>
    %159 = tpu.matmul %158, %19, %cst_167 {dimension_numbers = #tpu.dot_dimension_numbers<[1], [0], [0], [1], [0, 0, 1, 1], [], []>, precision = #tpu.contract_precision<fp32>} : vector<4x8xf32>, vector<8x16xf32>, vector<4x16xf32> -> vector<4x16xf32>
    %160 = arith.addf %156, %159 : vector<4x16xf32>
    %cst_168 = arith.constant dense<0.000000e+00> : vector<8x16xf32>
    %161 = tpu.matmul %35, %160, %cst_168 {dimension_numbers = #tpu.dot_dimension_numbers<[1], [0], [0], [1], [0, 0, 1, 1], [], []>, precision = #tpu.contract_precision<fp32>} : vector<8x4xf32>, vector<4x16xf32>, vector<8x16xf32> -> vector<8x16xf32>
    %162 = arith.addf %151, %161 : vector<8x16xf32>
    %c0_169 = arith.constant 0 : index
    %c0_170 = arith.constant 0 : index
    %c4_171 = arith.constant 4 : index
    %c0_172 = arith.constant 0 : index
    %c0_173 = arith.constant 0 : index
    %163 = vector.load %arg4[%c0_169, %c0_170, %c4_171, %c0_172, %c0_173] : memref<1x1x8x8x16xf32, #tpu.memory_space<vmem>>, vector<1x1x1x8x16xf32>
    %164 = vector.shape_cast %163 : vector<1x1x1x8x16xf32> to vector<8x16xf32>
    %165 = vector.shape_cast %162 : vector<8x16xf32> to vector<1x1x1x8x16xf32>
    tpu.vector_store %arg4[%c0_169, %c0_170, %c4_171, %c0_172, %c0_173], %165 {strides = array<i32>} : memref<1x1x8x8x16xf32, #tpu.memory_space<vmem>>, vector<1x1x1x8x16xf32>,
    %cst_174 = arith.constant 0.000000e+00 : f32
    %166 = vector.broadcast %cst_174 : f32 to vector<8x16xf32>
    %cst_175 = arith.constant 0.000000e+00 : f32
    %167 = vector.broadcast %cst_175 : f32 to vector<4x16xf32>
    %c0_176 = arith.constant 0 : index
    %c4_177 = arith.constant 4 : index
    %c2_178 = arith.constant 2 : index
    %c0_179 = arith.constant 0 : index
    %c0_180 = arith.constant 0 : index
    %168 = vector.load %arg3[%c0_176, %c4_177, %c2_178, %c0_179, %c0_180] : memref<1x8x4x4x8xf32, #tpu.memory_space<vmem>>, vector<1x1x1x4x8xf32>
    %169 = vector.shape_cast %168 : vector<1x1x1x4x8xf32> to vector<4x8xf32>
    %cst_181 = arith.constant dense<0.000000e+00> : vector<4x16xf32>
    %170 = tpu.matmul %169, %11, %cst_181 {dimension_numbers = #tpu.dot_dimension_numbers<[1], [0], [0], [1], [0, 0, 1, 1], [], []>, precision = #tpu.contract_precision<fp32>} : vector<4x8xf32>, vector<8x16xf32>, vector<4x16xf32> -> vector<4x16xf32>
    %171 = arith.addf %167, %170 : vector<4x16xf32>
    %c0_182 = arith.constant 0 : index
    %c5_183 = arith.constant 5 : index
    %c2_184 = arith.constant 2 : index
    %c0_185 = arith.constant 0 : index
    %c0_186 = arith.constant 0 : index
    %172 = vector.load %arg3[%c0_182, %c5_183, %c2_184, %c0_185, %c0_186] : memref<1x8x4x4x8xf32, #tpu.memory_space<vmem>>, vector<1x1x1x4x8xf32>
    %173 = vector.shape_cast %172 : vector<1x1x1x4x8xf32> to vector<4x8xf32>
    %cst_187 = arith.constant dense<0.000000e+00> : vector<4x16xf32>
    %174 = tpu.matmul %173, %19, %cst_187 {dimension_numbers = #tpu.dot_dimension_numbers<[1], [0], [0], [1], [0, 0, 1, 1], [], []>, precision = #tpu.contract_precision<fp32>} : vector<4x8xf32>, vector<8x16xf32>, vector<4x16xf32> -> vector<4x16xf32>
    %175 = arith.addf %171, %174 : vector<4x16xf32>
    %cst_188 = arith.constant dense<0.000000e+00> : vector<8x16xf32>
    %176 = tpu.matmul %27, %175, %cst_188 {dimension_numbers = #tpu.dot_dimension_numbers<[1], [0], [0], [1], [0, 0, 1, 1], [], []>, precision = #tpu.contract_precision<fp32>} : vector<8x4xf32>, vector<4x16xf32>, vector<8x16xf32> -> vector<8x16xf32>
    %177 = arith.addf %166, %176 : vector<8x16xf32>
    %cst_189 = arith.constant 0.000000e+00 : f32
    %178 = vector.broadcast %cst_189 : f32 to vector<4x16xf32>
    %c0_190 = arith.constant 0 : index
    %c6_191 = arith.constant 6 : index
    %c2_192 = arith.constant 2 : index
    %c0_193 = arith.constant 0 : index
    %c0_194 = arith.constant 0 : index
    %179 = vector.load %arg3[%c0_190, %c6_191, %c2_192, %c0_193, %c0_194] : memref<1x8x4x4x8xf32, #tpu.memory_space<vmem>>, vector<1x1x1x4x8xf32>
    %180 = vector.shape_cast %179 : vector<1x1x1x4x8xf32> to vector<4x8xf32>
    %cst_195 = arith.constant dense<0.000000e+00> : vector<4x16xf32>
    %181 = tpu.matmul %180, %11, %cst_195 {dimension_numbers = #tpu.dot_dimension_numbers<[1], [0], [0], [1], [0, 0, 1, 1], [], []>, precision = #tpu.contract_precision<fp32>} : vector<4x8xf32>, vector<8x16xf32>, vector<4x16xf32> -> vector<4x16xf32>
    %182 = arith.addf %178, %181 : vector<4x16xf32>
    %c0_196 = arith.constant 0 : index
    %c7_197 = arith.constant 7 : index
    %c2_198 = arith.constant 2 : index
    %c0_199 = arith.constant 0 : index
    %c0_200 = arith.constant 0 : index
    %183 = vector.load %arg3[%c0_196, %c7_197, %c2_198, %c0_199, %c0_200] : memref<1x8x4x4x8xf32, #tpu.memory_space<vmem>>, vector<1x1x1x4x8xf32>
    %184 = vector.shape_cast %183 : vector<1x1x1x4x8xf32> to vector<4x8xf32>
    %cst_201 = arith.constant dense<0.000000e+00> : vector<4x16xf32>
    %185 = tpu.matmul %184, %19, %cst_201 {dimension_numbers = #tpu.dot_dimension_numbers<[1], [0], [0], [1], [0, 0, 1, 1], [], []>, precision = #tpu.contract_precision<fp32>} : vector<4x8xf32>, vector<8x16xf32>, vector<4x16xf32> -> vector<4x16xf32>
    %186 = arith.addf %182, %185 : vector<4x16xf32>
    %cst_202 = arith.constant dense<0.000000e+00> : vector<8x16xf32>
    %187 = tpu.matmul %35, %186, %cst_202 {dimension_numbers = #tpu.dot_dimension_numbers<[1], [0], [0], [1], [0, 0, 1, 1], [], []>, precision = #tpu.contract_precision<fp32>} : vector<8x4xf32>, vector<4x16xf32>, vector<8x16xf32> -> vector<8x16xf32>
    %188 = arith.addf %177, %187 : vector<8x16xf32>
    %c0_203 = arith.constant 0 : index
    %c0_204 = arith.constant 0 : index
    %c5_205 = arith.constant 5 : index
    %c0_206 = arith.constant 0 : index
    %c0_207 = arith.constant 0 : index
    %189 = vector.load %arg4[%c0_203, %c0_204, %c5_205, %c0_206, %c0_207] : memref<1x1x8x8x16xf32, #tpu.memory_space<vmem>>, vector<1x1x1x8x16xf32>
    %190 = vector.shape_cast %189 : vector<1x1x1x8x16xf32> to vector<8x16xf32>
    %191 = vector.shape_cast %188 : vector<8x16xf32> to vector<1x1x1x8x16xf32>
    tpu.vector_store %arg4[%c0_203, %c0_204, %c5_205, %c0_206, %c0_207], %191 {strides = array<i32>} : memref<1x1x8x8x16xf32, #tpu.memory_space<vmem>>, vector<1x1x1x8x16xf32>,
    %cst_208 = arith.constant 0.000000e+00 : f32
    %192 = vector.broadcast %cst_208 : f32 to vector<8x16xf32>
    %cst_209 = arith.constant 0.000000e+00 : f32
    %193 = vector.broadcast %cst_209 : f32 to vector<4x16xf32>
    %c0_210 = arith.constant 0 : index
    %c0_211 = arith.constant 0 : index
    %c3_212 = arith.constant 3 : index
    %c0_213 = arith.constant 0 : index
    %c0_214 = arith.constant 0 : index
    %194 = vector.load %arg3[%c0_210, %c0_211, %c3_212, %c0_213, %c0_214] : memref<1x8x4x4x8xf32, #tpu.memory_space<vmem>>, vector<1x1x1x4x8xf32>
    %195 = vector.shape_cast %194 : vector<1x1x1x4x8xf32> to vector<4x8xf32>
    %cst_215 = arith.constant dense<0.000000e+00> : vector<4x16xf32>
    %196 = tpu.matmul %195, %11, %cst_215 {dimension_numbers = #tpu.dot_dimension_numbers<[1], [0], [0], [1], [0, 0, 1, 1], [], []>, precision = #tpu.contract_precision<fp32>} : vector<4x8xf32>, vector<8x16xf32>, vector<4x16xf32> -> vector<4x16xf32>
    %197 = arith.addf %193, %196 : vector<4x16xf32>
    %c0_216 = arith.constant 0 : index
    %c1_217 = arith.constant 1 : index
    %c3_218 = arith.constant 3 : index
    %c0_219 = arith.constant 0 : index
    %c0_220 = arith.constant 0 : index
    %198 = vector.load %arg3[%c0_216, %c1_217, %c3_218, %c0_219, %c0_220] : memref<1x8x4x4x8xf32, #tpu.memory_space<vmem>>, vector<1x1x1x4x8xf32>
    %199 = vector.shape_cast %198 : vector<1x1x1x4x8xf32> to vector<4x8xf32>
    %cst_221 = arith.constant dense<0.000000e+00> : vector<4x16xf32>
    %200 = tpu.matmul %199, %19, %cst_221 {dimension_numbers = #tpu.dot_dimension_numbers<[1], [0], [0], [1], [0, 0, 1, 1], [], []>, precision = #tpu.contract_precision<fp32>} : vector<4x8xf32>, vector<8x16xf32>, vector<4x16xf32> -> vector<4x16xf32>
    %201 = arith.addf %197, %200 : vector<4x16xf32>
    %cst_222 = arith.constant dense<0.000000e+00> : vector<8x16xf32>
    %202 = tpu.matmul %27, %201, %cst_222 {dimension_numbers = #tpu.dot_dimension_numbers<[1], [0], [0], [1], [0, 0, 1, 1], [], []>, precision = #tpu.contract_precision<fp32>} : vector<8x4xf32>, vector<4x16xf32>, vector<8x16xf32> -> vector<8x16xf32>
    %203 = arith.addf %192, %202 : vector<8x16xf32>
    %cst_223 = arith.constant 0.000000e+00 : f32
    %204 = vector.broadcast %cst_223 : f32 to vector<4x16xf32>
    %c0_224 = arith.constant 0 : index
    %c2_225 = arith.constant 2 : index
    %c3_226 = arith.constant 3 : index
    %c0_227 = arith.constant 0 : index
    %c0_228 = arith.constant 0 : index
    %205 = vector.load %arg3[%c0_224, %c2_225, %c3_226, %c0_227, %c0_228] : memref<1x8x4x4x8xf32, #tpu.memory_space<vmem>>, vector<1x1x1x4x8xf32>
    %206 = vector.shape_cast %205 : vector<1x1x1x4x8xf32> to vector<4x8xf32>
    %cst_229 = arith.constant dense<0.000000e+00> : vector<4x16xf32>
    %207 = tpu.matmul %206, %11, %cst_229 {dimension_numbers = #tpu.dot_dimension_numbers<[1], [0], [0], [1], [0, 0, 1, 1], [], []>, precision = #tpu.contract_precision<fp32>} : vector<4x8xf32>, vector<8x16xf32>, vector<4x16xf32> -> vector<4x16xf32>
    %208 = arith.addf %204, %207 : vector<4x16xf32>
    %c0_230 = arith.constant 0 : index
    %c3_231 = arith.constant 3 : index
    %c3_232 = arith.constant 3 : index
    %c0_233 = arith.constant 0 : index
    %c0_234 = arith.constant 0 : index
    %209 = vector.load %arg3[%c0_230, %c3_231, %c3_232, %c0_233, %c0_234] : memref<1x8x4x4x8xf32, #tpu.memory_space<vmem>>, vector<1x1x1x4x8xf32>
    %210 = vector.shape_cast %209 : vector<1x1x1x4x8xf32> to vector<4x8xf32>
    %cst_235 = arith.constant dense<0.000000e+00> : vector<4x16xf32>
    %211 = tpu.matmul %210, %19, %cst_235 {dimension_numbers = #tpu.dot_dimension_numbers<[1], [0], [0], [1], [0, 0, 1, 1], [], []>, precision = #tpu.contract_precision<fp32>} : vector<4x8xf32>, vector<8x16xf32>, vector<4x16xf32> -> vector<4x16xf32>
    %212 = arith.addf %208, %211 : vector<4x16xf32>
    %cst_236 = arith.constant dense<0.000000e+00> : vector<8x16xf32>
    %213 = tpu.matmul %35, %212, %cst_236 {dimension_numbers = #tpu.dot_dimension_numbers<[1], [0], [0], [1], [0, 0, 1, 1], [], []>, precision = #tpu.contract_precision<fp32>} : vector<8x4xf32>, vector<4x16xf32>, vector<8x16xf32> -> vector<8x16xf32>
    %214 = arith.addf %203, %213 : vector<8x16xf32>
    %c0_237 = arith.constant 0 : index
    %c0_238 = arith.constant 0 : index
    %c6_239 = arith.constant 6 : index
    %c0_240 = arith.constant 0 : index
    %c0_241 = arith.constant 0 : index
    %215 = vector.load %arg4[%c0_237, %c0_238, %c6_239, %c0_240, %c0_241] : memref<1x1x8x8x16xf32, #tpu.memory_space<vmem>>, vector<1x1x1x8x16xf32>
    %216 = vector.shape_cast %215 : vector<1x1x1x8x16xf32> to vector<8x16xf32>
    %217 = vector.shape_cast %214 : vector<8x16xf32> to vector<1x1x1x8x16xf32>
    tpu.vector_store %arg4[%c0_237, %c0_238, %c6_239, %c0_240, %c0_241], %217 {strides = array<i32>} : memref<1x1x8x8x16xf32, #tpu.memory_space<vmem>>, vector<1x1x1x8x16xf32>,
    %cst_242 = arith.constant 0.000000e+00 : f32
    %218 = vector.broadcast %cst_242 : f32 to vector<8x16xf32>
    %cst_243 = arith.constant 0.000000e+00 : f32
    %219 = vector.broadcast %cst_243 : f32 to vector<4x16xf32>
    %c0_244 = arith.constant 0 : index
    %c4_245 = arith.constant 4 : index
    %c3_246 = arith.constant 3 : index
    %c0_247 = arith.constant 0 : index
    %c0_248 = arith.constant 0 : index
    %220 = vector.load %arg3[%c0_244, %c4_245, %c3_246, %c0_247, %c0_248] : memref<1x8x4x4x8xf32, #tpu.memory_space<vmem>>, vector<1x1x1x4x8xf32>
    %221 = vector.shape_cast %220 : vector<1x1x1x4x8xf32> to vector<4x8xf32>
    %cst_249 = arith.constant dense<0.000000e+00> : vector<4x16xf32>
    %222 = tpu.matmul %221, %11, %cst_249 {dimension_numbers = #tpu.dot_dimension_numbers<[1], [0], [0], [1], [0, 0, 1, 1], [], []>, precision = #tpu.contract_precision<fp32>} : vector<4x8xf32>, vector<8x16xf32>, vector<4x16xf32> -> vector<4x16xf32>
    %223 = arith.addf %219, %222 : vector<4x16xf32>
    %c0_250 = arith.constant 0 : index
    %c5_251 = arith.constant 5 : index
    %c3_252 = arith.constant 3 : index
    %c0_253 = arith.constant 0 : index
    %c0_254 = arith.constant 0 : index
    %224 = vector.load %arg3[%c0_250, %c5_251, %c3_252, %c0_253, %c0_254] : memref<1x8x4x4x8xf32, #tpu.memory_space<vmem>>, vector<1x1x1x4x8xf32>
    %225 = vector.shape_cast %224 : vector<1x1x1x4x8xf32> to vector<4x8xf32>
    %cst_255 = arith.constant dense<0.000000e+00> : vector<4x16xf32>
    %226 = tpu.matmul %225, %19, %cst_255 {dimension_numbers = #tpu.dot_dimension_numbers<[1], [0], [0], [1], [0, 0, 1, 1], [], []>, precision = #tpu.contract_precision<fp32>} : vector<4x8xf32>, vector<8x16xf32>, vector<4x16xf32> -> vector<4x16xf32>
    %227 = arith.addf %223, %226 : vector<4x16xf32>
    %cst_256 = arith.constant dense<0.000000e+00> : vector<8x16xf32>
    %228 = tpu.matmul %27, %227, %cst_256 {dimension_numbers = #tpu.dot_dimension_numbers<[1], [0], [0], [1], [0, 0, 1, 1], [], []>, precision = #tpu.contract_precision<fp32>} : vector<8x4xf32>, vector<4x16xf32>, vector<8x16xf32> -> vector<8x16xf32>
    %229 = arith.addf %218, %228 : vector<8x16xf32>
    %cst_257 = arith.constant 0.000000e+00 : f32
    %230 = vector.broadcast %cst_257 : f32 to vector<4x16xf32>
    %c0_258 = arith.constant 0 : index
    %c6_259 = arith.constant 6 : index
    %c3_260 = arith.constant 3 : index
    %c0_261 = arith.constant 0 : index
    %c0_262 = arith.constant 0 : index
    %231 = vector.load %arg3[%c0_258, %c6_259, %c3_260, %c0_261, %c0_262] : memref<1x8x4x4x8xf32, #tpu.memory_space<vmem>>, vector<1x1x1x4x8xf32>
    %232 = vector.shape_cast %231 : vector<1x1x1x4x8xf32> to vector<4x8xf32>
    %cst_263 = arith.constant dense<0.000000e+00> : vector<4x16xf32>
    %233 = tpu.matmul %232, %11, %cst_263 {dimension_numbers = #tpu.dot_dimension_numbers<[1], [0], [0], [1], [0, 0, 1, 1], [], []>, precision = #tpu.contract_precision<fp32>} : vector<4x8xf32>, vector<8x16xf32>, vector<4x16xf32> -> vector<4x16xf32>
    %234 = arith.addf %230, %233 : vector<4x16xf32>
    %c0_264 = arith.constant 0 : index
    %c7_265 = arith.constant 7 : index
    %c3_266 = arith.constant 3 : index
    %c0_267 = arith.constant 0 : index
    %c0_268 = arith.constant 0 : index
    %235 = vector.load %arg3[%c0_264, %c7_265, %c3_266, %c0_267, %c0_268] : memref<1x8x4x4x8xf32, #tpu.memory_space<vmem>>, vector<1x1x1x4x8xf32>
    %236 = vector.shape_cast %235 : vector<1x1x1x4x8xf32> to vector<4x8xf32>
    %cst_269 = arith.constant dense<0.000000e+00> : vector<4x16xf32>
    %237 = tpu.matmul %236, %19, %cst_269 {dimension_numbers = #tpu.dot_dimension_numbers<[1], [0], [0], [1], [0, 0, 1, 1], [], []>, precision = #tpu.contract_precision<fp32>} : vector<4x8xf32>, vector<8x16xf32>, vector<4x16xf32> -> vector<4x16xf32>
    %238 = arith.addf %234, %237 : vector<4x16xf32>
    %cst_270 = arith.constant dense<0.000000e+00> : vector<8x16xf32>
    %239 = tpu.matmul %35, %238, %cst_270 {dimension_numbers = #tpu.dot_dimension_numbers<[1], [0], [0], [1], [0, 0, 1, 1], [], []>, precision = #tpu.contract_precision<fp32>} : vector<8x4xf32>, vector<4x16xf32>, vector<8x16xf32> -> vector<8x16xf32>
    %240 = arith.addf %229, %239 : vector<8x16xf32>
    %c0_271 = arith.constant 0 : index
    %c0_272 = arith.constant 0 : index
    %c7_273 = arith.constant 7 : index
    %c0_274 = arith.constant 0 : index
    %c0_275 = arith.constant 0 : index
    %241 = vector.load %arg4[%c0_271, %c0_272, %c7_273, %c0_274, %c0_275] : memref<1x1x8x8x16xf32, #tpu.memory_space<vmem>>, vector<1x1x1x8x16xf32>
    %242 = vector.shape_cast %241 : vector<1x1x1x8x16xf32> to vector<8x16xf32>
    %243 = vector.shape_cast %240 : vector<8x16xf32> to vector<1x1x1x8x16xf32>
    tpu.vector_store %arg4[%c0_271, %c0_272, %c7_273, %c0_274, %c0_275], %243 {strides = array<i32>} : memref<1x1x8x8x16xf32, #tpu.memory_space<vmem>>, vector<1x1x1x8x16xf32>,
    return
  }
  func.func @transform_0(%arg0: i32, %arg1: i32, %arg2: i32) -> (i32, i32, i32, i32, i32) {
    %c0_i32 = arith.constant 0 : i32
    %c0_i32_0 = arith.constant 0 : i32
    %c0_i32_1 = arith.constant 0 : i32
    return %arg0, %arg1, %arg2, %c0_i32, %c0_i32_0 : i32, i32, i32, i32, i32
  }
  func.func @transform_1(%arg0: i32, %arg1: i32, %arg2: i32) -> (i32, i32, i32, i32, i32) {
    %c0_i32 = arith.constant 0 : i32
    %c0_i32_0 = arith.constant 0 : i32
    %c0_i32_1 = arith.constant 0 : i32
    return %arg0, %arg1, %arg2, %c0_i32, %c0_i32_0 : i32, i32, i32, i32, i32
  }
}

</mosaic_0001>

<bundles_post_ra>
// kernel: pixel_shuffle3d.1
= control target key start
LH: loop header
LB: loop body
LE: loop exit
PB: predicated region body
PF: predicated region fallthrough
CT: control target
= control target key end

     0   :  { %6 = vsyncpa [#allocation3], 0  ;;  %s26150_s0 = inlined_call_operand.vmem [shape: f32[2,16,4,4,8], index: 0, kind: input, shape index: {}]   ;;  %s26151_s1 = inlined_call_operand.hbm [shape: f32[2,2,8,8,16], index: 1, kind: output, shape index: {}]  }
   0x1   :  { %8 = vsyncpa [#allocation3 + $0x1], 0  ;;  %s24149_s6 = smov 0   ;;  %s24151_s7 = smov 0  }
   0x2   :  { %s24153_s8 = smov 0   ;;  %s24155_s9 = smov 0  }
   0x3   :  { %s24157_s10 = smov 0   ;;  %s24159_s11 = smov 0  }
   0x4   :  { %s24161_s12 = smov 0   ;;  %s24163_s13 = smov 0  }
   0x5 LB: > { %s21749_s14 = sadd.s32 4294967295, %s24131_s13   ;;  %s21750_s15 = sadd.s32 4294967294, %s24131_s13   ;;  %s24131_s13 = sphi %s24163_s13, %s14_s13   ;;  %s24127_s12 = sphi %s24161_s12, %s26164_s12   ;;  %s24123_s11 = sphi %s24159_s11, %s26163_s11   ;;  %s24119_s10 = sphi %s24157_s10, %s26162_s10   ;;  %s24115_s9 = sphi %s24155_s9, %s26161_s9   ;;  %s24111_s8 = sphi %s24153_s8, %s26160_s8   ;;  %s24107_s7 = sphi %s24151_s7, %s26159_s7   ;;  %s24103_s6 = sphi %s24149_s6, %s26158_s6  }
   0x6   : > { %s29_s16 = sadd.s32 1, %s24123_s11  ;;  %s33_s17 = sadd.s32 1, %s24127_s12 }
   0x7   : > { %p31_p0 = scmp.ge.s32.totalorder %s29_s16, 2  ;;  %p84_p1 = scmp.ne.s32.totalorder %s24111_s8, %s24107_s7 }
   0x8   : > { %p85_p2 = scmp.eq.s32.totalorder %s21749_s14, 3  ;;  %p90_p5 = scmp.ne.s32.totalorder %s24107_s7, %s24103_s6 }
   0x9   : > { %s26166_s16 = smov (%p31_p0, %s29_s16), 0  ;;  %s26168_s17 = smov (!%p31_p0, %s33_s17), %s24127_s12 }
   0xa   : > { %s68_s18 = ssub.s32 %s24123_s11, %s26166_s16  ;;  %p24200_p3 = por %p85_p2, %p84_p1 }
   0xb   : > { %p35_p4 = scmp.ge.s32.totalorder %s26168_s17, 2  ;;  %p91_p6 = scmp.eq.s32.totalorder %s21750_s15, 3 }
   0xc   : > { %p21753_p7 = scmp.ge.s32.totalorder %s24131_s13, 1  ;;  %p128_p9 = scmp.lt.s32.totalorder %s24131_s13, 5 }
   0xd   : > { %s26170_s17 = smov (%p35_p4, %s26168_s17), 0  ;;  %p24209_p8 = por %p91_p6, %p90_p5 }
   0xe   : > { %s67_s21 = ssub.s32 %s24127_s12, %s26170_s17  ;;  %s74_s22 = sadd.s32 1, %s24111_s8 }
   0xf   : > { %s69_s23 = sor.u32 %s68_s18, %s67_s21  ;;  %p129_p10 = pnand %p21753_p7, %p128_p9 }
  0x10   : > { %p72_p11 = scmp.eq.s32.totalorder %s69_s23, 0  ;;  %s24221_s25 = sshll.u32 (!%p129_p10), %s24115_s9, 3 }
  0x11   : > { %132 = sbr.rel (%p129_p10) target bundleno = 2450 (0x992), region = 24  ;;  %p159_p12 = scmp.lt.s32.totalorder (!%p129_p10), %s24119_s10, 1 }
  0x12   : > { %s24218_s24 = scalar_select %p72_p11, %s24111_s8, %s74_s22  }
  0x13   : > { %p161_p13 = scmp.lt.s32.totalorder (!%p129_p10), %s24221_s25, 15  ;;  %s154_s9 = sand.u32 (!%p129_p10), 1, %s24107_s7  }
  0x14   : > { %s21754_s14 = sshll.u32 (!%p129_p10), %s154_s9, 6  ;;  %s21943_s18 = sshll.u32 (!%p129_p10), %s24119_s10, 4 }
  0x15   : > { %s24675_s15 = scalar_lea.vmem (!%p129_p10), [#allocation2], %s21754_s14  ;;  %s21653_s21 = sadd.s32 (!%p129_p10), %s21943_s18, %s24221_s25 }
  0x16   : > { %v174_v0 = vlaneseq  ;;  %v24133_v1 = vmov 0.0   ;;  %vm24134_vm0 = vmmov 0   ;;  %s160_s26 = scalar_select %p159_p12, %s24119_s10, 1  ;;  %vm193_vm2 = vcmask 64512  }
  0x17   : > { %22523 = vmatprep.subr.mxu0 %v24133_v1  ;;  %22528 = vmatprep.subr.mxu1 %v24133_v1  ;;  %s162_s27 = scalar_select %p161_p13, %s24221_s25, 15  ;;  %v24135_v8 = vmov 1.0   ;;  %vm1970_vm5 = vcmask 31744   ;;  %vm1974_vm7 = vcmask 1043456   ;;  %vm2876_vm8 = vcmask 130048  }
  0x18   : > { %v24227_v2 = vshrl.u32 %v174_v0, 7  ;;  %22525 = vmatprep.mubr.msk.f32.mxu0 %vm24134_vm0, %v24133_v1  ;;  %22530 = vmatprep.mubr.msk.f32.mxu1 %vm24134_vm0, %v24133_v1  ;;  %v24235_v3 = vand.u32 127, %v174_v0  ;;  %s21757_s28 = sshll.u32 %s160_s26, 6  ;;  %s21944_s22 = sshll.u32 %s21653_s21, 7 }
  0x19   : > { %s21756_s29 = sshll.u32 %s162_s27, 2  ;;  %s21656_s23 = sshll.u32 %s24675_s15, 4  ;;  %s26093_s23 = int_to_ptr.vmem [resolvable:$true] %s21656_s23 }
  0x1a   : > { %v178_v4 = vmul.u32 2, %v24227_v2  ;;  %s168_s30 = sadd.s32 %s21757_s28, %s21756_s29  ;;  %s26091_s10 = scalar_lea.hbm %s26151_s1, %s21944_s22 }
  0x1b   : > { %s21758_s2 = sshll.u32 %s168_s30, 2  ;;  %s26099_s25 = scalar_lea.sflag [#allocation3], %s154_s9 }
  0x1c   : > { %v181_v5 = vadd.s32 1, %v178_v4  ;;  %vm24239_vm1 = vcmp.eq.s32.totalorder %v24235_v3, %v178_v4  ;;  %s24251_s5 = scalar_lea.vmem %s26150_s0, %s21758_s2  ;;  %s24039_s28 = scalar_lea.vmem %s26093_s23, 1024 }
  0x1d   : > { %v21759_v10 = vld [vmem:[%s24251_s5 + $0x10] sm:$0xf]  ;;  %v180_v11 = vsel %vm24239_vm1, 1.0, %v24133_v1  ;;  %v190_v12 = vld [vmem:[%s24251_s5] sm:$0xf]  ;;  %p24040_p0 = scmp.ne.s32.totalorder %s26093_s23, %s24039_s28  ;;  %s24136_s29 = smov [#allocation2]  }
  0x1e   : > { %vm24244_vm3 = vcmp.eq.s32.totalorder %v24235_v3, %v181_v5  ;;  %v195_v14 = vsel %vm193_vm2, %v21759_v10, 0  ;;  %v638_v15 = vsel %vm193_vm2, %v190_v12, 0  ;;  %v24272_v18 = vsub.f32 %v180_v11, %v180_v11  ;;  %v21767_v28 = vld [vmem:[%s24251_s5 + $0x30] sm:$0xf]  ;;  %v21766_v37 = vld [vmem:[%s24251_s5 + $0x20] sm:$0xf] }
  0x1f   : > { %22524 = vmatpush3.msk.msra.mxu0 %vm24244_vm3, %v24135_v8  ;;  %v183_v9 = vsel %vm24244_vm3, 1.0, %v24133_v1  ;;  %v262_v16 = vand.u32 4294901760, %v195_v14  ;;  %v24274_v20 = vand.u32 4294901760, %v638_v15  ;;  %v1085_v31 = vsel %vm193_vm2, %v21767_v28, 0  ;;  %p24041_p1 = pnand %p24040_p0, %p24200_p3  ;;  %s24043_s30 = sshll.u32 %s24136_s29, 4  ;;  %s24044_s30 = int_to_ptr.vmem [resolvable:$false] %s24043_s30 }
  0x20   : > { %v24264_v13 = vsub.f32 %v183_v9, %v183_v9  ;;  %22533 = vmatprep.subr.mxu0 %v24133_v1  ;;  %v24281_v24 = vand.u32 4294901760, %v24272_v18  ;;  %v24308_v34 = vand.u32 4294901760, %v1085_v31  ;;  %v1528_v39 = vsel %vm193_vm2, %v21766_v37, 0  ;;  %s24045_s2 = scalar_lea.vmem %s24044_s30, 2048  ;;  %p24046_p4 = scmp.lt.s32.totalorder %s26093_s23, %s24044_s30 }
  0x21   : > { %v263_v19 = vsub.f32 %v195_v14, %v262_v16  ;;  %v706_v26 = vsub.f32 %v638_v15, %v24274_v20  ;;  %v1595_v41 = vand.u32 4294901760, %v1528_v39  ;;  %p24042_p2 = pneg %p24041_p1  ;;  %p24047_p5 = scmp.lt.s32.totalorder %s24045_s2, %s24039_s28 }
  0x22   : > { %v24270_v17 = vand.u32 4294901760, %v24264_v13  ;;  %v748_v29 = vsub.f32 %v24272_v18, %v24281_v24  ;;  %v1153_v36 = vsub.f32 %v1085_v31, %v24308_v34 }
  0x23   : > { %v264_v22 = vand.u32 4294901760, %v263_v19  ;;  %v707_v30 = vand.u32 4294901760, %v706_v26  ;;  %v1596_v43 = vsub.f32 %v1528_v39, %v1595_v41  ;;  %p24048_p6 = por %p24047_p5, %p24046_p4 }
  0x24   : > { %v305_v21 = vsub.f32 %v24264_v13, %v24270_v17  ;;  %v24305_v32 = vand.u32 4294901760, %v748_v29  ;;  %v1154_v38 = vand.u32 4294901760, %v1153_v36 }
  0x25   : > { %v265_v25 = vsub.f32 %v263_v19, %v264_v22  ;;  %v708_v33 = vsub.f32 %v706_v26, %v707_v30  ;;  %v1597_v44 = vand.u32 4294901760, %v1596_v43  ;;  %p24049_p7 = pnand %p24048_p6, %p24042_p2 }
  0x26   : > { %v24278_v23 = vand.u32 4294901760, %v305_v21  ;;  %v1155_v40 = vsub.f32 %v1153_v36, %v1154_v38 }
  0x27   : > { %v266_v27 = vand.u32 4294901760, %v265_v25  ;;  %v709_v35 = vand.u32 4294901760, %v708_v33  ;;  %v1598_v45 = vsub.f32 %v1596_v43, %v1597_v44 }
  0x28   : > { %22529 = vmatpush3.msra.mxu1 %v24278_v23  ;;  %v1156_v42 = vand.u32 4294901760, %v1155_v40 }
  0x29   : > { %22531 = vmatmul.mubr.f32.vlgmr.msra.gmra.mxu1 %v262_v16  ;;  %22538 = vmatprep.subr.mxu1 %v24133_v1  ;;  %v1599_v46 = vand.u32 4294901760, %v1598_v45 }
  0x2a   : > { %22539 = vmatpush3.msk.msra.mxu1 %vm24244_vm3, %v24135_v8  ;;  %22540 = vmatprep.mubr.msk.f32.mxu1 %vm24134_vm0, %v24133_v1 }
  0x2b   : > { %22526 = vmatmul.mubr.f32.vlgmr.msra.gmra.mxu0 %v266_v27  ;;  %22548 = vmatprep.subr.mxu1 %v24133_v1 }
  0x2c   : > { %22534 = vmatpush3.msra.mxu0 %v24264_v13  ;;  %22535 = vmatprep.mubr.msk.f32.mxu0 %vm24134_vm0, %v24133_v1 }
  0x2d   : > { %22541 = vmatmul.mubr.f32.vlgmr.msra.gmra.mxu1 %v264_v22  ;;  %22543 = vmatprep.subr.mxu0 %v24133_v1 }
  0x2e   : > { %22549 = vmatpush3.msk.msra.mxu1 %vm24244_vm3, %v24135_v8  ;;  %22550 = vmatprep.mubr.msk.f32.mxu1 %vm24134_vm0, %v24133_v1 }
  0x2f   : > { %22536 = vmatmul.mubr.f32.vlgmr.msra.gmra.mxu0 %v263_v19  ;;  %22558 = vmatprep.subr.mxu1 %v24133_v1  ;;  %v184_v19 = vmul.u32 2, %v24235_v3 }
  0x30   : > { %22544 = vmatpush3.msra.mxu0 %v24270_v17  ;;  %22545 = vmatprep.mubr.msk.f32.mxu0 %vm24134_vm0, %v24133_v1 }
  0x31   : > { %22551 = vmatmul.mubr.f32.vlgmr.msra.gmra.mxu1 %v262_v16  ;;  %22553 = vmatprep.subr.mxu0 %v24133_v1  ;;  %v187_v27 = vadd.s32 1, %v184_v19  ;;  %vm185_vm6 = vcmp.eq.s32.totalorder %v24227_v2, %v184_v19 }
  0x32   : > { %22559 = vmatpush3.msra.mxu1 %v24305_v32  ;;  %22560 = vmatprep.mubr.msk.f32.mxu1 %vm24134_vm0, %v24133_v1 }
  0x33   : > { %22546 = vmatmul.mubr.f32.vlgmr.msra.gmra.mxu0 %v262_v16  ;;  %22568 = vmatprep.subr.mxu1 %v24133_v1  ;;  %vm188_vm4 = vcmp.eq.s32.totalorder %v24227_v2, %v187_v27 }
  0x34   : > { %22554 = vmatpush3.msk.msra.mxu0 %vm24239_vm1, %v24135_v8  ;;  %22555 = vmatprep.mubr.msk.f32.mxu0 %vm24134_vm0, %v24133_v1  ;;  %v24420_v3 = vsel %vm188_vm4, 1.0, %v24133_v1 }
  0x35   : > { %22561 = vmatmul.mubr.f32.vlgmr.msra.gmra.mxu1 %v24274_v20  ;;  %22563 = vmatprep.subr.mxu0 %v24133_v1 }
  0x36   : > { %22569 = vmatpush3.msk.msra.mxu1 %vm24239_vm1, %v24135_v8  ;;  %22570 = vmatprep.mubr.msk.f32.mxu1 %vm24134_vm0, %v24133_v1 }
  0x37   : > { %22556 = vmatmul.mubr.f32.vlgmr.msra.gmra.mxu0 %v709_v35  ;;  %22578 = vmatprep.subr.mxu1 %v24133_v1 }
  0x38   : > { %22564 = vmatpush3.msra.mxu0 %v24272_v18  ;;  %22565 = vmatprep.mubr.msk.f32.mxu0 %vm24134_vm0, %v24133_v1 }
  0x39   : > { %22571 = vmatmul.mubr.f32.vlgmr.msra.gmra.mxu1 %v707_v30  ;;  %22573 = vmatprep.subr.mxu0 %v24133_v1 }
  0x3a   : > { %22579 = vmatpush3.msk.msra.mxu1 %vm24239_vm1, %v24135_v8  ;;  %22580 = vmatprep.mubr.msk.f32.mxu1 %vm24134_vm0, %v24133_v1 }
  0x3b   : > { %22566 = vmatmul.mubr.f32.vlgmr.msra.gmra.mxu0 %v706_v26  ;;  %22588 = vmatprep.subr.mxu1 %v24133_v1 }
  0x3c   : > { %22574 = vmatpush3.msra.mxu0 %v24281_v24  ;;  %22575 = vmatprep.mubr.msk.f32.mxu0 %vm24134_vm0, %v24133_v1 }
  0x3d   : > { %22581 = vmatmul.mubr.f32.vlgmr.msra.gmra.mxu1 %v24274_v20  ;;  %22583 = vmatprep.subr.mxu0 %v24133_v1 }
  0x3e   : > { %22589 = vmatpush3.msra.mxu1 %v24278_v23  ;;  %22590 = vmatprep.mubr.msk.f32.mxu1 %vm24134_vm0, %v24133_v1 }
  0x3f   : > { %22576 = vmatmul.mubr.f32.vlgmr.msra.gmra.mxu0 %v24274_v20  ;;  %22598 = vmatprep.subr.mxu1 %v24133_v1 }
  0x40   : > { %22584 = vmatpush3.msk.msra.mxu0 %vm24244_vm3, %v24135_v8  ;;  %22585 = vmatprep.mubr.msk.f32.mxu0 %vm24134_vm0, %v24133_v1 }
  0x41   : > { %22591 = vmatmul.mubr.f32.vlgmr.msra.gmra.mxu1 %v24308_v34  ;;  %22593 = vmatprep.subr.mxu0 %v24133_v1 }
  0x42   : > { %22599 = vmatpush3.msk.msra.mxu1 %vm24244_vm3, %v24135_v8  ;;  %22600 = vmatprep.mubr.msk.f32.mxu1 %vm24134_vm0, %v24133_v1 }
  0x43   : > { %22586 = vmatmul.mubr.f32.vlgmr.msra.gmra.mxu0 %v1156_v42  ;;  %22608 = vmatprep.subr.mxu1 %v24133_v1 }
  0x44   : > { %22594 = vmatpush3.msra.mxu0 %v24264_v13  ;;  %22595 = vmatprep.mubr.msk.f32.mxu0 %vm24134_vm0, %v24133_v1 }
  0x45   : > { %22601 = vmatmul.mubr.f32.vlgmr.msra.gmra.mxu1 %v1154_v38  ;;  %22603 = vmatprep.subr.mxu0 %v24133_v1 }
  0x46   : > { %22609 = vmatpush3.msk.msra.mxu1 %vm24244_vm3, %v24135_v8  ;;  %22610 = vmatprep.mubr.msk.f32.mxu1 %vm24134_vm0, %v24133_v1 }
  0x47   : > { %22596 = vmatmul.mubr.f32.vlgmr.msra.gmra.mxu0 %v1153_v36  ;;  %22618 = vmatprep.subr.mxu1 %v24133_v1 }
  0x48   : > { %22604 = vmatpush3.msra.mxu0 %v24270_v17  ;;  %22605 = vmatprep.mubr.msk.f32.mxu0 %vm24134_vm0, %v24133_v1 }
  0x49   : > { %22611 = vmatmul.mubr.f32.vlgmr.msra.gmra.mxu1 %v24308_v34  ;;  %22613 = vmatprep.subr.mxu0 %v24133_v1 }
  0x4a   : > { %22619 = vmatpush3.msra.mxu1 %v24305_v32  ;;  %22620 = vmatprep.mubr.msk.f32.mxu1 %vm24134_vm0, %v24133_v1 }
  0x4b   : > { %22606 = vmatmul.mubr.f32.vlgmr.msra.gmra.mxu0 %v24308_v34  ;;  %22628 = vmatprep.subr.mxu1 %v24133_v1 }
  0x4c   : > { %22614 = vmatpush3.msk.msra.mxu0 %vm24239_vm1, %v24135_v8  ;;  %22615 = vmatprep.mubr.msk.f32.mxu0 %vm24134_vm0, %v24133_v1 }
  0x4d   : > { %22621 = vmatmul.mubr.f32.vlgmr.msra.gmra.mxu1 %v1595_v41  ;;  %22623 = vmatprep.subr.mxu0 %v24133_v1 }
  0x4e   : > { %22629 = vmatpush3.msk.msra.mxu1 %vm24239_vm1, %v24135_v8  ;;  %22630 = vmatprep.mubr.msk.f32.mxu1 %vm24134_vm0, %v24133_v1 }
  0x4f   : > { %22616 = vmatmul.mubr.f32.vlgmr.msra.gmra.mxu0 %v1599_v46  ;;  %22638 = vmatprep.subr.mxu1 %v24133_v1  ;;  %v1972_v46 = vsel %vm1970_vm5, %v24420_v3, 0 }
  0x50   : > { %22624 = vmatpush3.msra.mxu0 %v24272_v18  ;;  %22625 = vmatprep.mubr.msk.f32.mxu0 %vm24134_vm0, %v24133_v1 }
  0x51   : > { %22631 = vmatmul.mubr.f32.vlgmr.msra.gmra.mxu1 %v1597_v44  ;;  %22633 = vmatprep.subr.mxu0 %v24133_v1 }
  0x52   : > { %22639 = vmatpush3.msk.msra.mxu1 %vm24239_vm1, %v24135_v8  ;;  %22640 = vmatprep.mubr.msk.f32.mxu1 %vm24134_vm0, %v24133_v1 }
  0x53   : > { %22626 = vmatmul.mubr.f32.vlgmr.msra.gmra.mxu0 %v1596_v43  ;;  %22648 = vmatprep.subr.mxu1 %v24133_v1 }
  0x54   : > { %22634 = vmatpush3.msra.mxu0 %v24281_v24  ;;  %22635 = vmatprep.mubr.msk.f32.mxu0 %vm24134_vm0, %v24133_v1 }
  0x55   : > { %22641 = vmatmul.mubr.f32.vlgmr.msra.gmra.mxu1 %v1595_v41  ;;  %22643 = vmatprep.subr.mxu0 %v24133_v1 }
  0x56   : > { %22650 = vmatprep.mubr.msk.f32.mxu1 %vm24134_vm0, %v24133_v1 }
  0x57   : > { %22636 = vmatmul.mubr.f32.vlgmr.msra.gmra.mxu0 %v1595_v41 }
  0x58   : > { %22645 = vmatprep.mubr.msk.f32.mxu0 %vm24134_vm0, %v24133_v1 }
  0xe9   : > { %v343_v47 = vpop.f32.mrf.mxu1 }
  0xeb   : > { %v268_v48 = vpop.f32.mrf.mxu0  ;;  %v22532_v49 = vpop.f32.mrf.mxu1 }
  0xec   : > { %v344_v56 = vadd.f32 %v343_v47, %v268_v48 }
  0xed   : > { %v22527_v50 = vpop.f32.mrf.mxu0  ;;  %v489_v51 = vpop.f32.mrf.mxu1 }
  0xef   : > { %v416_v52 = vpop.f32.mrf.mxu0  ;;  %v22542_v53 = vpop.f32.mrf.mxu1 }
  0xf0   : > { %v417_v59 = vadd.f32 %v416_v52, %v344_v56  ;;  %v24424_v52 = vsub.f32 %v1972_v46, %v1972_v46 }
  0xf1   : > { %v22537_v54 = vpop.f32.mrf.mxu0  ;;  %v633_v55 = vpop.f32.mrf.mxu1 }
  0xf2   : > { %v490_v0 = vadd.f32 %v489_v51, %v417_v59 }
  0xf3   : > { %v562_v57 = vpop.f32.mrf.mxu0  ;;  %v22552_v58 = vpop.f32.mrf.mxu1 }
  0xf4   : > { %v563_v11 = vadd.f32 %v562_v57, %v490_v0 }
  0xf5   : > { %v22547_v60 = vpop.f32.mrf.mxu0  ;;  %v786_v61 = vpop.f32.mrf.mxu1 }
  0xf6   : > { %v634_v20 = vadd.f32 %v633_v55, %v563_v11  ;;  %v24427_v60 = vand.u32 4294901760, %v24424_v52 }
  0xf7   : > { %v711_v62 = vpop.f32.mrf.mxu0  ;;  %v22562_v63 = vpop.f32.mrf.mxu1 }
  0xf8   : > { %v712_v28 = vadd.f32 %v711_v62, %v634_v20  ;;  %v2047_v11 = vsub.f32 %v24424_v52, %v24427_v60 }
  0xf9   : > { %v22557_v4 = vpop.f32.mrf.mxu0  ;;  %v932_v5 = vpop.f32.mrf.mxu1 }
  0xfa   : > { %v787_v35 = vadd.f32 %v786_v61, %v712_v28  ;;  %v24439_v20 = vand.u32 4294901760, %v2047_v11 }
  0xfb   : > { %v859_v9 = vpop.f32.mrf.mxu0  ;;  %v22572_v10 = vpop.f32.mrf.mxu1 }
  0xfc   : > { %v860_v42 = vadd.f32 %v859_v9, %v787_v35 }
  0xfd   : > { %v22567_v12 = vpop.f32.mrf.mxu0  ;;  %v1076_v14 = vpop.f32.mrf.mxu1 }
  0xfe   : > { %v933_v50 = vadd.f32 %v932_v5, %v860_v42  ;;  %v24431_v5 = vsel %vm185_vm6, 1.0, %v24133_v1 }
  0xff   : > { %v1005_v15 = vpop.f32.mrf.mxu0  ;;  %v22582_v16 = vpop.f32.mrf.mxu1  ;;  %v2425_v2 = vsel %vm1970_vm5, %v24431_v5, 0 }
 0x100   : > { %v1006_v58 = vadd.f32 %v1005_v15, %v933_v50 }
 0x101   : > { %v22577_v21 = vpop.f32.mrf.mxu0  ;;  %v1233_v22 = vpop.f32.mrf.mxu1 }
 0x102   : > { %v1077_v9 = vadd.f32 %v1076_v14, %v1006_v58 }
 0x103   : > { %v1158_v25 = vpop.f32.mrf.mxu0  ;;  %v22592_v26 = vpop.f32.mrf.mxu1 }
 0x104   : > { %v1234_v31 = vadd.f32 %v1233_v22, %v1158_v25  ;;  %v2428_v16 = vsel %vm1974_vm7, %v1077_v9, 0  ;;  %v24441_v22 = vsub.f32 %v2425_v2, %v2425_v2  ;;  %v21781_v26 = vld [vmem:[%s24251_s5 + $0x50] sm:$0xf] }
 0x105   : > { %v22587_v29 = vpop.f32.mrf.mxu0  ;;  %v1379_v30 = vpop.f32.mrf.mxu1  ;;  %v24443_v14 = vand.u32 4294901760, %v2428_v16 }
 0x106   : > { %v24451_v28 = vand.u32 4294901760, %v24441_v22 }
 0x107   : > { %v1306_v33 = vpop.f32.mrf.mxu0  ;;  %v22602_v34 = vpop.f32.mrf.mxu1  ;;  %v2538_v29 = vsub.f32 %v2428_v16, %v24443_v14 }
 0x108   : > { %v1307_v36 = vadd.f32 %v1306_v33, %v1234_v31  ;;  %v2883_v31 = vsel %vm193_vm2, %v21781_v26, 0  ;;  %v2499_v34 = vsub.f32 %v24441_v22, %v24451_v28 }
 0x109   : > { %v22597_v37 = vpop.f32.mrf.mxu0  ;;  %v1523_v38 = vpop.f32.mrf.mxu1  ;;  %v24462_v35 = vand.u32 4294901760, %v2883_v31 }
 0x10a   : > { %v1380_v39 = vadd.f32 %v1379_v30, %v1307_v36  ;;  %v2539_v36 = vand.u32 4294901760, %v2538_v29  ;;  %v24469_v37 = vand.u32 4294901760, %v2499_v34 }
 0x10b   : > { %v1452_v40 = vpop.f32.mrf.mxu0  ;;  %v22612_v41 = vpop.f32.mrf.mxu1 }
 0x10c   : > { %v1453_v43 = vadd.f32 %v1452_v40, %v1380_v39  ;;  %v2540_v39 = vsub.f32 %v2538_v29, %v2539_v36  ;;  %v21780_v40 = vld [vmem:[%s24251_s5 + $0x40] sm:$0xf] }
 0x10d   : > { %v22607_v44 = vpop.f32.mrf.mxu0  ;;  %v1676_v45 = vpop.f32.mrf.mxu1 }
 0x10e   : > { %v1524_v47 = vadd.f32 %v1523_v38, %v1453_v43  ;;  %v24475_v38 = vsub.f32 %v2883_v31, %v24462_v35  ;;  %v2541_v42 = vand.u32 4294901760, %v2540_v39  ;;  %v3326_v43 = vsel %vm193_vm2, %v21780_v40, 0 }
 0x10f   : > { %v1601_v48 = vpop.f32.mrf.mxu0  ;;  %v22622_v49 = vpop.f32.mrf.mxu1 }
 0x110   : > { %v1602_v51 = vadd.f32 %v1601_v48, %v1524_v47  ;;  %v2952_v41 = vand.u32 4294901760, %v24475_v38  ;;  %v21789_v48 = vld [vmem:[%s24251_s5 + $0x70] sm:$0xf] }
 0x111   : > { %v22617_v53 = vpop.f32.mrf.mxu0  ;;  %v1822_v54 = vpop.f32.mrf.mxu1  ;;  %v3773_v50 = vsel %vm193_vm2, %v21789_v48, 0 }
 0x112   : > { %v1677_v55 = vadd.f32 %v1676_v45, %v1602_v51  ;;  %v2953_v44 = vsub.f32 %v24475_v38, %v2952_v41  ;;  %v24498_v45 = vand.u32 4294901760, %v3326_v43  ;;  %v24541_v53 = vand.u32 4294901760, %v3773_v50 }
 0x113   : > { %v1749_v56 = vpop.f32.mrf.mxu0  ;;  %v22632_v57 = vpop.f32.mrf.mxu1 }
 0x114   : > { %v1750_v59 = vadd.f32 %v1749_v56, %v1677_v55  ;;  %v2954_v46 = vand.u32 4294901760, %v2953_v44  ;;  %v24513_v47 = vsub.f32 %v3326_v43, %v24498_v45  ;;  %v3841_v55 = vsub.f32 %v3773_v50, %v24541_v53  ;;  %v21788_v56 = vld [vmem:[%s24251_s5 + $0x60] sm:$0xf] }
 0x115   : > { %v22627_v61 = vpop.f32.mrf.mxu0  ;;  %v1966_v62 = vpop.f32.mrf.mxu1  ;;  %v4216_v58 = vsel %vm193_vm2, %v21788_v56, 0 }
 0x116   : > { %v1823_v63 = vadd.f32 %v1822_v54, %v1750_v59  ;;  %v3395_v49 = vand.u32 4294901760, %v24513_v47  ;;  %v3842_v57 = vand.u32 4294901760, %v3841_v55  ;;  %v24580_v61 = vand.u32 4294901760, %v4216_v58 }
 0x117   : > { %v1895_v0 = vpop.f32.mrf.mxu0  ;;  %v22642_v4 = vpop.f32.mrf.mxu1 }
 0x118   : > { %v1896_v10 = vadd.f32 %v1895_v0, %v1823_v63  ;;  %v3396_v51 = vsub.f32 %v24513_v47, %v3395_v49  ;;  %v3843_v59 = vsub.f32 %v3841_v55, %v3842_v57  ;;  %v4284_v63 = vsub.f32 %v4216_v58, %v24580_v61 }
 0x119   : > { %v22637_v12 = vpop.f32.mrf.mxu0 }
 0x11a   : > { %v1967_v15 = vadd.f32 %v1966_v62, %v1896_v10  ;;  %v3397_v54 = vand.u32 4294901760, %v3396_v51  ;;  %v3844_v62 = vand.u32 4294901760, %v3843_v59  ;;  %v4285_v0 = vand.u32 4294901760, %v4284_v63 }
 0x11c   : > { %v1976_v19 = vsel %vm1974_vm7, %v1967_v15, 0  ;;  %v4286_v4 = vsub.f32 %v4284_v63, %v4285_v0 }
 0x11d   : > { %v2009_v21 = vand.u32 4294901760, %v1976_v19 }
 0x11e   : > { %v4287_v9 = vand.u32 4294901760, %v4286_v4 }
 0x11f   : > { %v2086_v25 = vsub.f32 %v1976_v19, %v2009_v21  ;;  %22644 = vmatpush3.msra.mxu0 %v2009_v21 }
 0x120   : > { %22646 = vmatmul.mubr.f32.vlgmr.msra.gmra.mxu0 %v24439_v20  ;;  %22653 = vmatprep.subr.mxu0 %v24133_v1 }
 0x121   : > { %22654 = vmatpush3.msra.mxu0 %v2086_v25  ;;  %22655 = vmatprep.mubr.msk.f32.mxu0 %vm24134_vm0, %v24133_v1  ;;  %v2087_v27 = vand.u32 4294901760, %v2086_v25 }
 0x122   : > { %22663 = vmatprep.subr.mxu0 %v24133_v1 }
 0x123   : > { %v2088_v30 = vsub.f32 %v2086_v25, %v2087_v27 }
 0x124   : > { %22656 = vmatmul.mubr.f32.vlgmr.msra.gmra.mxu0 %v24424_v52 }
 0x125   : > { %22664 = vmatpush3.msra.mxu0 %v2087_v27  ;;  %v2089_v33 = vand.u32 4294901760, %v2088_v30  ;;  %22665 = vmatprep.mubr.msk.f32.mxu0 %vm24134_vm0, %v24133_v1 }
 0x126   : > { %22673 = vmatprep.subr.mxu0 %v24133_v1 }
 0x127   : > { %22649 = vmatpush3.msra.mxu1 %v2089_v33 }
 0x128   : > { %22651 = vmatmul.mubr.msk.f32.vlgmr.msra.gmra.mxu1 %vm1970_vm5, %v24420_v3  ;;  %22658 = vmatprep.subr.mxu1 %v24133_v1 }
 0x129   : > { %22666 = vmatmul.mubr.msk.f32.vlgmr.msra.gmra.mxu0 %vm1970_vm5, %v24420_v3  ;;  %22659 = vmatpush3.msra.mxu1 %v2009_v21 }
 0x12a   : > { %22674 = vmatpush3.msra.mxu0 %v24443_v14  ;;  %22660 = vmatprep.mubr.msk.f32.mxu1 %vm24134_vm0, %v24133_v1 }
 0x12b   : > { %22668 = vmatprep.subr.mxu1 %v24133_v1  ;;  %22675 = vmatprep.mubr.msk.f32.mxu0 %vm24134_vm0, %v24133_v1 }
 0x12c   : > { %22683 = vmatprep.subr.mxu0 %v24133_v1  ;;  %22661 = vmatmul.mubr.f32.vlgmr.msra.gmra.mxu1 %v24427_v60 }
 0x12d   : > { %22669 = vmatpush3.msra.mxu1 %v2009_v21  ;;  %22676 = vmatmul.mubr.f32.vlgmr.msra.gmra.mxu0 %v24469_v37 }
 0x12e   : > { %22684 = vmatpush3.msra.mxu0 %v2538_v29  ;;  %22670 = vmatprep.mubr.msk.f32.mxu1 %vm24134_vm0, %v24133_v1 }
 0x12f   : > { %22678 = vmatprep.subr.mxu1 %v24133_v1  ;;  %22685 = vmatprep.mubr.msk.f32.mxu0 %vm24134_vm0, %v24133_v1 }
 0x130   : > { %22693 = vmatprep.subr.mxu0 %v24133_v1  ;;  %22671 = vmatmul.mubr.msk.f32.vlgmr.msra.gmra.mxu1 %vm1970_vm5, %v24420_v3 }
 0x131   : > { %22679 = vmatpush3.msra.mxu1 %v2541_v42  ;;  %22686 = vmatmul.mubr.f32.vlgmr.msra.gmra.mxu0 %v24441_v22 }
 0x132   : > { %22694 = vmatpush3.msra.mxu0 %v2539_v36  ;;  %22680 = vmatprep.mubr.msk.f32.mxu1 %vm24134_vm0, %v24133_v1 }
 0x133   : > { %22688 = vmatprep.subr.mxu1 %v24133_v1  ;;  %22695 = vmatprep.mubr.msk.f32.mxu0 %vm24134_vm0, %v24133_v1 }
 0x134   : > { %22681 = vmatmul.mubr.msk.f32.vlgmr.msra.gmra.mxu1 %vm1970_vm5, %v24431_v5  ;;  %22703 = vmatprep.subr.mxu0 %v24133_v1 }
 0x135   : > { %22689 = vmatpush3.msra.mxu1 %v24443_v14  ;;  %22690 = vmatprep.mubr.msk.f32.mxu1 %vm24134_vm0, %v24133_v1 }
 0x136   : > { %22698 = vmatprep.subr.mxu1 %v24133_v1  ;;  %22696 = vmatmul.mubr.msk.f32.vlgmr.msra.gmra.mxu0 %vm1970_vm5, %v24431_v5 }
 0x137   : > { %22704 = vmatpush3.msk.msra.mxu0 %vm24244_vm3, %v24135_v8  ;;  %22705 = vmatprep.mubr.msk.f32.mxu0 %vm24134_vm0, %v24133_v1 }
 0x138   : > { %22691 = vmatmul.mubr.f32.vlgmr.msra.gmra.mxu1 %v24451_v28  ;;  %22713 = vmatprep.subr.mxu0 %v24133_v1 }
 0x139   : > { %22699 = vmatpush3.msra.mxu1 %v24443_v14  ;;  %22700 = vmatprep.mubr.msk.f32.mxu1 %vm24134_vm0, %v24133_v1 }
 0x13a   : > { %22706 = vmatmul.mubr.f32.vlgmr.msra.gmra.mxu0 %v2954_v46  ;;  %22708 = vmatprep.subr.mxu1 %v24133_v1 }
 0x13b   : > { %22714 = vmatpush3.msra.mxu0 %v24264_v13  ;;  %22715 = vmatprep.mubr.msk.f32.mxu0 %vm24134_vm0, %v24133_v1 }
 0x13c   : > { %22701 = vmatmul.mubr.msk.f32.vlgmr.msra.gmra.mxu1 %vm1970_vm5, %v24431_v5  ;;  %22723 = vmatprep.subr.mxu0 %v24133_v1 }
 0x13d   : > { %22709 = vmatpush3.msra.mxu1 %v24278_v23  ;;  %22710 = vmatprep.mubr.msk.f32.mxu1 %vm24134_vm0, %v24133_v1 }
 0x13e   : > { %22716 = vmatmul.mubr.f32.vlgmr.msra.gmra.mxu0 %v24475_v38  ;;  %22718 = vmatprep.subr.mxu1 %v24133_v1 }
 0x13f   : > { %22724 = vmatpush3.msra.mxu0 %v24270_v17  ;;  %22725 = vmatprep.mubr.msk.f32.mxu0 %vm24134_vm0, %v24133_v1 }
 0x140   : > { %22711 = vmatmul.mubr.f32.vlgmr.msra.gmra.mxu1 %v24462_v35  ;;  %22733 = vmatprep.subr.mxu0 %v24133_v1 }
 0x141   : > { %22719 = vmatpush3.msk.msra.mxu1 %vm24244_vm3, %v24135_v8  ;;  %22720 = vmatprep.mubr.msk.f32.mxu1 %vm24134_vm0, %v24133_v1 }
 0x142   : > { %22726 = vmatmul.mubr.f32.vlgmr.msra.gmra.mxu0 %v24462_v35  ;;  %22728 = vmatprep.subr.mxu1 %v24133_v1 }
 0x143   : > { %22734 = vmatpush3.msk.msra.mxu0 %vm24239_vm1, %v24135_v8  ;;  %22735 = vmatprep.mubr.msk.f32.mxu0 %vm24134_vm0, %v24133_v1 }
 0x144   : > { %22721 = vmatmul.mubr.f32.vlgmr.msra.gmra.mxu1 %v2952_v41  ;;  %22743 = vmatprep.subr.mxu0 %v24133_v1 }
 0x145   : > { %22729 = vmatpush3.msk.msra.mxu1 %vm24244_vm3, %v24135_v8  ;;  %22730 = vmatprep.mubr.msk.f32.mxu1 %vm24134_vm0, %v24133_v1 }
 0x146   : > { %22736 = vmatmul.mubr.f32.vlgmr.msra.gmra.mxu0 %v3397_v54  ;;  %22738 = vmatprep.subr.mxu1 %v24133_v1 }
 0x147   : > { %22744 = vmatpush3.msra.mxu0 %v24272_v18  ;;  %22745 = vmatprep.mubr.msk.f32.mxu0 %vm24134_vm0, %v24133_v1 }
 0x148   : > { %22731 = vmatmul.mubr.f32.vlgmr.msra.gmra.mxu1 %v24462_v35  ;;  %22753 = vmatprep.subr.mxu0 %v24133_v1 }
 0x149   : > { %22739 = vmatpush3.msra.mxu1 %v24305_v32  ;;  %22740 = vmatprep.mubr.msk.f32.mxu1 %vm24134_vm0, %v24133_v1 }
 0x14a   : > { %22746 = vmatmul.mubr.f32.vlgmr.msra.gmra.mxu0 %v24513_v47  ;;  %22748 = vmatprep.subr.mxu1 %v24133_v1 }
 0x14b   : > { %22754 = vmatpush3.msra.mxu0 %v24281_v24  ;;  %22755 = vmatprep.mubr.msk.f32.mxu0 %vm24134_vm0, %v24133_v1 }
 0x14c   : > { %22741 = vmatmul.mubr.f32.vlgmr.msra.gmra.mxu1 %v24498_v45  ;;  %22763 = vmatprep.subr.mxu0 %v24133_v1 }
 0x14d   : > { %22749 = vmatpush3.msk.msra.mxu1 %vm24239_vm1, %v24135_v8  ;;  %22750 = vmatprep.mubr.msk.f32.mxu1 %vm24134_vm0, %v24133_v1 }
 0x14e   : > { %22756 = vmatmul.mubr.f32.vlgmr.msra.gmra.mxu0 %v24498_v45  ;;  %22758 = vmatprep.subr.mxu1 %v24133_v1 }
 0x14f   : > { %22764 = vmatpush3.msk.msra.mxu0 %vm24244_vm3, %v24135_v8  ;;  %22765 = vmatprep.mubr.msk.f32.mxu0 %vm24134_vm0, %v24133_v1 }
 0x150   : > { %22751 = vmatmul.mubr.f32.vlgmr.msra.gmra.mxu1 %v3395_v49  ;;  %22773 = vmatprep.subr.mxu0 %v24133_v1 }
 0x151   : > { %22759 = vmatpush3.msk.msra.mxu1 %vm24239_vm1, %v24135_v8  ;;  %22760 = vmatprep.mubr.msk.f32.mxu1 %vm24134_vm0, %v24133_v1 }
 0x152   : > { %22766 = vmatmul.mubr.f32.vlgmr.msra.gmra.mxu0 %v3844_v62  ;;  %22768 = vmatprep.subr.mxu1 %v24133_v1 }
 0x153   : > { %22774 = vmatpush3.msra.mxu0 %v24264_v13  ;;  %22775 = vmatprep.mubr.msk.f32.mxu0 %vm24134_vm0, %v24133_v1 }
 0x154   : > { %22761 = vmatmul.mubr.f32.vlgmr.msra.gmra.mxu1 %v24498_v45  ;;  %22783 = vmatprep.subr.mxu0 %v24133_v1 }
 0x155   : > { %22769 = vmatpush3.msra.mxu1 %v24278_v23  ;;  %22770 = vmatprep.mubr.msk.f32.mxu1 %vm24134_vm0, %v24133_v1 }
 0x156   : > { %22776 = vmatmul.mubr.f32.vlgmr.msra.gmra.mxu0 %v3841_v55  ;;  %22778 = vmatprep.subr.mxu1 %v24133_v1 }
 0x157   : > { %22784 = vmatpush3.msra.mxu0 %v24270_v17  ;;  %22785 = vmatprep.mubr.msk.f32.mxu0 %vm24134_vm0, %v24133_v1 }
 0x158   : > { %22771 = vmatmul.mubr.f32.vlgmr.msra.gmra.mxu1 %v24541_v53  ;;  %22793 = vmatprep.subr.mxu0 %v24133_v1 }
 0x159   : > { %22779 = vmatpush3.msk.msra.mxu1 %vm24244_vm3, %v24135_v8  ;;  %22780 = vmatprep.mubr.msk.f32.mxu1 %vm24134_vm0, %v24133_v1 }
 0x15a   : > { %22786 = vmatmul.mubr.f32.vlgmr.msra.gmra.mxu0 %v24541_v53  ;;  %22788 = vmatprep.subr.mxu1 %v24133_v1 }
 0x15b   : > { %22794 = vmatpush3.msk.msra.mxu0 %vm24239_vm1, %v24135_v8  ;;  %22795 = vmatprep.mubr.msk.f32.mxu0 %vm24134_vm0, %v24133_v1 }
 0x15c   : > { %22781 = vmatmul.mubr.f32.vlgmr.msra.gmra.mxu1 %v3842_v57  ;;  %22803 = vmatprep.subr.mxu0 %v24133_v1 }
 0x15d   : > { %22789 = vmatpush3.msk.msra.mxu1 %vm24244_vm3, %v24135_v8  ;;  %22790 = vmatprep.mubr.msk.f32.mxu1 %vm24134_vm0, %v24133_v1 }
 0x15e   : > { %22796 = vmatmul.mubr.f32.vlgmr.msra.gmra.mxu0 %v4287_v9  ;;  %22798 = vmatprep.subr.mxu1 %v24133_v1 }
 0x15f   : > { %22804 = vmatpush3.msra.mxu0 %v24272_v18  ;;  %22805 = vmatprep.mubr.msk.f32.mxu0 %vm24134_vm0, %v24133_v1 }
 0x160   : > { %22791 = vmatmul.mubr.f32.vlgmr.msra.gmra.mxu1 %v24541_v53  ;;  %22813 = vmatprep.subr.mxu0 %v24133_v1 }
 0x161   : > { %22799 = vmatpush3.msra.mxu1 %v24305_v32  ;;  %22800 = vmatprep.mubr.msk.f32.mxu1 %vm24134_vm0, %v24133_v1 }
 0x162   : > { %22806 = vmatmul.mubr.f32.vlgmr.msra.gmra.mxu0 %v4284_v63  ;;  %22808 = vmatprep.subr.mxu1 %v24133_v1 }
 0x163   : > { %22814 = vmatpush3.msra.mxu0 %v24281_v24  ;;  %22815 = vmatprep.mubr.msk.f32.mxu0 %vm24134_vm0, %v24133_v1 }
 0x164   : > { %22801 = vmatmul.mubr.f32.vlgmr.msra.gmra.mxu1 %v24580_v61  ;;  %22823 = vmatprep.subr.mxu0 %v24133_v1 }
 0x165   : > { %22809 = vmatpush3.msk.msra.mxu1 %vm24239_vm1, %v24135_v8  ;;  %22810 = vmatprep.mubr.msk.f32.mxu1 %vm24134_vm0, %v24133_v1 }
 0x166   : > { %22816 = vmatmul.mubr.f32.vlgmr.msra.gmra.mxu0 %v24580_v61  ;;  %22818 = vmatprep.subr.mxu1 %v24133_v1 }
 0x167   : > { %22825 = vmatprep.mubr.msk.f32.mxu0 %vm24134_vm0, %v24133_v1 }
 0x168   : > { %22811 = vmatmul.mubr.f32.vlgmr.msra.gmra.mxu1 %v4285_v0 }
 0x169   : > { %22819 = vmatpush3.msk.msra.mxu1 %vm24239_vm1, %v24135_v8  ;;  %22820 = vmatprep.mubr.msk.f32.mxu1 %vm24134_vm0, %v24133_v1 }
 0x16a   : > { %22828 = vmatprep.subr.mxu1 %v24133_v1 }
 0x16c   : > { %22821 = vmatmul.mubr.f32.vlgmr.msra.gmra.mxu1 %v24580_v61 }
 0x16d   : > { %22830 = vmatprep.mubr.msk.f32.mxu1 %vm24134_vm0, %v24133_v1 }
 0x1e0   : > { %v2050_v10 = vpop.f32.mrf.mxu0 }
 0x1e2   : > { %v22647_v11 = vpop.f32.mrf.mxu0 }
 0x1e4   : > { %v2200_v12 = vpop.f32.mrf.mxu0 }
 0x1e6   : > { %v22657_v15 = vpop.f32.mrf.mxu0 }
 0x1e8   : > { %v2126_v2 = vpop.f32.mrf.mxu1 }
 0x1e9   : > { %v2127_v16 = vadd.f32 %v2126_v2, %v2050_v10  ;;  %v2348_v19 = vpop.f32.mrf.mxu0 }
 0x1ea   : > { %v22652_v21 = vpop.f32.mrf.mxu1 }
 0x1eb   : > { %v2201_v14 = vadd.f32 %v2200_v12, %v2127_v16  ;;  %v22667_v25 = vpop.f32.mrf.mxu0 }
 0x1ec   : > { %v2274_v26 = vpop.f32.mrf.mxu1 }
 0x1ed   : > { %v2275_v27 = vadd.f32 %v2274_v26, %v2201_v14  ;;  %v2502_v29 = vpop.f32.mrf.mxu0 }
 0x1ee   : > { %v22662_v30 = vpop.f32.mrf.mxu1 }
 0x1ef   : > { %v2349_v31 = vadd.f32 %v2348_v19, %v2275_v27  ;;  %v22677_v33 = vpop.f32.mrf.mxu0 }
 0x1f0   : > { %v2420_v34 = vpop.f32.mrf.mxu1 }
 0x1f1   : > { %v2421_v35 = vadd.f32 %v2420_v34, %v2349_v31  ;;  %v2652_v36 = vpop.f32.mrf.mxu0 }
 0x1f2   : > { %v22672_v38 = vpop.f32.mrf.mxu1 }
 0x1f3   : > { %v2503_v39 = vadd.f32 %v2502_v29, %v2421_v35  ;;  %v22687_v40 = vpop.f32.mrf.mxu0 }
 0x1f4   : > { %v2578_v41 = vpop.f32.mrf.mxu1 }
 0x1f5   : > { %v2579_v42 = vadd.f32 %v2578_v41, %v2503_v39 }
 0x1f6   : > { %v22682_v43 = vpop.f32.mrf.mxu1  ;;  %v2800_v44 = vpop.f32.mrf.mxu0 }
 0x1f7   : > { %v2653_v45 = vadd.f32 %v2652_v36, %v2579_v42 }
 0x1f8   : > { %v2726_v46 = vpop.f32.mrf.mxu1  ;;  %v22697_v47 = vpop.f32.mrf.mxu0 }
 0x1f9   : > { %v2727_v48 = vadd.f32 %v2726_v46, %v2653_v45 }
 0x1fa   : > { %v22692_v49 = vpop.f32.mrf.mxu1  ;;  %v2956_v50 = vpop.f32.mrf.mxu0 }
 0x1fb   : > { %v2801_v51 = vadd.f32 %v2800_v44, %v2727_v48 }
 0x1fc   : > { %v2872_v53 = vpop.f32.mrf.mxu1  ;;  %v22707_v54 = vpop.f32.mrf.mxu0 }
 0x1fd   : > { %v2873_v55 = vadd.f32 %v2872_v53, %v2801_v51 }
 0x1fe   : > { %v22702_v56 = vpop.f32.mrf.mxu1  ;;  %v3104_v57 = vpop.f32.mrf.mxu0 }
 0x1ff   : > { %2877 = vst.msk [vmem:[%s24675_s15] sm:$0xff] %vm2876_vm8, %v2873_v55 }
 0x200   : > { %v3031_v58 = vpop.f32.mrf.mxu1  ;;  %v22717_v59 = vpop.f32.mrf.mxu0 }
 0x201   : > { %v3032_v63 = vadd.f32 %v3031_v58, %v2956_v50 }
 0x202   : > { %v22712_v61 = vpop.f32.mrf.mxu1  ;;  %v3250_v62 = vpop.f32.mrf.mxu0 }
 0x203   : > { %v3105_v11 = vadd.f32 %v3104_v57, %v3032_v63 }
 0x204   : > { %v3177_v0 = vpop.f32.mrf.mxu1  ;;  %v22727_v4 = vpop.f32.mrf.mxu0 }
 0x205   : > { %v3178_v19 = vadd.f32 %v3177_v0, %v3105_v11 }
 0x206   : > { %v22722_v9 = vpop.f32.mrf.mxu1  ;;  %v3399_v10 = vpop.f32.mrf.mxu0 }
 0x207   : > { %v3251_v27 = vadd.f32 %v3250_v62, %v3178_v19 }
 0x208   : > { %v3321_v12 = vpop.f32.mrf.mxu1  ;;  %v22737_v15 = vpop.f32.mrf.mxu0 }
 0x209   : > { %v3322_v34 = vadd.f32 %v3321_v12, %v3251_v27 }
 0x20a   : > { %v22732_v2 = vpop.f32.mrf.mxu1  ;;  %v3547_v16 = vpop.f32.mrf.mxu0 }
 0x20b   : > { %v3400_v40 = vadd.f32 %v3399_v10, %v3322_v34 }
 0x20c   : > { %v3474_v21 = vpop.f32.mrf.mxu1  ;;  %v22747_v14 = vpop.f32.mrf.mxu0 }
 0x20d   : > { %v3475_v46 = vadd.f32 %v3474_v21, %v3400_v40 }
 0x20e   : > { %v22742_v25 = vpop.f32.mrf.mxu1  ;;  %v3693_v26 = vpop.f32.mrf.mxu0 }
 0x20f   : > { %v3548_v54 = vadd.f32 %v3547_v16, %v3475_v46 }
 0x210   : > { %v3620_v29 = vpop.f32.mrf.mxu1  ;;  %v22757_v30 = vpop.f32.mrf.mxu0 }
 0x211   : > { %v3621_v62 = vadd.f32 %v3620_v29, %v3548_v54 }
 0x212   : > { %v22752_v31 = vpop.f32.mrf.mxu1  ;;  %v3846_v33 = vpop.f32.mrf.mxu0 }
 0x213   : > { %v3694_v12 = vadd.f32 %v3693_v26, %v3621_v62  ;;  %v21804_v26 = vld [vmem:[%s24251_s5 + $0x14] sm:$0xf] }
 0x214   : > { %v3764_v35 = vpop.f32.mrf.mxu1  ;;  %v22767_v36 = vpop.f32.mrf.mxu0 }
 0x215   : > { %v3765_v14 = vadd.f32 %v3764_v35, %v3694_v12 }
 0x216   : > { %v22762_v38 = vpop.f32.mrf.mxu1  ;;  %v3994_v39 = vpop.f32.mrf.mxu0 }
 0x217   : > { %v5108_v29 = vsel %vm1974_vm7, %v3765_v14, 0 }
 0x218   : > { %v3921_v41 = vpop.f32.mrf.mxu1  ;;  %v22777_v42 = vpop.f32.mrf.mxu0  ;;  %v24681_v36 = vand.u32 4294901760, %v5108_v29 }
 0x219   : > { %v3922_v43 = vadd.f32 %v3921_v41, %v3846_v33  ;;  %v5563_v41 = vsel %vm193_vm2, %v21804_v26, 0 }
 0x21a   : > { %v22772_v44 = vpop.f32.mrf.mxu1  ;;  %v4140_v45 = vpop.f32.mrf.mxu0 }
 0x21b   : > { %v3995_v47 = vadd.f32 %v3994_v39, %v3922_v43  ;;  %v5218_v39 = vsub.f32 %v5108_v29, %v24681_v36  ;;  %v24695_v43 = vand.u32 4294901760, %v5563_v41 }
 0x21c   : > { %v4067_v48 = vpop.f32.mrf.mxu1  ;;  %v22787_v49 = vpop.f32.mrf.mxu0 }
 0x21d   : > { %v4068_v50 = vadd.f32 %v4067_v48, %v3995_v47  ;;  %v5219_v44 = vand.u32 4294901760, %v5218_v39  ;;  %v21803_v47 = vld [vmem:[%s24251_s5 + $0x4] sm:$0xf] }
 0x21e   : > { %v22782_v51 = vpop.f32.mrf.mxu1  ;;  %v4289_v53 = vpop.f32.mrf.mxu0 }
 0x21f   : > { %v4141_v55 = vadd.f32 %v4140_v45, %v4068_v50  ;;  %v24706_v45 = vsub.f32 %v5563_v41, %v24695_v43  ;;  %v5220_v46 = vsub.f32 %v5218_v39, %v5219_v44  ;;  %v6006_v50 = vsel %vm193_vm2, %v21803_v47, 0 }
 0x220   : > { %v4211_v56 = vpop.f32.mrf.mxu1  ;;  %v22797_v57 = vpop.f32.mrf.mxu0 }
 0x221   : > { %v4212_v58 = vadd.f32 %v4211_v56, %v4141_v55  ;;  %v5632_v48 = vand.u32 4294901760, %v24706_v45  ;;  %v5221_v49 = vand.u32 4294901760, %v5220_v46  ;;  %v21812_v56 = vld [vmem:[%s24251_s5 + $0x34] sm:$0xf] }
 0x222   : > { %v22792_v59 = vpop.f32.mrf.mxu1  ;;  %v4437_v61 = vpop.f32.mrf.mxu0 }
 0x223   : > { %v4290_v63 = vadd.f32 %v4289_v53, %v4212_v58  ;;  %v5633_v51 = vsub.f32 %v24706_v45, %v5632_v48  ;;  %v24729_v53 = vand.u32 4294901760, %v6006_v50  ;;  %v6453_v58 = vsel %vm193_vm2, %v21812_v56, 0 }
 0x224   : > { %v4364_v0 = vpop.f32.mrf.mxu1  ;;  %v22807_v4 = vpop.f32.mrf.mxu0 }
 0x225   : > { %v4365_v9 = vadd.f32 %v4364_v0, %v4290_v63  ;;  %v5634_v54 = vand.u32 4294901760, %v5633_v51  ;;  %v24744_v55 = vsub.f32 %v6006_v50, %v24729_v53  ;;  %v21811_v0 = vld [vmem:[%s24251_s5 + $0x24] sm:$0xf] }
 0x226   : > { %v22802_v10 = vpop.f32.mrf.mxu1  ;;  %v4583_v11 = vpop.f32.mrf.mxu0 }
 0x227   : > { %v4438_v15 = vadd.f32 %v4437_v61, %v4365_v9  ;;  %v6075_v57 = vand.u32 4294901760, %v24744_v55  ;;  %v24772_v61 = vand.u32 4294901760, %v6453_v58  ;;  %v6896_v9 = vsel %vm193_vm2, %v21811_v0, 0 }
 0x228   : > { %v4510_v2 = vpop.f32.mrf.mxu1  ;;  %v22817_v19 = vpop.f32.mrf.mxu0 }
 0x229   : > { %v4511_v21 = vadd.f32 %v4510_v2, %v4438_v15  ;;  %v6076_v59 = vsub.f32 %v24744_v55, %v6075_v57  ;;  %v6521_v63 = vsub.f32 %v6453_v58, %v24772_v61 }
 0x22a   : > { %v22812_v16 = vpop.f32.mrf.mxu1 }
 0x22b   : > { %v4584_v25 = vadd.f32 %v4583_v11, %v4511_v21  ;;  %v6077_v62 = vand.u32 4294901760, %v6076_v59  ;;  %v6522_v4 = vand.u32 4294901760, %v6521_v63  ;;  %v24811_v11 = vand.u32 4294901760, %v6896_v9 }
 0x22c   : > { %v4654_v27 = vpop.f32.mrf.mxu1 }
 0x22d   : > { %v4655_v30 = vadd.f32 %v4654_v27, %v4584_v25  ;;  %v6523_v10 = vsub.f32 %v6521_v63, %v6522_v4  ;;  %v6964_v15 = vsub.f32 %v6896_v9, %v24811_v11 }
 0x22e   : > { %v22822_v31 = vpop.f32.mrf.mxu1 }
 0x22f   : > { %v4659_v33 = vsel %vm1974_vm7, %v4655_v30, 0  ;;  %v6524_v12 = vand.u32 4294901760, %v6523_v10  ;;  %v6965_v2 = vand.u32 4294901760, %v6964_v15 }
 0x230   : > { %v4692_v34 = vand.u32 4294901760, %v4659_v33 }
 0x231   : > { %v6966_v19 = vsub.f32 %v6964_v15, %v6965_v2 }
 0x232   : > { %v4769_v38 = vsub.f32 %v4659_v33, %v4692_v34  ;;  %22824 = vmatpush3.msra.mxu0 %v4692_v34 }
 0x233   : > { %22826 = vmatmul.mubr.f32.vlgmr.msra.gmra.mxu0 %v24439_v20  ;;  %22833 = vmatprep.subr.mxu0 %v24133_v1  ;;  %v6967_v21 = vand.u32 4294901760, %v6966_v19 }
 0x234   : > { %22834 = vmatpush3.msra.mxu0 %v4769_v38  ;;  %22835 = vmatprep.mubr.msk.f32.mxu0 %vm24134_vm0, %v24133_v1  ;;  %v4770_v35 = vand.u32 4294901760, %v4769_v38 }
 0x235   : > { %22843 = vmatprep.subr.mxu0 %v24133_v1 }
 0x236   : > { %v4771_v40 = vsub.f32 %v4769_v38, %v4770_v35 }
 0x237   : > { %22836 = vmatmul.mubr.f32.vlgmr.msra.gmra.mxu0 %v24424_v52 }
 0x238   : > { %22844 = vmatpush3.msra.mxu0 %v4770_v35  ;;  %v4772_v42 = vand.u32 4294901760, %v4771_v40  ;;  %22845 = vmatprep.mubr.msk.f32.mxu0 %vm24134_vm0, %v24133_v1 }
 0x239   : > { %22853 = vmatprep.subr.mxu0 %v24133_v1 }
 0x23a   : > { %22829 = vmatpush3.msra.mxu1 %v4772_v42 }
 0x23b   : > { %22831 = vmatmul.mubr.msk.f32.vlgmr.msra.gmra.mxu1 %vm1970_vm5, %v24420_v3  ;;  %22838 = vmatprep.subr.mxu1 %v24133_v1 }
 0x23c   : > { %22846 = vmatmul.mubr.msk.f32.vlgmr.msra.gmra.mxu0 %vm1970_vm5, %v24420_v3  ;;  %22839 = vmatpush3.msra.mxu1 %v4692_v34 }
 0x23d   : > { %22854 = vmatpush3.msra.mxu0 %v24681_v36  ;;  %22840 = vmatprep.mubr.msk.f32.mxu1 %vm24134_vm0, %v24133_v1 }
 0x23e   : > { %22848 = vmatprep.subr.mxu1 %v24133_v1  ;;  %22855 = vmatprep.mubr.msk.f32.mxu0 %vm24134_vm0, %v24133_v1 }
 0x23f   : > { %22863 = vmatprep.subr.mxu0 %v24133_v1  ;;  %22841 = vmatmul.mubr.f32.vlgmr.msra.gmra.mxu1 %v24427_v60 }
 0x240   : > { %22849 = vmatpush3.msra.mxu1 %v4692_v34  ;;  %22856 = vmatmul.mubr.f32.vlgmr.msra.gmra.mxu0 %v24469_v37 }
 0x241   : > { %22864 = vmatpush3.msra.mxu0 %v5218_v39  ;;  %22850 = vmatprep.mubr.msk.f32.mxu1 %vm24134_vm0, %v24133_v1 }
 0x242   : > { %22858 = vmatprep.subr.mxu1 %v24133_v1  ;;  %22865 = vmatprep.mubr.msk.f32.mxu0 %vm24134_vm0, %v24133_v1 }
 0x243   : > { %22873 = vmatprep.subr.mxu0 %v24133_v1  ;;  %22851 = vmatmul.mubr.msk.f32.vlgmr.msra.gmra.mxu1 %vm1970_vm5, %v24420_v3 }
 0x244   : > { %22859 = vmatpush3.msra.mxu1 %v5221_v49  ;;  %22866 = vmatmul.mubr.f32.vlgmr.msra.gmra.mxu0 %v24441_v22 }
 0x245   : > { %22874 = vmatpush3.msra.mxu0 %v5219_v44  ;;  %22860 = vmatprep.mubr.msk.f32.mxu1 %vm24134_vm0, %v24133_v1 }
 0x246   : > { %22868 = vmatprep.subr.mxu1 %v24133_v1  ;;  %22875 = vmatprep.mubr.msk.f32.mxu0 %vm24134_vm0, %v24133_v1 }
 0x247   : > { %22861 = vmatmul.mubr.msk.f32.vlgmr.msra.gmra.mxu1 %vm1970_vm5, %v24431_v5  ;;  %22883 = vmatprep.subr.mxu0 %v24133_v1 }
 0x248   : > { %22869 = vmatpush3.msra.mxu1 %v24681_v36  ;;  %22870 = vmatprep.mubr.msk.f32.mxu1 %vm24134_vm0, %v24133_v1 }
 0x249   : > { %22878 = vmatprep.subr.mxu1 %v24133_v1  ;;  %22876 = vmatmul.mubr.msk.f32.vlgmr.msra.gmra.mxu0 %vm1970_vm5, %v24431_v5 }
 0x24a   : > { %22884 = vmatpush3.msk.msra.mxu0 %vm24244_vm3, %v24135_v8  ;;  %22885 = vmatprep.mubr.msk.f32.mxu0 %vm24134_vm0, %v24133_v1 }
 0x24b   : > { %22871 = vmatmul.mubr.f32.vlgmr.msra.gmra.mxu1 %v24451_v28  ;;  %22893 = vmatprep.subr.mxu0 %v24133_v1 }
 0x24c   : > { %22879 = vmatpush3.msra.mxu1 %v24681_v36  ;;  %22880 = vmatprep.mubr.msk.f32.mxu1 %vm24134_vm0, %v24133_v1 }
 0x24d   : > { %22886 = vmatmul.mubr.f32.vlgmr.msra.gmra.mxu0 %v5634_v54  ;;  %22888 = vmatprep.subr.mxu1 %v24133_v1 }
 0x24e   : > { %22894 = vmatpush3.msra.mxu0 %v24264_v13  ;;  %22895 = vmatprep.mubr.msk.f32.mxu0 %vm24134_vm0, %v24133_v1 }
 0x24f   : > { %22881 = vmatmul.mubr.msk.f32.vlgmr.msra.gmra.mxu1 %vm1970_vm5, %v24431_v5  ;;  %22903 = vmatprep.subr.mxu0 %v24133_v1 }
 0x250   : > { %22889 = vmatpush3.msra.mxu1 %v24278_v23  ;;  %22890 = vmatprep.mubr.msk.f32.mxu1 %vm24134_vm0, %v24133_v1 }
 0x251   : > { %22896 = vmatmul.mubr.f32.vlgmr.msra.gmra.mxu0 %v24706_v45  ;;  %22898 = vmatprep.subr.mxu1 %v24133_v1 }
 0x252   : > { %22904 = vmatpush3.msra.mxu0 %v24270_v17  ;;  %22905 = vmatprep.mubr.msk.f32.mxu0 %vm24134_vm0, %v24133_v1 }
 0x253   : > { %22891 = vmatmul.mubr.f32.vlgmr.msra.gmra.mxu1 %v24695_v43  ;;  %22913 = vmatprep.subr.mxu0 %v24133_v1 }
 0x254   : > { %22899 = vmatpush3.msk.msra.mxu1 %vm24244_vm3, %v24135_v8  ;;  %22900 = vmatprep.mubr.msk.f32.mxu1 %vm24134_vm0, %v24133_v1 }
 0x255   : > { %22906 = vmatmul.mubr.f32.vlgmr.msra.gmra.mxu0 %v24695_v43  ;;  %22908 = vmatprep.subr.mxu1 %v24133_v1 }
 0x256   : > { %22914 = vmatpush3.msk.msra.mxu0 %vm24239_vm1, %v24135_v8  ;;  %22915 = vmatprep.mubr.msk.f32.mxu0 %vm24134_vm0, %v24133_v1 }
 0x257   : > { %22901 = vmatmul.mubr.f32.vlgmr.msra.gmra.mxu1 %v5632_v48  ;;  %22923 = vmatprep.subr.mxu0 %v24133_v1 }
 0x258   : > { %22909 = vmatpush3.msk.msra.mxu1 %vm24244_vm3, %v24135_v8  ;;  %22910 = vmatprep.mubr.msk.f32.mxu1 %vm24134_vm0, %v24133_v1 }
 0x259   : > { %22916 = vmatmul.mubr.f32.vlgmr.msra.gmra.mxu0 %v6077_v62  ;;  %22918 = vmatprep.subr.mxu1 %v24133_v1 }
 0x25a   : > { %22924 = vmatpush3.msra.mxu0 %v24272_v18  ;;  %22925 = vmatprep.mubr.msk.f32.mxu0 %vm24134_vm0, %v24133_v1 }
 0x25b   : > { %22911 = vmatmul.mubr.f32.vlgmr.msra.gmra.mxu1 %v24695_v43  ;;  %22933 = vmatprep.subr.mxu0 %v24133_v1 }
 0x25c   : > { %22919 = vmatpush3.msra.mxu1 %v24305_v32  ;;  %22920 = vmatprep.mubr.msk.f32.mxu1 %vm24134_vm0, %v24133_v1 }
 0x25d   : > { %22926 = vmatmul.mubr.f32.vlgmr.msra.gmra.mxu0 %v24744_v55  ;;  %22928 = vmatprep.subr.mxu1 %v24133_v1 }
 0x25e   : > { %22934 = vmatpush3.msra.mxu0 %v24281_v24  ;;  %22935 = vmatprep.mubr.msk.f32.mxu0 %vm24134_vm0, %v24133_v1 }
 0x25f   : > { %22921 = vmatmul.mubr.f32.vlgmr.msra.gmra.mxu1 %v24729_v53  ;;  %22943 = vmatprep.subr.mxu0 %v24133_v1 }
 0x260   : > { %22929 = vmatpush3.msk.msra.mxu1 %vm24239_vm1, %v24135_v8  ;;  %22930 = vmatprep.mubr.msk.f32.mxu1 %vm24134_vm0, %v24133_v1 }
 0x261   : > { %22936 = vmatmul.mubr.f32.vlgmr.msra.gmra.mxu0 %v24729_v53  ;;  %22938 = vmatprep.subr.mxu1 %v24133_v1 }
 0x262   : > { %22944 = vmatpush3.msk.msra.mxu0 %vm24244_vm3, %v24135_v8  ;;  %22945 = vmatprep.mubr.msk.f32.mxu0 %vm24134_vm0, %v24133_v1 }
 0x263   : > { %22931 = vmatmul.mubr.f32.vlgmr.msra.gmra.mxu1 %v6075_v57  ;;  %22953 = vmatprep.subr.mxu0 %v24133_v1 }
 0x264   : > { %22939 = vmatpush3.msk.msra.mxu1 %vm24239_vm1, %v24135_v8  ;;  %22940 = vmatprep.mubr.msk.f32.mxu1 %vm24134_vm0, %v24133_v1 }
 0x265   : > { %22946 = vmatmul.mubr.f32.vlgmr.msra.gmra.mxu0 %v6524_v12  ;;  %22948 = vmatprep.subr.mxu1 %v24133_v1 }
 0x266   : > { %22954 = vmatpush3.msra.mxu0 %v24264_v13  ;;  %22955 = vmatprep.mubr.msk.f32.mxu0 %vm24134_vm0, %v24133_v1 }
 0x267   : > { %22941 = vmatmul.mubr.f32.vlgmr.msra.gmra.mxu1 %v24729_v53  ;;  %22963 = vmatprep.subr.mxu0 %v24133_v1 }
 0x268   : > { %22949 = vmatpush3.msra.mxu1 %v24278_v23  ;;  %22950 = vmatprep.mubr.msk.f32.mxu1 %vm24134_vm0, %v24133_v1 }
 0x269   : > { %22956 = vmatmul.mubr.f32.vlgmr.msra.gmra.mxu0 %v6521_v63  ;;  %22958 = vmatprep.subr.mxu1 %v24133_v1 }
 0x26a   : > { %22964 = vmatpush3.msra.mxu0 %v24270_v17  ;;  %22965 = vmatprep.mubr.msk.f32.mxu0 %vm24134_vm0, %v24133_v1 }
 0x26b   : > { %22951 = vmatmul.mubr.f32.vlgmr.msra.gmra.mxu1 %v24772_v61  ;;  %22973 = vmatprep.subr.mxu0 %v24133_v1 }
 0x26c   : > { %22959 = vmatpush3.msk.msra.mxu1 %vm24244_vm3, %v24135_v8  ;;  %22960 = vmatprep.mubr.msk.f32.mxu1 %vm24134_vm0, %v24133_v1 }
 0x26d   : > { %22966 = vmatmul.mubr.f32.vlgmr.msra.gmra.mxu0 %v24772_v61  ;;  %22968 = vmatprep.subr.mxu1 %v24133_v1 }
 0x26e   : > { %22974 = vmatpush3.msk.msra.mxu0 %vm24239_vm1, %v24135_v8  ;;  %22975 = vmatprep.mubr.msk.f32.mxu0 %vm24134_vm0, %v24133_v1 }
 0x26f   : > { %22961 = vmatmul.mubr.f32.vlgmr.msra.gmra.mxu1 %v6522_v4  ;;  %22983 = vmatprep.subr.mxu0 %v24133_v1 }
 0x270   : > { %22969 = vmatpush3.msk.msra.mxu1 %vm24244_vm3, %v24135_v8  ;;  %22970 = vmatprep.mubr.msk.f32.mxu1 %vm24134_vm0, %v24133_v1 }
 0x271   : > { %22976 = vmatmul.mubr.f32.vlgmr.msra.gmra.mxu0 %v6967_v21  ;;  %22978 = vmatprep.subr.mxu1 %v24133_v1 }
 0x272   : > { %22984 = vmatpush3.msra.mxu0 %v24272_v18  ;;  %22985 = vmatprep.mubr.msk.f32.mxu0 %vm24134_vm0, %v24133_v1 }
 0x273   : > { %22971 = vmatmul.mubr.f32.vlgmr.msra.gmra.mxu1 %v24772_v61  ;;  %22993 = vmatprep.subr.mxu0 %v24133_v1 }
 0x274   : > { %22979 = vmatpush3.msra.mxu1 %v24305_v32  ;;  %22980 = vmatprep.mubr.msk.f32.mxu1 %vm24134_vm0, %v24133_v1 }
 0x275   : > { %22986 = vmatmul.mubr.f32.vlgmr.msra.gmra.mxu0 %v6964_v15  ;;  %22988 = vmatprep.subr.mxu1 %v24133_v1 }
 0x276   : > { %22994 = vmatpush3.msra.mxu0 %v24281_v24  ;;  %22995 = vmatprep.mubr.msk.f32.mxu0 %vm24134_vm0, %v24133_v1 }
 0x277   : > { %22981 = vmatmul.mubr.f32.vlgmr.msra.gmra.mxu1 %v24811_v11  ;;  %23003 = vmatprep.subr.mxu0 %v24133_v1 }
 0x278   : > { %22989 = vmatpush3.msk.msra.mxu1 %vm24239_vm1, %v24135_v8  ;;  %22990 = vmatprep.mubr.msk.f32.mxu1 %vm24134_vm0, %v24133_v1 }
 0x279   : > { %22996 = vmatmul.mubr.f32.vlgmr.msra.gmra.mxu0 %v24811_v11  ;;  %22998 = vmatprep.subr.mxu1 %v24133_v1 }
 0x27a   : > { %23005 = vmatprep.mubr.msk.f32.mxu0 %vm24134_vm0, %v24133_v1 }
 0x27b   : > { %22991 = vmatmul.mubr.f32.vlgmr.msra.gmra.mxu1 %v6965_v2 }
 0x27c   : > { %22999 = vmatpush3.msk.msra.mxu1 %vm24239_vm1, %v24135_v8  ;;  %23000 = vmatprep.mubr.msk.f32.mxu1 %vm24134_vm0, %v24133_v1 }
 0x27d   : > { %23008 = vmatprep.subr.mxu1 %v24133_v1 }
 0x27f   : > { %23001 = vmatmul.mubr.f32.vlgmr.msra.gmra.mxu1 %v24811_v11 }
 0x280   : > { %23010 = vmatprep.mubr.msk.f32.mxu1 %vm24134_vm0, %v24133_v1 }
 0x2f3   : > { %v4733_v16 = vpop.f32.mrf.mxu0 }
 0x2f5   : > { %v22827_v14 = vpop.f32.mrf.mxu0 }
 0x2f7   : > { %v4883_v25 = vpop.f32.mrf.mxu0 }
 0x2f9   : > { %v22837_v27 = vpop.f32.mrf.mxu0 }
 0x2fb   : > { %v4809_v30 = vpop.f32.mrf.mxu1 }
 0x2fc   : > { %v4810_v31 = vadd.f32 %v4809_v30, %v4733_v16  ;;  %v5031_v29 = vpop.f32.mrf.mxu0 }
 0x2fd   : > { %v22832_v33 = vpop.f32.mrf.mxu1 }
 0x2fe   : > { %v4884_v34 = vadd.f32 %v4883_v25, %v4810_v31  ;;  %v22847_v36 = vpop.f32.mrf.mxu0 }
 0x2ff   : > { %v4957_v38 = vpop.f32.mrf.mxu1 }
 0x300   : > { %v4958_v26 = vadd.f32 %v4957_v38, %v4884_v34  ;;  %v5182_v35 = vpop.f32.mrf.mxu0 }
 0x301   : > { %v22842_v39 = vpop.f32.mrf.mxu1 }
 0x302   : > { %v5032_v40 = vadd.f32 %v5031_v29, %v4958_v26  ;;  %v22857_v41 = vpop.f32.mrf.mxu0 }
 0x303   : > { %v5103_v42 = vpop.f32.mrf.mxu1 }
 0x304   : > { %v5104_v43 = vadd.f32 %v5103_v42, %v5032_v40  ;;  %v5332_v44 = vpop.f32.mrf.mxu0 }
 0x305   : > { %v22852_v45 = vpop.f32.mrf.mxu1 }
 0x306   : > { %v5183_v46 = vadd.f32 %v5182_v35, %v5104_v43  ;;  %v22867_v47 = vpop.f32.mrf.mxu0 }
 0x307   : > { %v5258_v48 = vpop.f32.mrf.mxu1 }
 0x308   : > { %v5259_v49 = vadd.f32 %v5258_v48, %v5183_v46 }
 0x309   : > { %v22862_v50 = vpop.f32.mrf.mxu1  ;;  %v5480_v51 = vpop.f32.mrf.mxu0 }
 0x30a   : > { %v5333_v53 = vadd.f32 %v5332_v44, %v5259_v49 }
 0x30b   : > { %v5406_v54 = vpop.f32.mrf.mxu1  ;;  %v22877_v55 = vpop.f32.mrf.mxu0 }
 0x30c   : > { %v5407_v56 = vadd.f32 %v5406_v54, %v5333_v53 }
 0x30d   : > { %v22872_v57 = vpop.f32.mrf.mxu1  ;;  %v5636_v58 = vpop.f32.mrf.mxu0 }
 0x30e   : > { %v5481_v59 = vadd.f32 %v5480_v51, %v5407_v56 }
 0x30f   : > { %v5552_v61 = vpop.f32.mrf.mxu1  ;;  %v22887_v62 = vpop.f32.mrf.mxu0 }
 0x310   : > { %v5553_v63 = vadd.f32 %v5552_v61, %v5481_v59 }
 0x311   : > { %v22882_v0 = vpop.f32.mrf.mxu1  ;;  %v5784_v4 = vpop.f32.mrf.mxu0 }
 0x312   : > { %21802 = vst.msk [vmem:[%s24675_s15 + $0x8] sm:$0xff] %vm2876_vm8, %v5553_v63 }
 0x313   : > { %v5711_v9 = vpop.f32.mrf.mxu1  ;;  %v22897_v10 = vpop.f32.mrf.mxu0 }
 0x314   : > { %v5712_v15 = vadd.f32 %v5711_v9, %v5636_v58 }
 0x315   : > { %v22892_v11 = vpop.f32.mrf.mxu1  ;;  %v5930_v12 = vpop.f32.mrf.mxu0 }
 0x316   : > { %v5785_v14 = vadd.f32 %v5784_v4, %v5712_v15 }
 0x317   : > { %v5857_v2 = vpop.f32.mrf.mxu1  ;;  %v22907_v19 = vpop.f32.mrf.mxu0 }
 0x318   : > { %v5858_v29 = vadd.f32 %v5857_v2, %v5785_v14 }
 0x319   : > { %v22902_v21 = vpop.f32.mrf.mxu1  ;;  %v6079_v16 = vpop.f32.mrf.mxu0 }
 0x31a   : > { %v5931_v26 = vadd.f32 %v5930_v12, %v5858_v29 }
 0x31b   : > { %v6001_v25 = vpop.f32.mrf.mxu1  ;;  %v22917_v27 = vpop.f32.mrf.mxu0 }
 0x31c   : > { %v6002_v42 = vadd.f32 %v6001_v25, %v5931_v26 }
 0x31d   : > { %v22912_v30 = vpop.f32.mrf.mxu1  ;;  %v6227_v31 = vpop.f32.mrf.mxu0 }
 0x31e   : > { %v6080_v47 = vadd.f32 %v6079_v16, %v6002_v42 }
 0x31f   : > { %v6154_v33 = vpop.f32.mrf.mxu1  ;;  %v22927_v34 = vpop.f32.mrf.mxu0 }
 0x320   : > { %v6155_v54 = vadd.f32 %v6154_v33, %v6080_v47 }
 0x321   : > { %v22922_v36 = vpop.f32.mrf.mxu1  ;;  %v6373_v38 = vpop.f32.mrf.mxu0 }
 0x322   : > { %v6228_v62 = vadd.f32 %v6227_v31, %v6155_v54 }
 0x323   : > { %v6300_v35 = vpop.f32.mrf.mxu1  ;;  %v22937_v39 = vpop.f32.mrf.mxu0 }
 0x324   : > { %v6301_v12 = vadd.f32 %v6300_v35, %v6228_v62 }
 0x325   : > { %v22932_v40 = vpop.f32.mrf.mxu1  ;;  %v6526_v41 = vpop.f32.mrf.mxu0 }
 0x326   : > { %v6374_v25 = vadd.f32 %v6373_v38, %v6301_v12  ;;  %v21827_v38 = vld [vmem:[%s24251_s5 + $0x54] sm:$0xf] }
 0x327   : > { %v6444_v43 = vpop.f32.mrf.mxu1  ;;  %v22947_v44 = vpop.f32.mrf.mxu0 }
 0x328   : > { %v6445_v34 = vadd.f32 %v6444_v43, %v6374_v25 }
 0x329   : > { %v22942_v45 = vpop.f32.mrf.mxu1  ;;  %v6674_v46 = vpop.f32.mrf.mxu0 }
 0x32a   : > { %v7788_v35 = vsel %vm1974_vm7, %v6445_v34, 0 }
 0x32b   : > { %v6601_v48 = vpop.f32.mrf.mxu1  ;;  %v22957_v49 = vpop.f32.mrf.mxu0  ;;  %v24907_v44 = vand.u32 4294901760, %v7788_v35 }
 0x32c   : > { %v6602_v50 = vadd.f32 %v6601_v48, %v6526_v41  ;;  %v8243_v48 = vsel %vm193_vm2, %v21827_v38, 0 }
 0x32d   : > { %v22952_v51 = vpop.f32.mrf.mxu1  ;;  %v6820_v53 = vpop.f32.mrf.mxu0 }
 0x32e   : > { %v6675_v55 = vadd.f32 %v6674_v46, %v6602_v50  ;;  %v7898_v46 = vsub.f32 %v7788_v35, %v24907_v44  ;;  %v24921_v50 = vand.u32 4294901760, %v8243_v48 }
 0x32f   : > { %v6747_v56 = vpop.f32.mrf.mxu1  ;;  %v22967_v57 = vpop.f32.mrf.mxu0 }
 0x330   : > { %v6748_v58 = vadd.f32 %v6747_v56, %v6675_v55  ;;  %v7899_v51 = vand.u32 4294901760, %v7898_v46  ;;  %v21826_v55 = vld [vmem:[%s24251_s5 + $0x44] sm:$0xf] }
 0x331   : > { %v22962_v59 = vpop.f32.mrf.mxu1  ;;  %v6969_v61 = vpop.f32.mrf.mxu0 }
 0x332   : > { %v6821_v63 = vadd.f32 %v6820_v53, %v6748_v58  ;;  %v24932_v53 = vsub.f32 %v8243_v48, %v24921_v50  ;;  %v7900_v54 = vsub.f32 %v7898_v46, %v7899_v51  ;;  %v8686_v58 = vsel %vm193_vm2, %v21826_v55, 0 }
 0x333   : > { %v6891_v0 = vpop.f32.mrf.mxu1  ;;  %v22977_v4 = vpop.f32.mrf.mxu0 }
 0x334   : > { %v6892_v9 = vadd.f32 %v6891_v0, %v6821_v63  ;;  %v8312_v56 = vand.u32 4294901760, %v24932_v53  ;;  %v7901_v57 = vand.u32 4294901760, %v7900_v54  ;;  %v21835_v0 = vld [vmem:[%s24251_s5 + $0x74] sm:$0xf] }
 0x335   : > { %v22972_v10 = vpop.f32.mrf.mxu1  ;;  %v7117_v11 = vpop.f32.mrf.mxu0 }
 0x336   : > { %v6970_v15 = vadd.f32 %v6969_v61, %v6892_v9  ;;  %v8313_v59 = vsub.f32 %v24932_v53, %v8312_v56  ;;  %v24955_v61 = vand.u32 4294901760, %v8686_v58  ;;  %v9133_v9 = vsel %vm193_vm2, %v21835_v0, 0 }
 0x337   : > { %v7044_v2 = vpop.f32.mrf.mxu1  ;;  %v22987_v19 = vpop.f32.mrf.mxu0 }
 0x338   : > { %v7045_v21 = vadd.f32 %v7044_v2, %v6970_v15  ;;  %v8314_v62 = vand.u32 4294901760, %v8313_v59  ;;  %v24970_v63 = vsub.f32 %v8686_v58, %v24955_v61  ;;  %v21834_v2 = vld [vmem:[%s24251_s5 + $0x64] sm:$0xf] }
 0x339   : > { %v22982_v16 = vpop.f32.mrf.mxu1  ;;  %v7263_v14 = vpop.f32.mrf.mxu0 }
 0x33a   : > { %v7118_v27 = vadd.f32 %v7117_v11, %v7045_v21  ;;  %v8755_v4 = vand.u32 4294901760, %v24970_v63  ;;  %v24998_v11 = vand.u32 4294901760, %v9133_v9  ;;  %v9576_v21 = vsel %vm193_vm2, %v21834_v2, 0 }
 0x33b   : > { %v7190_v30 = vpop.f32.mrf.mxu1  ;;  %v22997_v29 = vpop.f32.mrf.mxu0 }
 0x33c   : > { %v7191_v33 = vadd.f32 %v7190_v30, %v7118_v27  ;;  %v8756_v10 = vsub.f32 %v24970_v63, %v8755_v4  ;;  %v9201_v15 = vsub.f32 %v9133_v9, %v24998_v11 }
 0x33d   : > { %v22992_v31 = vpop.f32.mrf.mxu1 }
 0x33e   : > { %v7264_v36 = vadd.f32 %v7263_v14, %v7191_v33  ;;  %v8757_v12 = vand.u32 4294901760, %v8756_v10  ;;  %v9202_v19 = vand.u32 4294901760, %v9201_v15  ;;  %v25037_v14 = vand.u32 4294901760, %v9576_v21 }
 0x33f   : > { %v7334_v26 = vpop.f32.mrf.mxu1 }
 0x340   : > { %v7335_v39 = vadd.f32 %v7334_v26, %v7264_v36  ;;  %v9203_v16 = vsub.f32 %v9201_v15, %v9202_v19  ;;  %v9644_v27 = vsub.f32 %v9576_v21, %v25037_v14 }
 0x341   : > { %v23002_v40 = vpop.f32.mrf.mxu1 }
 0x342   : > { %v7339_v41 = vsel %vm1974_vm7, %v7335_v39, 0  ;;  %v9204_v25 = vand.u32 4294901760, %v9203_v16  ;;  %v9645_v30 = vand.u32 4294901760, %v9644_v27 }
 0x343   : > { %v7372_v42 = vand.u32 4294901760, %v7339_v41 }
 0x344   : > { %v9646_v29 = vsub.f32 %v9644_v27, %v9645_v30 }
 0x345   : > { %v7449_v45 = vsub.f32 %v7339_v41, %v7372_v42  ;;  %23004 = vmatpush3.msra.mxu0 %v7372_v42 }
 0x346   : > { %23006 = vmatmul.mubr.f32.vlgmr.msra.gmra.mxu0 %v24439_v20  ;;  %23013 = vmatprep.subr.mxu0 %v24133_v1  ;;  %v9647_v33 = vand.u32 4294901760, %v9646_v29 }
 0x347   : > { %23014 = vmatpush3.msra.mxu0 %v7449_v45  ;;  %23015 = vmatprep.mubr.msk.f32.mxu0 %vm24134_vm0, %v24133_v1  ;;  %v7450_v43 = vand.u32 4294901760, %v7449_v45 }
 0x348   : > { %23023 = vmatprep.subr.mxu0 %v24133_v1 }
 0x349   : > { %v7451_v47 = vsub.f32 %v7449_v45, %v7450_v43 }
 0x34a   : > { %23016 = vmatmul.mubr.f32.vlgmr.msra.gmra.mxu0 %v24424_v52 }
 0x34b   : > { %23024 = vmatpush3.msra.mxu0 %v7450_v43  ;;  %v7452_v49 = vand.u32 4294901760, %v7451_v47  ;;  %23025 = vmatprep.mubr.msk.f32.mxu0 %vm24134_vm0, %v24133_v1 }
 0x34c   : > { %23033 = vmatprep.subr.mxu0 %v24133_v1 }
 0x34d   : > { %23009 = vmatpush3.msra.mxu1 %v7452_v49 }
 0x34e   : > { %23011 = vmatmul.mubr.msk.f32.vlgmr.msra.gmra.mxu1 %vm1970_vm5, %v24420_v3  ;;  %23018 = vmatprep.subr.mxu1 %v24133_v1 }
 0x34f   : > { %23026 = vmatmul.mubr.msk.f32.vlgmr.msra.gmra.mxu0 %vm1970_vm5, %v24420_v3  ;;  %23019 = vmatpush3.msra.mxu1 %v7372_v42 }
 0x350   : > { %23034 = vmatpush3.msra.mxu0 %v24907_v44  ;;  %23020 = vmatprep.mubr.msk.f32.mxu1 %vm24134_vm0, %v24133_v1 }
 0x351   : > { %23028 = vmatprep.subr.mxu1 %v24133_v1  ;;  %23035 = vmatprep.mubr.msk.f32.mxu0 %vm24134_vm0, %v24133_v1 }
 0x352   : > { %23043 = vmatprep.subr.mxu0 %v24133_v1  ;;  %23021 = vmatmul.mubr.f32.vlgmr.msra.gmra.mxu1 %v24427_v60 }
 0x353   : > { %23029 = vmatpush3.msra.mxu1 %v7372_v42  ;;  %23036 = vmatmul.mubr.f32.vlgmr.msra.gmra.mxu0 %v24469_v37 }
 0x354   : > { %23044 = vmatpush3.msra.mxu0 %v7898_v46  ;;  %23030 = vmatprep.mubr.msk.f32.mxu1 %vm24134_vm0, %v24133_v1 }
 0x355   : > { %23038 = vmatprep.subr.mxu1 %v24133_v1  ;;  %23045 = vmatprep.mubr.msk.f32.mxu0 %vm24134_vm0, %v24133_v1 }
 0x356   : > { %23053 = vmatprep.subr.mxu0 %v24133_v1  ;;  %23031 = vmatmul.mubr.msk.f32.vlgmr.msra.gmra.mxu1 %vm1970_vm5, %v24420_v3 }
 0x357   : > { %23039 = vmatpush3.msra.mxu1 %v7901_v57  ;;  %23046 = vmatmul.mubr.f32.vlgmr.msra.gmra.mxu0 %v24441_v22 }
 0x358   : > { %23054 = vmatpush3.msra.mxu0 %v7899_v51  ;;  %23040 = vmatprep.mubr.msk.f32.mxu1 %vm24134_vm0, %v24133_v1 }
 0x359   : > { %23048 = vmatprep.subr.mxu1 %v24133_v1  ;;  %23055 = vmatprep.mubr.msk.f32.mxu0 %vm24134_vm0, %v24133_v1 }
 0x35a   : > { %23041 = vmatmul.mubr.msk.f32.vlgmr.msra.gmra.mxu1 %vm1970_vm5, %v24431_v5  ;;  %23063 = vmatprep.subr.mxu0 %v24133_v1 }
 0x35b   : > { %23049 = vmatpush3.msra.mxu1 %v24907_v44  ;;  %23050 = vmatprep.mubr.msk.f32.mxu1 %vm24134_vm0, %v24133_v1 }
 0x35c   : > { %23058 = vmatprep.subr.mxu1 %v24133_v1  ;;  %23056 = vmatmul.mubr.msk.f32.vlgmr.msra.gmra.mxu0 %vm1970_vm5, %v24431_v5 }
 0x35d   : > { %23064 = vmatpush3.msk.msra.mxu0 %vm24244_vm3, %v24135_v8  ;;  %23065 = vmatprep.mubr.msk.f32.mxu0 %vm24134_vm0, %v24133_v1 }
 0x35e   : > { %23051 = vmatmul.mubr.f32.vlgmr.msra.gmra.mxu1 %v24451_v28  ;;  %23073 = vmatprep.subr.mxu0 %v24133_v1 }
 0x35f   : > { %23059 = vmatpush3.msra.mxu1 %v24907_v44  ;;  %23060 = vmatprep.mubr.msk.f32.mxu1 %vm24134_vm0, %v24133_v1 }
 0x360   : > { %23066 = vmatmul.mubr.f32.vlgmr.msra.gmra.mxu0 %v8314_v62  ;;  %23068 = vmatprep.subr.mxu1 %v24133_v1 }
 0x361   : > { %23074 = vmatpush3.msra.mxu0 %v24264_v13  ;;  %23075 = vmatprep.mubr.msk.f32.mxu0 %vm24134_vm0, %v24133_v1 }
 0x362   : > { %23061 = vmatmul.mubr.msk.f32.vlgmr.msra.gmra.mxu1 %vm1970_vm5, %v24431_v5  ;;  %23083 = vmatprep.subr.mxu0 %v24133_v1 }
 0x363   : > { %23069 = vmatpush3.msra.mxu1 %v24278_v23  ;;  %23070 = vmatprep.mubr.msk.f32.mxu1 %vm24134_vm0, %v24133_v1 }
 0x364   : > { %23076 = vmatmul.mubr.f32.vlgmr.msra.gmra.mxu0 %v24932_v53  ;;  %23078 = vmatprep.subr.mxu1 %v24133_v1 }
 0x365   : > { %23084 = vmatpush3.msra.mxu0 %v24270_v17  ;;  %23085 = vmatprep.mubr.msk.f32.mxu0 %vm24134_vm0, %v24133_v1 }
 0x366   : > { %23071 = vmatmul.mubr.f32.vlgmr.msra.gmra.mxu1 %v24921_v50  ;;  %23093 = vmatprep.subr.mxu0 %v24133_v1 }
 0x367   : > { %23079 = vmatpush3.msk.msra.mxu1 %vm24244_vm3, %v24135_v8  ;;  %23080 = vmatprep.mubr.msk.f32.mxu1 %vm24134_vm0, %v24133_v1 }
 0x368   : > { %23086 = vmatmul.mubr.f32.vlgmr.msra.gmra.mxu0 %v24921_v50  ;;  %23088 = vmatprep.subr.mxu1 %v24133_v1 }
 0x369   : > { %23094 = vmatpush3.msk.msra.mxu0 %vm24239_vm1, %v24135_v8  ;;  %23095 = vmatprep.mubr.msk.f32.mxu0 %vm24134_vm0, %v24133_v1 }
 0x36a   : > { %23081 = vmatmul.mubr.f32.vlgmr.msra.gmra.mxu1 %v8312_v56  ;;  %23103 = vmatprep.subr.mxu0 %v24133_v1 }
 0x36b   : > { %23089 = vmatpush3.msk.msra.mxu1 %vm24244_vm3, %v24135_v8  ;;  %23090 = vmatprep.mubr.msk.f32.mxu1 %vm24134_vm0, %v24133_v1 }
 0x36c   : > { %23096 = vmatmul.mubr.f32.vlgmr.msra.gmra.mxu0 %v8757_v12  ;;  %23098 = vmatprep.subr.mxu1 %v24133_v1 }
 0x36d   : > { %23104 = vmatpush3.msra.mxu0 %v24272_v18  ;;  %23105 = vmatprep.mubr.msk.f32.mxu0 %vm24134_vm0, %v24133_v1 }
 0x36e   : > { %23091 = vmatmul.mubr.f32.vlgmr.msra.gmra.mxu1 %v24921_v50  ;;  %23113 = vmatprep.subr.mxu0 %v24133_v1 }
 0x36f   : > { %23099 = vmatpush3.msra.mxu1 %v24305_v32  ;;  %23100 = vmatprep.mubr.msk.f32.mxu1 %vm24134_vm0, %v24133_v1 }
 0x370   : > { %23106 = vmatmul.mubr.f32.vlgmr.msra.gmra.mxu0 %v24970_v63  ;;  %23108 = vmatprep.subr.mxu1 %v24133_v1 }
 0x371   : > { %23114 = vmatpush3.msra.mxu0 %v24281_v24  ;;  %23115 = vmatprep.mubr.msk.f32.mxu0 %vm24134_vm0, %v24133_v1 }
 0x372   : > { %23101 = vmatmul.mubr.f32.vlgmr.msra.gmra.mxu1 %v24955_v61  ;;  %23123 = vmatprep.subr.mxu0 %v24133_v1 }
 0x373   : > { %23109 = vmatpush3.msk.msra.mxu1 %vm24239_vm1, %v24135_v8  ;;  %23110 = vmatprep.mubr.msk.f32.mxu1 %vm24134_vm0, %v24133_v1 }
 0x374   : > { %23116 = vmatmul.mubr.f32.vlgmr.msra.gmra.mxu0 %v24955_v61  ;;  %23118 = vmatprep.subr.mxu1 %v24133_v1 }
 0x375   : > { %23124 = vmatpush3.msk.msra.mxu0 %vm24244_vm3, %v24135_v8  ;;  %23125 = vmatprep.mubr.msk.f32.mxu0 %vm24134_vm0, %v24133_v1 }
 0x376   : > { %23111 = vmatmul.mubr.f32.vlgmr.msra.gmra.mxu1 %v8755_v4  ;;  %23133 = vmatprep.subr.mxu0 %v24133_v1 }
 0x377   : > { %23119 = vmatpush3.msk.msra.mxu1 %vm24239_vm1, %v24135_v8  ;;  %23120 = vmatprep.mubr.msk.f32.mxu1 %vm24134_vm0, %v24133_v1 }
 0x378   : > { %23126 = vmatmul.mubr.f32.vlgmr.msra.gmra.mxu0 %v9204_v25  ;;  %23128 = vmatprep.subr.mxu1 %v24133_v1 }
 0x379   : > { %23134 = vmatpush3.msra.mxu0 %v24264_v13  ;;  %23135 = vmatprep.mubr.msk.f32.mxu0 %vm24134_vm0, %v24133_v1 }
 0x37a   : > { %23121 = vmatmul.mubr.f32.vlgmr.msra.gmra.mxu1 %v24955_v61  ;;  %23143 = vmatprep.subr.mxu0 %v24133_v1 }
 0x37b   : > { %23129 = vmatpush3.msra.mxu1 %v24278_v23  ;;  %23130 = vmatprep.mubr.msk.f32.mxu1 %vm24134_vm0, %v24133_v1 }
 0x37c   : > { %23136 = vmatmul.mubr.f32.vlgmr.msra.gmra.mxu0 %v9201_v15  ;;  %23138 = vmatprep.subr.mxu1 %v24133_v1 }
 0x37d   : > { %23144 = vmatpush3.msra.mxu0 %v24270_v17  ;;  %23145 = vmatprep.mubr.msk.f32.mxu0 %vm24134_vm0, %v24133_v1 }
 0x37e   : > { %23131 = vmatmul.mubr.f32.vlgmr.msra.gmra.mxu1 %v24998_v11  ;;  %23153 = vmatprep.subr.mxu0 %v24133_v1 }
 0x37f   : > { %23139 = vmatpush3.msk.msra.mxu1 %vm24244_vm3, %v24135_v8  ;;  %23140 = vmatprep.mubr.msk.f32.mxu1 %vm24134_vm0, %v24133_v1 }
 0x380   : > { %23146 = vmatmul.mubr.f32.vlgmr.msra.gmra.mxu0 %v24998_v11  ;;  %23148 = vmatprep.subr.mxu1 %v24133_v1 }
 0x381   : > { %23154 = vmatpush3.msk.msra.mxu0 %vm24239_vm1, %v24135_v8  ;;  %23155 = vmatprep.mubr.msk.f32.mxu0 %vm24134_vm0, %v24133_v1 }
 0x382   : > { %23141 = vmatmul.mubr.f32.vlgmr.msra.gmra.mxu1 %v9202_v19  ;;  %23163 = vmatprep.subr.mxu0 %v24133_v1 }
 0x383   : > { %23149 = vmatpush3.msk.msra.mxu1 %vm24244_vm3, %v24135_v8  ;;  %23150 = vmatprep.mubr.msk.f32.mxu1 %vm24134_vm0, %v24133_v1 }
 0x384   : > { %23156 = vmatmul.mubr.f32.vlgmr.msra.gmra.mxu0 %v9647_v33  ;;  %23158 = vmatprep.subr.mxu1 %v24133_v1 }
 0x385   : > { %23164 = vmatpush3.msra.mxu0 %v24272_v18  ;;  %23165 = vmatprep.mubr.msk.f32.mxu0 %vm24134_vm0, %v24133_v1 }
 0x386   : > { %23151 = vmatmul.mubr.f32.vlgmr.msra.gmra.mxu1 %v24998_v11  ;;  %23173 = vmatprep.subr.mxu0 %v24133_v1 }
 0x387   : > { %23159 = vmatpush3.msra.mxu1 %v24305_v32  ;;  %23160 = vmatprep.mubr.msk.f32.mxu1 %vm24134_vm0, %v24133_v1 }
 0x388   : > { %23166 = vmatmul.mubr.f32.vlgmr.msra.gmra.mxu0 %v9644_v27  ;;  %23168 = vmatprep.subr.mxu1 %v24133_v1 }
 0x389   : > { %23174 = vmatpush3.msra.mxu0 %v24281_v24  ;;  %23175 = vmatprep.mubr.msk.f32.mxu0 %vm24134_vm0, %v24133_v1 }
 0x38a   : > { %23161 = vmatmul.mubr.f32.vlgmr.msra.gmra.mxu1 %v25037_v14  ;;  %23183 = vmatprep.subr.mxu0 %v24133_v1 }
 0x38b   : > { %23169 = vmatpush3.msk.msra.mxu1 %vm24239_vm1, %v24135_v8  ;;  %23170 = vmatprep.mubr.msk.f32.mxu1 %vm24134_vm0, %v24133_v1 }
 0x38c   : > { %23176 = vmatmul.mubr.f32.vlgmr.msra.gmra.mxu0 %v25037_v14  ;;  %23178 = vmatprep.subr.mxu1 %v24133_v1 }
 0x38d   : > { %23185 = vmatprep.mubr.msk.f32.mxu0 %vm24134_vm0, %v24133_v1 }
 0x38e   : > { %23171 = vmatmul.mubr.f32.vlgmr.msra.gmra.mxu1 %v9645_v30 }
 0x38f   : > { %23179 = vmatpush3.msk.msra.mxu1 %vm24239_vm1, %v24135_v8  ;;  %23180 = vmatprep.mubr.msk.f32.mxu1 %vm24134_vm0, %v24133_v1 }
 0x390   : > { %23188 = vmatprep.subr.mxu1 %v24133_v1 }
 0x392   : > { %23181 = vmatmul.mubr.f32.vlgmr.msra.gmra.mxu1 %v25037_v14 }
 0x393   : > { %23190 = vmatprep.mubr.msk.f32.mxu1 %vm24134_vm0, %v24133_v1 }
 0x406   : > { %v7413_v31 = vpop.f32.mrf.mxu0 }
 0x408   : > { %v23007_v34 = vpop.f32.mrf.mxu0 }
 0x40a   : > { %v7563_v36 = vpop.f32.mrf.mxu0 }
 0x40c   : > { %v23017_v26 = vpop.f32.mrf.mxu0 }
 0x40e   : > { %v7489_v39 = vpop.f32.mrf.mxu1 }
 0x40f   : > { %v7490_v40 = vadd.f32 %v7489_v39, %v7413_v31  ;;  %v7711_v35 = vpop.f32.mrf.mxu0 }
 0x410   : > { %v23012_v41 = vpop.f32.mrf.mxu1 }
 0x411   : > { %v7564_v42 = vadd.f32 %v7563_v36, %v7490_v40  ;;  %v23027_v44 = vpop.f32.mrf.mxu0 }
 0x412   : > { %v7637_v45 = vpop.f32.mrf.mxu1 }
 0x413   : > { %v7638_v38 = vadd.f32 %v7637_v45, %v7564_v42  ;;  %v7862_v43 = vpop.f32.mrf.mxu0 }
 0x414   : > { %v23022_v46 = vpop.f32.mrf.mxu1 }
 0x415   : > { %v7712_v47 = vadd.f32 %v7711_v35, %v7638_v38  ;;  %v23037_v48 = vpop.f32.mrf.mxu0 }
 0x416   : > { %v7783_v49 = vpop.f32.mrf.mxu1 }
 0x417   : > { %v7784_v50 = vadd.f32 %v7783_v49, %v7712_v47  ;;  %v8012_v51 = vpop.f32.mrf.mxu0 }
 0x418   : > { %v23032_v53 = vpop.f32.mrf.mxu1 }
 0x419   : > { %v7863_v54 = vadd.f32 %v7862_v43, %v7784_v50  ;;  %v23047_v55 = vpop.f32.mrf.mxu0 }
 0x41a   : > { %v7938_v56 = vpop.f32.mrf.mxu1 }
 0x41b   : > { %v7939_v57 = vadd.f32 %v7938_v56, %v7863_v54 }
 0x41c   : > { %v23042_v58 = vpop.f32.mrf.mxu1  ;;  %v8160_v59 = vpop.f32.mrf.mxu0 }
 0x41d   : > { %v8013_v61 = vadd.f32 %v8012_v51, %v7939_v57 }
 0x41e   : > { %v8086_v62 = vpop.f32.mrf.mxu1  ;;  %v23057_v63 = vpop.f32.mrf.mxu0 }
 0x41f   : > { %v8087_v0 = vadd.f32 %v8086_v62, %v8013_v61 }
 0x420   : > { %v23052_v4 = vpop.f32.mrf.mxu1  ;;  %v8316_v9 = vpop.f32.mrf.mxu0 }
 0x421   : > { %v8161_v10 = vadd.f32 %v8160_v59, %v8087_v0 }
 0x422   : > { %v8232_v11 = vpop.f32.mrf.mxu1  ;;  %v23067_v12 = vpop.f32.mrf.mxu0 }
 0x423   : > { %v8233_v15 = vadd.f32 %v8232_v11, %v8161_v10 }
 0x424   : > { %v23062_v2 = vpop.f32.mrf.mxu1  ;;  %v8464_v19 = vpop.f32.mrf.mxu0 }
 0x425   : > { %21825 = vst.msk [vmem:[%s24675_s15 + $0x10] sm:$0xff] %vm2876_vm8, %v8233_v15 }
 0x426   : > { %v8391_v21 = vpop.f32.mrf.mxu1  ;;  %v23077_v16 = vpop.f32.mrf.mxu0 }
 0x427   : > { %v8392_v27 = vadd.f32 %v8391_v21, %v8316_v9 }
 0x428   : > { %v23072_v14 = vpop.f32.mrf.mxu1  ;;  %v8610_v25 = vpop.f32.mrf.mxu0 }
 0x429   : > { %v8465_v34 = vadd.f32 %v8464_v19, %v8392_v27 }
 0x42a   : > { %v8537_v30 = vpop.f32.mrf.mxu1  ;;  %v23087_v29 = vpop.f32.mrf.mxu0 }
 0x42b   : > { %v8538_v35 = vadd.f32 %v8537_v30, %v8465_v34 }
 0x42c   : > { %v23082_v33 = vpop.f32.mrf.mxu1  ;;  %v8759_v31 = vpop.f32.mrf.mxu0 }
 0x42d   : > { %v8611_v38 = vadd.f32 %v8610_v25, %v8538_v35 }
 0x42e   : > { %v8681_v36 = vpop.f32.mrf.mxu1  ;;  %v23097_v26 = vpop.f32.mrf.mxu0 }
 0x42f   : > { %v8682_v49 = vadd.f32 %v8681_v36, %v8611_v38 }
 0x430   : > { %v23092_v39 = vpop.f32.mrf.mxu1  ;;  %v8907_v40 = vpop.f32.mrf.mxu0 }
 0x431   : > { %v8760_v55 = vadd.f32 %v8759_v31, %v8682_v49 }
 0x432   : > { %v8834_v41 = vpop.f32.mrf.mxu1  ;;  %v23107_v42 = vpop.f32.mrf.mxu0 }
 0x433   : > { %v8835_v62 = vadd.f32 %v8834_v41, %v8760_v55 }
 0x434   : > { %v23102_v44 = vpop.f32.mrf.mxu1  ;;  %v9053_v45 = vpop.f32.mrf.mxu0 }
 0x435   : > { %v8908_v12 = vadd.f32 %v8907_v40, %v8835_v62 }
 0x436   : > { %v8980_v43 = vpop.f32.mrf.mxu1  ;;  %v23117_v46 = vpop.f32.mrf.mxu0 }
 0x437   : > { %v8981_v25 = vadd.f32 %v8980_v43, %v8908_v12 }
 0x438   : > { %v23112_v47 = vpop.f32.mrf.mxu1  ;;  %v9206_v48 = vpop.f32.mrf.mxu0 }
 0x439   : > { %v9054_v36 = vadd.f32 %v9053_v45, %v8981_v25  ;;  %v21850_v45 = vld [vmem:[%s24251_s5 + $0x18] sm:$0xf] }
 0x43a   : > { %v9124_v50 = vpop.f32.mrf.mxu1  ;;  %v23127_v51 = vpop.f32.mrf.mxu0 }
 0x43b   : > { %v9125_v42 = vadd.f32 %v9124_v50, %v9054_v36 }
 0x43c   : > { %v23122_v53 = vpop.f32.mrf.mxu1  ;;  %v9354_v54 = vpop.f32.mrf.mxu0 }
 0x43d   : > { %v10468_v43 = vsel %vm1974_vm7, %v9125_v42, 0 }
 0x43e   : > { %v9281_v56 = vpop.f32.mrf.mxu1  ;;  %v23137_v57 = vpop.f32.mrf.mxu0  ;;  %v25133_v51 = vand.u32 4294901760, %v10468_v43 }
 0x43f   : > { %v9282_v58 = vadd.f32 %v9281_v56, %v9206_v48  ;;  %v10923_v56 = vsel %vm193_vm2, %v21850_v45, 0 }
 0x440   : > { %v23132_v59 = vpop.f32.mrf.mxu1  ;;  %v9500_v61 = vpop.f32.mrf.mxu0 }
 0x441   : > { %v9355_v63 = vadd.f32 %v9354_v54, %v9282_v58  ;;  %v10578_v54 = vsub.f32 %v10468_v43, %v25133_v51  ;;  %v25147_v58 = vand.u32 4294901760, %v10923_v56 }
 0x442   : > { %v9427_v0 = vpop.f32.mrf.mxu1  ;;  %v23147_v4 = vpop.f32.mrf.mxu0 }
 0x443   : > { %v9428_v9 = vadd.f32 %v9427_v0, %v9355_v63  ;;  %v10579_v59 = vand.u32 4294901760, %v10578_v54  ;;  %v21849_v63 = vld [vmem:[%s24251_s5 + $0x8] sm:$0xf] }
 0x444   : > { %v23142_v10 = vpop.f32.mrf.mxu1  ;;  %v9649_v11 = vpop.f32.mrf.mxu0 }
 0x445   : > { %v9501_v15 = vadd.f32 %v9500_v61, %v9428_v9  ;;  %v25158_v61 = vsub.f32 %v10923_v56, %v25147_v58  ;;  %v10580_v62 = vsub.f32 %v10578_v54, %v10579_v59  ;;  %v11366_v9 = vsel %vm193_vm2, %v21849_v63, 0 }
 0x446   : > { %v9571_v2 = vpop.f32.mrf.mxu1  ;;  %v23157_v19 = vpop.f32.mrf.mxu0 }
 0x447   : > { %v9572_v21 = vadd.f32 %v9571_v2, %v9501_v15  ;;  %v10992_v0 = vand.u32 4294901760, %v25158_v61  ;;  %v10581_v4 = vand.u32 4294901760, %v10580_v62  ;;  %v21858_v2 = vld [vmem:[%s24251_s5 + $0x38] sm:$0xf] }
 0x448   : > { %v23152_v16 = vpop.f32.mrf.mxu1  ;;  %v9797_v14 = vpop.f32.mrf.mxu0 }
 0x449   : > { %v9650_v27 = vadd.f32 %v9649_v11, %v9572_v21  ;;  %v10993_v10 = vsub.f32 %v25158_v61, %v10992_v0  ;;  %v25181_v11 = vand.u32 4294901760, %v11366_v9  ;;  %v11813_v21 = vsel %vm193_vm2, %v21858_v2, 0 }
 0x44a   : > { %v9724_v30 = vpop.f32.mrf.mxu1  ;;  %v23167_v29 = vpop.f32.mrf.mxu0 }
 0x44b   : > { %v9725_v33 = vadd.f32 %v9724_v30, %v9650_v27  ;;  %v10994_v12 = vand.u32 4294901760, %v10993_v10  ;;  %v25196_v15 = vsub.f32 %v11366_v9, %v25181_v11  ;;  %v21857_v30 = vld [vmem:[%s24251_s5 + $0x28] sm:$0xf] }
 0x44c   : > { %v23162_v31 = vpop.f32.mrf.mxu1  ;;  %v9943_v34 = vpop.f32.mrf.mxu0 }
 0x44d   : > { %v9798_v26 = vadd.f32 %v9797_v14, %v9725_v33  ;;  %v11435_v19 = vand.u32 4294901760, %v25196_v15  ;;  %v25224_v14 = vand.u32 4294901760, %v11813_v21  ;;  %v12256_v33 = vsel %vm193_vm2, %v21857_v30, 0 }
 0x44e   : > { %v9870_v39 = vpop.f32.mrf.mxu1  ;;  %v23177_v35 = vpop.f32.mrf.mxu0 }
 0x44f   : > { %v9871_v41 = vadd.f32 %v9870_v39, %v9798_v26  ;;  %v11436_v16 = vsub.f32 %v25196_v15, %v11435_v19  ;;  %v11881_v27 = vsub.f32 %v11813_v21, %v25224_v14 }
 0x450   : > { %v23172_v40 = vpop.f32.mrf.mxu1 }
 0x451   : > { %v9944_v44 = vadd.f32 %v9943_v34, %v9871_v41  ;;  %v11437_v25 = vand.u32 4294901760, %v11436_v16  ;;  %v11882_v29 = vand.u32 4294901760, %v11881_v27  ;;  %v25263_v34 = vand.u32 4294901760, %v12256_v33 }
 0x452   : > { %v10014_v38 = vpop.f32.mrf.mxu1 }
 0x453   : > { %v10015_v46 = vadd.f32 %v10014_v38, %v9944_v44  ;;  %v11883_v31 = vsub.f32 %v11881_v27, %v11882_v29  ;;  %v12324_v26 = vsub.f32 %v12256_v33, %v25263_v34 }
 0x454   : > { %v23182_v47 = vpop.f32.mrf.mxu1 }
 0x455   : > { %v10019_v48 = vsel %vm1974_vm7, %v10015_v46, 0  ;;  %v11884_v36 = vand.u32 4294901760, %v11883_v31  ;;  %v12325_v39 = vand.u32 4294901760, %v12324_v26 }
 0x456   : > { %v10052_v49 = vand.u32 4294901760, %v10019_v48 }
 0x457   : > { %v12326_v35 = vsub.f32 %v12324_v26, %v12325_v39 }
 0x458   : > { %v10129_v53 = vsub.f32 %v10019_v48, %v10052_v49  ;;  %23184 = vmatpush3.msra.mxu0 %v10052_v49 }
 0x459   : > { %23186 = vmatmul.mubr.f32.vlgmr.msra.gmra.mxu0 %v24439_v20  ;;  %23193 = vmatprep.subr.mxu0 %v24133_v1  ;;  %v12327_v41 = vand.u32 4294901760, %v12326_v35 }
 0x45a   : > { %23194 = vmatpush3.msra.mxu0 %v10129_v53  ;;  %23195 = vmatprep.mubr.msk.f32.mxu0 %vm24134_vm0, %v24133_v1  ;;  %v10130_v50 = vand.u32 4294901760, %v10129_v53 }
 0x45b   : > { %23203 = vmatprep.subr.mxu0 %v24133_v1 }
 0x45c   : > { %v10131_v55 = vsub.f32 %v10129_v53, %v10130_v50 }
 0x45d   : > { %23196 = vmatmul.mubr.f32.vlgmr.msra.gmra.mxu0 %v24424_v52 }
 0x45e   : > { %23204 = vmatpush3.msra.mxu0 %v10130_v50  ;;  %v10132_v57 = vand.u32 4294901760, %v10131_v55  ;;  %23205 = vmatprep.mubr.msk.f32.mxu0 %vm24134_vm0, %v24133_v1 }
 0x45f   : > { %23213 = vmatprep.subr.mxu0 %v24133_v1 }
 0x460   : > { %23189 = vmatpush3.msra.mxu1 %v10132_v57 }
 0x461   : > { %23191 = vmatmul.mubr.msk.f32.vlgmr.msra.gmra.mxu1 %vm1970_vm5, %v24420_v3  ;;  %23198 = vmatprep.subr.mxu1 %v24133_v1 }
 0x462   : > { %23206 = vmatmul.mubr.msk.f32.vlgmr.msra.gmra.mxu0 %vm1970_vm5, %v24420_v3  ;;  %23199 = vmatpush3.msra.mxu1 %v10052_v49 }
 0x463   : > { %23214 = vmatpush3.msra.mxu0 %v25133_v51  ;;  %23200 = vmatprep.mubr.msk.f32.mxu1 %vm24134_vm0, %v24133_v1 }
 0x464   : > { %23208 = vmatprep.subr.mxu1 %v24133_v1  ;;  %23215 = vmatprep.mubr.msk.f32.mxu0 %vm24134_vm0, %v24133_v1 }
 0x465   : > { %23223 = vmatprep.subr.mxu0 %v24133_v1  ;;  %23201 = vmatmul.mubr.f32.vlgmr.msra.gmra.mxu1 %v24427_v60 }
 0x466   : > { %23209 = vmatpush3.msra.mxu1 %v10052_v49  ;;  %23216 = vmatmul.mubr.f32.vlgmr.msra.gmra.mxu0 %v24469_v37 }
 0x467   : > { %23224 = vmatpush3.msra.mxu0 %v10578_v54  ;;  %23210 = vmatprep.mubr.msk.f32.mxu1 %vm24134_vm0, %v24133_v1 }
 0x468   : > { %23218 = vmatprep.subr.mxu1 %v24133_v1  ;;  %23225 = vmatprep.mubr.msk.f32.mxu0 %vm24134_vm0, %v24133_v1 }
 0x469   : > { %23233 = vmatprep.subr.mxu0 %v24133_v1  ;;  %23211 = vmatmul.mubr.msk.f32.vlgmr.msra.gmra.mxu1 %vm1970_vm5, %v24420_v3 }
 0x46a   : > { %23219 = vmatpush3.msra.mxu1 %v10581_v4  ;;  %23226 = vmatmul.mubr.f32.vlgmr.msra.gmra.mxu0 %v24441_v22 }
 0x46b   : > { %23234 = vmatpush3.msra.mxu0 %v10579_v59  ;;  %23220 = vmatprep.mubr.msk.f32.mxu1 %vm24134_vm0, %v24133_v1 }
 0x46c   : > { %23228 = vmatprep.subr.mxu1 %v24133_v1  ;;  %23235 = vmatprep.mubr.msk.f32.mxu0 %vm24134_vm0, %v24133_v1 }
 0x46d   : > { %23221 = vmatmul.mubr.msk.f32.vlgmr.msra.gmra.mxu1 %vm1970_vm5, %v24431_v5  ;;  %23243 = vmatprep.subr.mxu0 %v24133_v1 }
 0x46e   : > { %23229 = vmatpush3.msra.mxu1 %v25133_v51  ;;  %23230 = vmatprep.mubr.msk.f32.mxu1 %vm24134_vm0, %v24133_v1 }
 0x46f   : > { %23238 = vmatprep.subr.mxu1 %v24133_v1  ;;  %23236 = vmatmul.mubr.msk.f32.vlgmr.msra.gmra.mxu0 %vm1970_vm5, %v24431_v5 }
 0x470   : > { %23244 = vmatpush3.msk.msra.mxu0 %vm24244_vm3, %v24135_v8  ;;  %23245 = vmatprep.mubr.msk.f32.mxu0 %vm24134_vm0, %v24133_v1 }
 0x471   : > { %23231 = vmatmul.mubr.f32.vlgmr.msra.gmra.mxu1 %v24451_v28  ;;  %23253 = vmatprep.subr.mxu0 %v24133_v1 }
 0x472   : > { %23239 = vmatpush3.msra.mxu1 %v25133_v51  ;;  %23240 = vmatprep.mubr.msk.f32.mxu1 %vm24134_vm0, %v24133_v1 }
 0x473   : > { %23246 = vmatmul.mubr.f32.vlgmr.msra.gmra.mxu0 %v10994_v12  ;;  %23248 = vmatprep.subr.mxu1 %v24133_v1 }
 0x474   : > { %23254 = vmatpush3.msra.mxu0 %v24264_v13  ;;  %23255 = vmatprep.mubr.msk.f32.mxu0 %vm24134_vm0, %v24133_v1 }
 0x475   : > { %23241 = vmatmul.mubr.msk.f32.vlgmr.msra.gmra.mxu1 %vm1970_vm5, %v24431_v5  ;;  %23263 = vmatprep.subr.mxu0 %v24133_v1 }
 0x476   : > { %23249 = vmatpush3.msra.mxu1 %v24278_v23  ;;  %23250 = vmatprep.mubr.msk.f32.mxu1 %vm24134_vm0, %v24133_v1 }
 0x477   : > { %23256 = vmatmul.mubr.f32.vlgmr.msra.gmra.mxu0 %v25158_v61  ;;  %23258 = vmatprep.subr.mxu1 %v24133_v1 }
 0x478   : > { %23264 = vmatpush3.msra.mxu0 %v24270_v17  ;;  %23265 = vmatprep.mubr.msk.f32.mxu0 %vm24134_vm0, %v24133_v1 }
 0x479   : > { %23251 = vmatmul.mubr.f32.vlgmr.msra.gmra.mxu1 %v25147_v58  ;;  %23273 = vmatprep.subr.mxu0 %v24133_v1 }
 0x47a   : > { %23259 = vmatpush3.msk.msra.mxu1 %vm24244_vm3, %v24135_v8  ;;  %23260 = vmatprep.mubr.msk.f32.mxu1 %vm24134_vm0, %v24133_v1 }
 0x47b   : > { %23266 = vmatmul.mubr.f32.vlgmr.msra.gmra.mxu0 %v25147_v58  ;;  %23268 = vmatprep.subr.mxu1 %v24133_v1 }
 0x47c   : > { %23274 = vmatpush3.msk.msra.mxu0 %vm24239_vm1, %v24135_v8  ;;  %23275 = vmatprep.mubr.msk.f32.mxu0 %vm24134_vm0, %v24133_v1 }
 0x47d   : > { %23261 = vmatmul.mubr.f32.vlgmr.msra.gmra.mxu1 %v10992_v0  ;;  %23283 = vmatprep.subr.mxu0 %v24133_v1 }
 0x47e   : > { %23269 = vmatpush3.msk.msra.mxu1 %vm24244_vm3, %v24135_v8  ;;  %23270 = vmatprep.mubr.msk.f32.mxu1 %vm24134_vm0, %v24133_v1 }
 0x47f   : > { %23276 = vmatmul.mubr.f32.vlgmr.msra.gmra.mxu0 %v11437_v25  ;;  %23278 = vmatprep.subr.mxu1 %v24133_v1 }
 0x480   : > { %23284 = vmatpush3.msra.mxu0 %v24272_v18  ;;  %23285 = vmatprep.mubr.msk.f32.mxu0 %vm24134_vm0, %v24133_v1 }
 0x481   : > { %23271 = vmatmul.mubr.f32.vlgmr.msra.gmra.mxu1 %v25147_v58  ;;  %23293 = vmatprep.subr.mxu0 %v24133_v1 }
 0x482   : > { %23279 = vmatpush3.msra.mxu1 %v24305_v32  ;;  %23280 = vmatprep.mubr.msk.f32.mxu1 %vm24134_vm0, %v24133_v1 }
 0x483   : > { %23286 = vmatmul.mubr.f32.vlgmr.msra.gmra.mxu0 %v25196_v15  ;;  %23288 = vmatprep.subr.mxu1 %v24133_v1 }
 0x484   : > { %23294 = vmatpush3.msra.mxu0 %v24281_v24  ;;  %23295 = vmatprep.mubr.msk.f32.mxu0 %vm24134_vm0, %v24133_v1 }
 0x485   : > { %23281 = vmatmul.mubr.f32.vlgmr.msra.gmra.mxu1 %v25181_v11  ;;  %23303 = vmatprep.subr.mxu0 %v24133_v1 }
 0x486   : > { %23289 = vmatpush3.msk.msra.mxu1 %vm24239_vm1, %v24135_v8  ;;  %23290 = vmatprep.mubr.msk.f32.mxu1 %vm24134_vm0, %v24133_v1 }
 0x487   : > { %23296 = vmatmul.mubr.f32.vlgmr.msra.gmra.mxu0 %v25181_v11  ;;  %23298 = vmatprep.subr.mxu1 %v24133_v1 }
 0x488   : > { %23304 = vmatpush3.msk.msra.mxu0 %vm24244_vm3, %v24135_v8  ;;  %23305 = vmatprep.mubr.msk.f32.mxu0 %vm24134_vm0, %v24133_v1 }
 0x489   : > { %23291 = vmatmul.mubr.f32.vlgmr.msra.gmra.mxu1 %v11435_v19  ;;  %23313 = vmatprep.subr.mxu0 %v24133_v1 }
 0x48a   : > { %23299 = vmatpush3.msk.msra.mxu1 %vm24239_vm1, %v24135_v8  ;;  %23300 = vmatprep.mubr.msk.f32.mxu1 %vm24134_vm0, %v24133_v1 }
 0x48b   : > { %23306 = vmatmul.mubr.f32.vlgmr.msra.gmra.mxu0 %v11884_v36  ;;  %23308 = vmatprep.subr.mxu1 %v24133_v1 }
 0x48c   : > { %23314 = vmatpush3.msra.mxu0 %v24264_v13  ;;  %23315 = vmatprep.mubr.msk.f32.mxu0 %vm24134_vm0, %v24133_v1 }
 0x48d   : > { %23301 = vmatmul.mubr.f32.vlgmr.msra.gmra.mxu1 %v25181_v11  ;;  %23323 = vmatprep.subr.mxu0 %v24133_v1 }
 0x48e   : > { %23309 = vmatpush3.msra.mxu1 %v24278_v23  ;;  %23310 = vmatprep.mubr.msk.f32.mxu1 %vm24134_vm0, %v24133_v1 }
 0x48f   : > { %23316 = vmatmul.mubr.f32.vlgmr.msra.gmra.mxu0 %v11881_v27  ;;  %23318 = vmatprep.subr.mxu1 %v24133_v1 }
 0x490   : > { %23324 = vmatpush3.msra.mxu0 %v24270_v17  ;;  %23325 = vmatprep.mubr.msk.f32.mxu0 %vm24134_vm0, %v24133_v1 }
 0x491   : > { %23311 = vmatmul.mubr.f32.vlgmr.msra.gmra.mxu1 %v25224_v14  ;;  %23333 = vmatprep.subr.mxu0 %v24133_v1 }
 0x492   : > { %23319 = vmatpush3.msk.msra.mxu1 %vm24244_vm3, %v24135_v8  ;;  %23320 = vmatprep.mubr.msk.f32.mxu1 %vm24134_vm0, %v24133_v1 }
 0x493   : > { %23326 = vmatmul.mubr.f32.vlgmr.msra.gmra.mxu0 %v25224_v14  ;;  %23328 = vmatprep.subr.mxu1 %v24133_v1 }
 0x494   : > { %23334 = vmatpush3.msk.msra.mxu0 %vm24239_vm1, %v24135_v8  ;;  %23335 = vmatprep.mubr.msk.f32.mxu0 %vm24134_vm0, %v24133_v1 }
 0x495   : > { %23321 = vmatmul.mubr.f32.vlgmr.msra.gmra.mxu1 %v11882_v29  ;;  %23343 = vmatprep.subr.mxu0 %v24133_v1 }
 0x496   : > { %23329 = vmatpush3.msk.msra.mxu1 %vm24244_vm3, %v24135_v8  ;;  %23330 = vmatprep.mubr.msk.f32.mxu1 %vm24134_vm0, %v24133_v1 }
 0x497   : > { %23336 = vmatmul.mubr.f32.vlgmr.msra.gmra.mxu0 %v12327_v41  ;;  %23338 = vmatprep.subr.mxu1 %v24133_v1 }
 0x498   : > { %23344 = vmatpush3.msra.mxu0 %v24272_v18  ;;  %23345 = vmatprep.mubr.msk.f32.mxu0 %vm24134_vm0, %v24133_v1 }
 0x499   : > { %23331 = vmatmul.mubr.f32.vlgmr.msra.gmra.mxu1 %v25224_v14  ;;  %23353 = vmatprep.subr.mxu0 %v24133_v1 }
 0x49a   : > { %23339 = vmatpush3.msra.mxu1 %v24305_v32  ;;  %23340 = vmatprep.mubr.msk.f32.mxu1 %vm24134_vm0, %v24133_v1 }
 0x49b   : > { %23346 = vmatmul.mubr.f32.vlgmr.msra.gmra.mxu0 %v12324_v26  ;;  %23348 = vmatprep.subr.mxu1 %v24133_v1 }
 0x49c   : > { %23354 = vmatpush3.msra.mxu0 %v24281_v24  ;;  %23355 = vmatprep.mubr.msk.f32.mxu0 %vm24134_vm0, %v24133_v1 }
 0x49d   : > { %23341 = vmatmul.mubr.f32.vlgmr.msra.gmra.mxu1 %v25263_v34  ;;  %23363 = vmatprep.subr.mxu0 %v24133_v1 }
 0x49e   : > { %23349 = vmatpush3.msk.msra.mxu1 %vm24239_vm1, %v24135_v8  ;;  %23350 = vmatprep.mubr.msk.f32.mxu1 %vm24134_vm0, %v24133_v1 }
 0x49f   : > { %23356 = vmatmul.mubr.f32.vlgmr.msra.gmra.mxu0 %v25263_v34  ;;  %23358 = vmatprep.subr.mxu1 %v24133_v1 }
 0x4a0   : > { %23365 = vmatprep.mubr.msk.f32.mxu0 %vm24134_vm0, %v24133_v1 }
 0x4a1   : > { %23351 = vmatmul.mubr.f32.vlgmr.msra.gmra.mxu1 %v12325_v39 }
 0x4a2   : > { %23359 = vmatpush3.msk.msra.mxu1 %vm24239_vm1, %v24135_v8  ;;  %23360 = vmatprep.mubr.msk.f32.mxu1 %vm24134_vm0, %v24133_v1 }
 0x4a3   : > { %23368 = vmatprep.subr.mxu1 %v24133_v1 }
 0x4a5   : > { %23361 = vmatmul.mubr.f32.vlgmr.msra.gmra.mxu1 %v25263_v34 }
 0x4a6   : > { %23370 = vmatprep.mubr.msk.f32.mxu1 %vm24134_vm0, %v24133_v1 }
 0x519   : > { %v10093_v40 = vpop.f32.mrf.mxu0 }
 0x51b   : > { %v23187_v42 = vpop.f32.mrf.mxu0 }
 0x51d   : > { %v10243_v44 = vpop.f32.mrf.mxu0 }
 0x51f   : > { %v23197_v38 = vpop.f32.mrf.mxu0 }
 0x521   : > { %v10169_v46 = vpop.f32.mrf.mxu1 }
 0x522   : > { %v10170_v47 = vadd.f32 %v10169_v46, %v10093_v40  ;;  %v10391_v43 = vpop.f32.mrf.mxu0 }
 0x523   : > { %v23192_v48 = vpop.f32.mrf.mxu1 }
 0x524   : > { %v10244_v49 = vadd.f32 %v10243_v44, %v10170_v47  ;;  %v23207_v51 = vpop.f32.mrf.mxu0 }
 0x525   : > { %v10317_v53 = vpop.f32.mrf.mxu1 }
 0x526   : > { %v10318_v45 = vadd.f32 %v10317_v53, %v10244_v49  ;;  %v10542_v50 = vpop.f32.mrf.mxu0 }
 0x527   : > { %v23202_v54 = vpop.f32.mrf.mxu1 }
 0x528   : > { %v10392_v55 = vadd.f32 %v10391_v43, %v10318_v45  ;;  %v23217_v56 = vpop.f32.mrf.mxu0 }
 0x529   : > { %v10463_v57 = vpop.f32.mrf.mxu1 }
 0x52a   : > { %v10464_v58 = vadd.f32 %v10463_v57, %v10392_v55  ;;  %v10692_v59 = vpop.f32.mrf.mxu0 }
 0x52b   : > { %v23212_v61 = vpop.f32.mrf.mxu1 }
 0x52c   : > { %v10543_v62 = vadd.f32 %v10542_v50, %v10464_v58  ;;  %v23227_v63 = vpop.f32.mrf.mxu0 }
 0x52d   : > { %v10618_v0 = vpop.f32.mrf.mxu1 }
 0x52e   : > { %v10619_v4 = vadd.f32 %v10618_v0, %v10543_v62 }
 0x52f   : > { %v23222_v9 = vpop.f32.mrf.mxu1  ;;  %v10840_v10 = vpop.f32.mrf.mxu0 }
 0x530   : > { %v10693_v11 = vadd.f32 %v10692_v59, %v10619_v4 }
 0x531   : > { %v10766_v12 = vpop.f32.mrf.mxu1  ;;  %v23237_v15 = vpop.f32.mrf.mxu0 }
 0x532   : > { %v10767_v2 = vadd.f32 %v10766_v12, %v10693_v11 }
 0x533   : > { %v23232_v19 = vpop.f32.mrf.mxu1  ;;  %v10996_v21 = vpop.f32.mrf.mxu0 }
 0x534   : > { %v10841_v16 = vadd.f32 %v10840_v10, %v10767_v2 }
 0x535   : > { %v10912_v14 = vpop.f32.mrf.mxu1  ;;  %v23247_v25 = vpop.f32.mrf.mxu0 }
 0x536   : > { %v10913_v27 = vadd.f32 %v10912_v14, %v10841_v16 }
 0x537   : > { %v23242_v30 = vpop.f32.mrf.mxu1  ;;  %v11144_v29 = vpop.f32.mrf.mxu0 }
 0x538   : > { %21848 = vst.msk [vmem:[%s24675_s15 + $0x18] sm:$0xff] %vm2876_vm8, %v10913_v27 }
 0x539   : > { %v11071_v33 = vpop.f32.mrf.mxu1  ;;  %v23257_v31 = vpop.f32.mrf.mxu0 }
 0x53a   : > { %v11072_v26 = vadd.f32 %v11071_v33, %v10996_v21 }
 0x53b   : > { %v23252_v34 = vpop.f32.mrf.mxu1  ;;  %v11290_v36 = vpop.f32.mrf.mxu0 }
 0x53c   : > { %v11145_v42 = vadd.f32 %v11144_v29, %v11072_v26 }
 0x53d   : > { %v11217_v39 = vpop.f32.mrf.mxu1  ;;  %v23267_v35 = vpop.f32.mrf.mxu0 }
 0x53e   : > { %v11218_v43 = vadd.f32 %v11217_v39, %v11145_v42 }
 0x53f   : > { %v23262_v41 = vpop.f32.mrf.mxu1  ;;  %v11439_v40 = vpop.f32.mrf.mxu0 }
 0x540   : > { %v11291_v45 = vadd.f32 %v11290_v36, %v11218_v43 }
 0x541   : > { %v11361_v44 = vpop.f32.mrf.mxu1  ;;  %v23277_v38 = vpop.f32.mrf.mxu0 }
 0x542   : > { %v11362_v57 = vadd.f32 %v11361_v44, %v11291_v45 }
 0x543   : > { %v23272_v46 = vpop.f32.mrf.mxu1  ;;  %v11587_v47 = vpop.f32.mrf.mxu0 }
 0x544   : > { %v11440_v63 = vadd.f32 %v11439_v40, %v11362_v57 }
 0x545   : > { %v11514_v48 = vpop.f32.mrf.mxu1  ;;  %v23287_v49 = vpop.f32.mrf.mxu0 }
 0x546   : > { %v11515_v12 = vadd.f32 %v11514_v48, %v11440_v63 }
 0x547   : > { %v23282_v51 = vpop.f32.mrf.mxu1  ;;  %v11733_v53 = vpop.f32.mrf.mxu0 }
 0x548   : > { %v11588_v25 = vadd.f32 %v11587_v47, %v11515_v12 }
 0x549   : > { %v11660_v50 = vpop.f32.mrf.mxu1  ;;  %v23297_v54 = vpop.f32.mrf.mxu0 }
 0x54a   : > { %v11661_v36 = vadd.f32 %v11660_v50, %v11588_v25 }
 0x54b   : > { %v23292_v55 = vpop.f32.mrf.mxu1  ;;  %v11886_v56 = vpop.f32.mrf.mxu0 }
 0x54c   : > { %v11734_v44 = vadd.f32 %v11733_v53, %v11661_v36  ;;  %v21873_v53 = vld [vmem:[%s24251_s5 + $0x58] sm:$0xf] }
 0x54d   : > { %v11804_v58 = vpop.f32.mrf.mxu1  ;;  %v23307_v59 = vpop.f32.mrf.mxu0 }
 0x54e   : > { %v11805_v49 = vadd.f32 %v11804_v58, %v11734_v44 }
 0x54f   : > { %v23302_v61 = vpop.f32.mrf.mxu1  ;;  %v12034_v62 = vpop.f32.mrf.mxu0 }
 0x550   : > { %v13148_v50 = vsel %vm1974_vm7, %v11805_v49, 0 }
 0x551   : > { %v11961_v0 = vpop.f32.mrf.mxu1  ;;  %v23317_v4 = vpop.f32.mrf.mxu0  ;;  %v25359_v59 = vand.u32 4294901760, %v13148_v50 }
 0x552   : > { %v11962_v9 = vadd.f32 %v11961_v0, %v11886_v56  ;;  %v13603_v0 = vsel %vm193_vm2, %v21873_v53, 0 }
 0x553   : > { %v23312_v10 = vpop.f32.mrf.mxu1  ;;  %v12180_v11 = vpop.f32.mrf.mxu0 }
 0x554   : > { %v12035_v15 = vadd.f32 %v12034_v62, %v11962_v9  ;;  %v13258_v62 = vsub.f32 %v13148_v50, %v25359_v59  ;;  %v25373_v9 = vand.u32 4294901760, %v13603_v0 }
 0x555   : > { %v12107_v2 = vpop.f32.mrf.mxu1  ;;  %v23327_v19 = vpop.f32.mrf.mxu0 }
 0x556   : > { %v12108_v21 = vadd.f32 %v12107_v2, %v12035_v15  ;;  %v13259_v10 = vand.u32 4294901760, %v13258_v62  ;;  %v21872_v15 = vld [vmem:[%s24251_s5 + $0x48] sm:$0xf] }
 0x557   : > { %v23322_v16 = vpop.f32.mrf.mxu1  ;;  %v12329_v14 = vpop.f32.mrf.mxu0 }
 0x558   : > { %v12181_v27 = vadd.f32 %v12180_v11, %v12108_v21  ;;  %v25384_v11 = vsub.f32 %v13603_v0, %v25373_v9  ;;  %v13260_v12 = vsub.f32 %v13258_v62, %v13259_v10  ;;  %v14046_v21 = vsel %vm193_vm2, %v21872_v15, 0 }
 0x559   : > { %v12251_v30 = vpop.f32.mrf.mxu1  ;;  %v23337_v29 = vpop.f32.mrf.mxu0 }
 0x55a   : > { %v12252_v33 = vadd.f32 %v12251_v30, %v12181_v27  ;;  %v13672_v2 = vand.u32 4294901760, %v25384_v11  ;;  %v13261_v19 = vand.u32 4294901760, %v13260_v12  ;;  %v21881_v30 = vld [vmem:[%s24251_s5 + $0x78] sm:$0xf] }
 0x55b   : > { %v23332_v31 = vpop.f32.mrf.mxu1  ;;  %v12477_v34 = vpop.f32.mrf.mxu0 }
 0x55c   : > { %v12330_v26 = vadd.f32 %v12329_v14, %v12252_v33  ;;  %v13673_v16 = vsub.f32 %v25384_v11, %v13672_v2  ;;  %v25407_v14 = vand.u32 4294901760, %v14046_v21  ;;  %v14493_v33 = vsel %vm193_vm2, %v21881_v30, 0 }
 0x55d   : > { %v12404_v39 = vpop.f32.mrf.mxu1  ;;  %v23347_v35 = vpop.f32.mrf.mxu0 }
 0x55e   : > { %v12405_v41 = vadd.f32 %v12404_v39, %v12330_v26  ;;  %v13674_v25 = vand.u32 4294901760, %v13673_v16  ;;  %v25422_v27 = vsub.f32 %v14046_v21, %v25407_v14  ;;  %v21880_v39 = vld [vmem:[%s24251_s5 + $0x68] sm:$0xf] }
 0x55f   : > { %v23342_v40 = vpop.f32.mrf.mxu1  ;;  %v12623_v42 = vpop.f32.mrf.mxu0 }
 0x560   : > { %v12478_v38 = vadd.f32 %v12477_v34, %v12405_v41  ;;  %v14115_v29 = vand.u32 4294901760, %v25422_v27  ;;  %v25450_v34 = vand.u32 4294901760, %v14493_v33  ;;  %v14936_v41 = vsel %vm193_vm2, %v21880_v39, 0 }
 0x561   : > { %v12550_v46 = vpop.f32.mrf.mxu1  ;;  %v23357_v43 = vpop.f32.mrf.mxu0 }
 0x562   : > { %v12551_v48 = vadd.f32 %v12550_v46, %v12478_v38  ;;  %v14116_v31 = vsub.f32 %v25422_v27, %v14115_v29  ;;  %v14561_v26 = vsub.f32 %v14493_v33, %v25450_v34 }
 0x563   : > { %v23352_v47 = vpop.f32.mrf.mxu1 }
 0x564   : > { %v12624_v51 = vadd.f32 %v12623_v42, %v12551_v48  ;;  %v14117_v36 = vand.u32 4294901760, %v14116_v31  ;;  %v14562_v35 = vand.u32 4294901760, %v14561_v26  ;;  %v25489_v42 = vand.u32 4294901760, %v14936_v41 }
 0x565   : > { %v12694_v45 = vpop.f32.mrf.mxu1 }
 0x566   : > { %v12695_v54 = vadd.f32 %v12694_v45, %v12624_v51  ;;  %v14563_v40 = vsub.f32 %v14561_v26, %v14562_v35  ;;  %v15004_v38 = vsub.f32 %v14936_v41, %v25489_v42 }
 0x567   : > { %v23362_v55 = vpop.f32.mrf.mxu1 }
 0x568   : > { %v12699_v56 = vsel %vm1974_vm7, %v12695_v54, 0  ;;  %v14564_v44 = vand.u32 4294901760, %v14563_v40  ;;  %v15005_v46 = vand.u32 4294901760, %v15004_v38 }
 0x569   : > { %v12732_v57 = vand.u32 4294901760, %v12699_v56 }
 0x56a   : > { %v15006_v43 = vsub.f32 %v15004_v38, %v15005_v46 }
 0x56b   : > { %v12809_v61 = vsub.f32 %v12699_v56, %v12732_v57  ;;  %23364 = vmatpush3.msra.mxu0 %v12732_v57 }
 0x56c   : > { %23366 = vmatmul.mubr.f32.vlgmr.msra.gmra.mxu0 %v24439_v20  ;;  %23373 = vmatprep.subr.mxu0 %v24133_v1  ;;  %v15007_v48 = vand.u32 4294901760, %v15006_v43 }
 0x56d   : > { %23374 = vmatpush3.msra.mxu0 %v12809_v61  ;;  %23375 = vmatprep.mubr.msk.f32.mxu0 %vm24134_vm0, %v24133_v1  ;;  %v12810_v58 = vand.u32 4294901760, %v12809_v61 }
 0x56e   : > { %23383 = vmatprep.subr.mxu0 %v24133_v1 }
 0x56f   : > { %v12811_v63 = vsub.f32 %v12809_v61, %v12810_v58 }
 0x570   : > { %23376 = vmatmul.mubr.f32.vlgmr.msra.gmra.mxu0 %v24424_v52 }
 0x571   : > { %23384 = vmatpush3.msra.mxu0 %v12810_v58  ;;  %v12812_v4 = vand.u32 4294901760, %v12811_v63  ;;  %23385 = vmatprep.mubr.msk.f32.mxu0 %vm24134_vm0, %v24133_v1 }
 0x572   : > { %23393 = vmatprep.subr.mxu0 %v24133_v1 }
 0x573   : > { %23369 = vmatpush3.msra.mxu1 %v12812_v4 }
 0x574   : > { %23371 = vmatmul.mubr.msk.f32.vlgmr.msra.gmra.mxu1 %vm1970_vm5, %v24420_v3  ;;  %23378 = vmatprep.subr.mxu1 %v24133_v1 }
 0x575   : > { %23386 = vmatmul.mubr.msk.f32.vlgmr.msra.gmra.mxu0 %vm1970_vm5, %v24420_v3  ;;  %23379 = vmatpush3.msra.mxu1 %v12732_v57 }
 0x576   : > { %23394 = vmatpush3.msra.mxu0 %v25359_v59  ;;  %23380 = vmatprep.mubr.msk.f32.mxu1 %vm24134_vm0, %v24133_v1 }
 0x577   : > { %23388 = vmatprep.subr.mxu1 %v24133_v1  ;;  %23395 = vmatprep.mubr.msk.f32.mxu0 %vm24134_vm0, %v24133_v1 }
 0x578   : > { %23403 = vmatprep.subr.mxu0 %v24133_v1  ;;  %23381 = vmatmul.mubr.f32.vlgmr.msra.gmra.mxu1 %v24427_v60 }
 0x579   : > { %23389 = vmatpush3.msra.mxu1 %v12732_v57  ;;  %23396 = vmatmul.mubr.f32.vlgmr.msra.gmra.mxu0 %v24469_v37 }
 0x57a   : > { %23404 = vmatpush3.msra.mxu0 %v13258_v62  ;;  %23390 = vmatprep.mubr.msk.f32.mxu1 %vm24134_vm0, %v24133_v1 }
 0x57b   : > { %23398 = vmatprep.subr.mxu1 %v24133_v1  ;;  %23405 = vmatprep.mubr.msk.f32.mxu0 %vm24134_vm0, %v24133_v1 }
 0x57c   : > { %23413 = vmatprep.subr.mxu0 %v24133_v1  ;;  %23391 = vmatmul.mubr.msk.f32.vlgmr.msra.gmra.mxu1 %vm1970_vm5, %v24420_v3 }
 0x57d   : > { %23399 = vmatpush3.msra.mxu1 %v13261_v19  ;;  %23406 = vmatmul.mubr.f32.vlgmr.msra.gmra.mxu0 %v24441_v22 }
 0x57e   : > { %23414 = vmatpush3.msra.mxu0 %v13259_v10  ;;  %23400 = vmatprep.mubr.msk.f32.mxu1 %vm24134_vm0, %v24133_v1 }
 0x57f   : > { %23408 = vmatprep.subr.mxu1 %v24133_v1  ;;  %23415 = vmatprep.mubr.msk.f32.mxu0 %vm24134_vm0, %v24133_v1 }
 0x580   : > { %23401 = vmatmul.mubr.msk.f32.vlgmr.msra.gmra.mxu1 %vm1970_vm5, %v24431_v5  ;;  %23423 = vmatprep.subr.mxu0 %v24133_v1 }
 0x581   : > { %23409 = vmatpush3.msra.mxu1 %v25359_v59  ;;  %23410 = vmatprep.mubr.msk.f32.mxu1 %vm24134_vm0, %v24133_v1 }
 0x582   : > { %23418 = vmatprep.subr.mxu1 %v24133_v1  ;;  %23416 = vmatmul.mubr.msk.f32.vlgmr.msra.gmra.mxu0 %vm1970_vm5, %v24431_v5 }
 0x583   : > { %23424 = vmatpush3.msk.msra.mxu0 %vm24244_vm3, %v24135_v8  ;;  %23425 = vmatprep.mubr.msk.f32.mxu0 %vm24134_vm0, %v24133_v1 }
 0x584   : > { %23411 = vmatmul.mubr.f32.vlgmr.msra.gmra.mxu1 %v24451_v28  ;;  %23433 = vmatprep.subr.mxu0 %v24133_v1 }
 0x585   : > { %23419 = vmatpush3.msra.mxu1 %v25359_v59  ;;  %23420 = vmatprep.mubr.msk.f32.mxu1 %vm24134_vm0, %v24133_v1 }
 0x586   : > { %23426 = vmatmul.mubr.f32.vlgmr.msra.gmra.mxu0 %v13674_v25  ;;  %23428 = vmatprep.subr.mxu1 %v24133_v1 }
 0x587   : > { %23434 = vmatpush3.msra.mxu0 %v24264_v13  ;;  %23435 = vmatprep.mubr.msk.f32.mxu0 %vm24134_vm0, %v24133_v1 }
 0x588   : > { %23421 = vmatmul.mubr.msk.f32.vlgmr.msra.gmra.mxu1 %vm1970_vm5, %v24431_v5  ;;  %23443 = vmatprep.subr.mxu0 %v24133_v1 }
 0x589   : > { %23429 = vmatpush3.msra.mxu1 %v24278_v23  ;;  %23430 = vmatprep.mubr.msk.f32.mxu1 %vm24134_vm0, %v24133_v1 }
 0x58a   : > { %23436 = vmatmul.mubr.f32.vlgmr.msra.gmra.mxu0 %v25384_v11  ;;  %23438 = vmatprep.subr.mxu1 %v24133_v1 }
 0x58b   : > { %23444 = vmatpush3.msra.mxu0 %v24270_v17  ;;  %23445 = vmatprep.mubr.msk.f32.mxu0 %vm24134_vm0, %v24133_v1 }
 0x58c   : > { %23431 = vmatmul.mubr.f32.vlgmr.msra.gmra.mxu1 %v25373_v9  ;;  %23453 = vmatprep.subr.mxu0 %v24133_v1 }
 0x58d   : > { %23439 = vmatpush3.msk.msra.mxu1 %vm24244_vm3, %v24135_v8  ;;  %23440 = vmatprep.mubr.msk.f32.mxu1 %vm24134_vm0, %v24133_v1 }
 0x58e   : > { %23446 = vmatmul.mubr.f32.vlgmr.msra.gmra.mxu0 %v25373_v9  ;;  %23448 = vmatprep.subr.mxu1 %v24133_v1 }
 0x58f   : > { %23454 = vmatpush3.msk.msra.mxu0 %vm24239_vm1, %v24135_v8  ;;  %23455 = vmatprep.mubr.msk.f32.mxu0 %vm24134_vm0, %v24133_v1 }
 0x590   : > { %23441 = vmatmul.mubr.f32.vlgmr.msra.gmra.mxu1 %v13672_v2  ;;  %23463 = vmatprep.subr.mxu0 %v24133_v1 }
 0x591   : > { %23449 = vmatpush3.msk.msra.mxu1 %vm24244_vm3, %v24135_v8  ;;  %23450 = vmatprep.mubr.msk.f32.mxu1 %vm24134_vm0, %v24133_v1 }
 0x592   : > { %23456 = vmatmul.mubr.f32.vlgmr.msra.gmra.mxu0 %v14117_v36  ;;  %23458 = vmatprep.subr.mxu1 %v24133_v1 }
 0x593   : > { %23464 = vmatpush3.msra.mxu0 %v24272_v18  ;;  %23465 = vmatprep.mubr.msk.f32.mxu0 %vm24134_vm0, %v24133_v1 }
 0x594   : > { %23451 = vmatmul.mubr.f32.vlgmr.msra.gmra.mxu1 %v25373_v9  ;;  %23473 = vmatprep.subr.mxu0 %v24133_v1 }
 0x595   : > { %23459 = vmatpush3.msra.mxu1 %v24305_v32  ;;  %23460 = vmatprep.mubr.msk.f32.mxu1 %vm24134_vm0, %v24133_v1 }
 0x596   : > { %23466 = vmatmul.mubr.f32.vlgmr.msra.gmra.mxu0 %v25422_v27  ;;  %23468 = vmatprep.subr.mxu1 %v24133_v1 }
 0x597   : > { %23474 = vmatpush3.msra.mxu0 %v24281_v24  ;;  %23475 = vmatprep.mubr.msk.f32.mxu0 %vm24134_vm0, %v24133_v1 }
 0x598   : > { %23461 = vmatmul.mubr.f32.vlgmr.msra.gmra.mxu1 %v25407_v14  ;;  %23483 = vmatprep.subr.mxu0 %v24133_v1 }
 0x599   : > { %23469 = vmatpush3.msk.msra.mxu1 %vm24239_vm1, %v24135_v8  ;;  %23470 = vmatprep.mubr.msk.f32.mxu1 %vm24134_vm0, %v24133_v1 }
 0x59a   : > { %23476 = vmatmul.mubr.f32.vlgmr.msra.gmra.mxu0 %v25407_v14  ;;  %23478 = vmatprep.subr.mxu1 %v24133_v1 }
 0x59b   : > { %23484 = vmatpush3.msk.msra.mxu0 %vm24244_vm3, %v24135_v8  ;;  %23485 = vmatprep.mubr.msk.f32.mxu0 %vm24134_vm0, %v24133_v1 }
 0x59c   : > { %23471 = vmatmul.mubr.f32.vlgmr.msra.gmra.mxu1 %v14115_v29  ;;  %23493 = vmatprep.subr.mxu0 %v24133_v1 }
 0x59d   : > { %23479 = vmatpush3.msk.msra.mxu1 %vm24239_vm1, %v24135_v8  ;;  %23480 = vmatprep.mubr.msk.f32.mxu1 %vm24134_vm0, %v24133_v1 }
 0x59e   : > { %23486 = vmatmul.mubr.f32.vlgmr.msra.gmra.mxu0 %v14564_v44  ;;  %23488 = vmatprep.subr.mxu1 %v24133_v1 }
 0x59f   : > { %23494 = vmatpush3.msra.mxu0 %v24264_v13  ;;  %23495 = vmatprep.mubr.msk.f32.mxu0 %vm24134_vm0, %v24133_v1 }
 0x5a0   : > { %23481 = vmatmul.mubr.f32.vlgmr.msra.gmra.mxu1 %v25407_v14  ;;  %23503 = vmatprep.subr.mxu0 %v24133_v1 }
 0x5a1   : > { %23489 = vmatpush3.msra.mxu1 %v24278_v23  ;;  %23490 = vmatprep.mubr.msk.f32.mxu1 %vm24134_vm0, %v24133_v1 }
 0x5a2   : > { %23496 = vmatmul.mubr.f32.vlgmr.msra.gmra.mxu0 %v14561_v26  ;;  %23498 = vmatprep.subr.mxu1 %v24133_v1 }
 0x5a3   : > { %23504 = vmatpush3.msra.mxu0 %v24270_v17  ;;  %23505 = vmatprep.mubr.msk.f32.mxu0 %vm24134_vm0, %v24133_v1 }
 0x5a4   : > { %23491 = vmatmul.mubr.f32.vlgmr.msra.gmra.mxu1 %v25450_v34  ;;  %23513 = vmatprep.subr.mxu0 %v24133_v1 }
 0x5a5   : > { %23499 = vmatpush3.msk.msra.mxu1 %vm24244_vm3, %v24135_v8  ;;  %23500 = vmatprep.mubr.msk.f32.mxu1 %vm24134_vm0, %v24133_v1 }
 0x5a6   : > { %23506 = vmatmul.mubr.f32.vlgmr.msra.gmra.mxu0 %v25450_v34  ;;  %23508 = vmatprep.subr.mxu1 %v24133_v1 }
 0x5a7   : > { %23514 = vmatpush3.msk.msra.mxu0 %vm24239_vm1, %v24135_v8  ;;  %23515 = vmatprep.mubr.msk.f32.mxu0 %vm24134_vm0, %v24133_v1 }
 0x5a8   : > { %23501 = vmatmul.mubr.f32.vlgmr.msra.gmra.mxu1 %v14562_v35  ;;  %23523 = vmatprep.subr.mxu0 %v24133_v1 }
 0x5a9   : > { %23509 = vmatpush3.msk.msra.mxu1 %vm24244_vm3, %v24135_v8  ;;  %23510 = vmatprep.mubr.msk.f32.mxu1 %vm24134_vm0, %v24133_v1 }
 0x5aa   : > { %23516 = vmatmul.mubr.f32.vlgmr.msra.gmra.mxu0 %v15007_v48  ;;  %23518 = vmatprep.subr.mxu1 %v24133_v1 }
 0x5ab   : > { %23524 = vmatpush3.msra.mxu0 %v24272_v18  ;;  %23525 = vmatprep.mubr.msk.f32.mxu0 %vm24134_vm0, %v24133_v1 }
 0x5ac   : > { %23511 = vmatmul.mubr.f32.vlgmr.msra.gmra.mxu1 %v25450_v34  ;;  %23533 = vmatprep.subr.mxu0 %v24133_v1 }
 0x5ad   : > { %23519 = vmatpush3.msra.mxu1 %v24305_v32  ;;  %23520 = vmatprep.mubr.msk.f32.mxu1 %vm24134_vm0, %v24133_v1 }
 0x5ae   : > { %23526 = vmatmul.mubr.f32.vlgmr.msra.gmra.mxu0 %v15004_v38  ;;  %23528 = vmatprep.subr.mxu1 %v24133_v1 }
 0x5af   : > { %23534 = vmatpush3.msra.mxu0 %v24281_v24  ;;  %23535 = vmatprep.mubr.msk.f32.mxu0 %vm24134_vm0, %v24133_v1 }
 0x5b0   : > { %23521 = vmatmul.mubr.f32.vlgmr.msra.gmra.mxu1 %v25489_v42  ;;  %23543 = vmatprep.subr.mxu0 %v24133_v1 }
 0x5b1   : > { %23529 = vmatpush3.msk.msra.mxu1 %vm24239_vm1, %v24135_v8  ;;  %23530 = vmatprep.mubr.msk.f32.mxu1 %vm24134_vm0, %v24133_v1 }
 0x5b2   : > { %23536 = vmatmul.mubr.f32.vlgmr.msra.gmra.mxu0 %v25489_v42  ;;  %23538 = vmatprep.subr.mxu1 %v24133_v1 }
 0x5b3   : > { %23545 = vmatprep.mubr.msk.f32.mxu0 %vm24134_vm0, %v24133_v1 }
 0x5b4   : > { %23531 = vmatmul.mubr.f32.vlgmr.msra.gmra.mxu1 %v15005_v46 }
 0x5b5   : > { %23539 = vmatpush3.msk.msra.mxu1 %vm24239_vm1, %v24135_v8  ;;  %23540 = vmatprep.mubr.msk.f32.mxu1 %vm24134_vm0, %v24133_v1 }
 0x5b6   : > { %23548 = vmatprep.subr.mxu1 %v24133_v1 }
 0x5b8   : > { %23541 = vmatmul.mubr.f32.vlgmr.msra.gmra.mxu1 %v25489_v42 }
 0x5b9   : > { %23550 = vmatprep.mubr.msk.f32.mxu1 %vm24134_vm0, %v24133_v1 }
 0x62c   : > { %v12773_v47 = vpop.f32.mrf.mxu0 }
 0x62e   : > { %v23367_v49 = vpop.f32.mrf.mxu0 }
 0x630   : > { %v12923_v51 = vpop.f32.mrf.mxu0 }
 0x632   : > { %v23377_v45 = vpop.f32.mrf.mxu0 }
 0x634   : > { %v12849_v54 = vpop.f32.mrf.mxu1 }
 0x635   : > { %v12850_v55 = vadd.f32 %v12849_v54, %v12773_v47  ;;  %v13071_v50 = vpop.f32.mrf.mxu0 }
 0x636   : > { %v23372_v56 = vpop.f32.mrf.mxu1 }
 0x637   : > { %v12924_v57 = vadd.f32 %v12923_v51, %v12850_v55  ;;  %v23387_v59 = vpop.f32.mrf.mxu0 }
 0x638   : > { %v12997_v61 = vpop.f32.mrf.mxu1 }
 0x639   : > { %v12998_v53 = vadd.f32 %v12997_v61, %v12924_v57  ;;  %v13222_v58 = vpop.f32.mrf.mxu0 }
 0x63a   : > { %v23382_v62 = vpop.f32.mrf.mxu1 }
 0x63b   : > { %v13072_v63 = vadd.f32 %v13071_v50, %v12998_v53  ;;  %v23397_v0 = vpop.f32.mrf.mxu0 }
 0x63c   : > { %v13143_v4 = vpop.f32.mrf.mxu1 }
 0x63d   : > { %v13144_v9 = vadd.f32 %v13143_v4, %v13072_v63  ;;  %v13372_v10 = vpop.f32.mrf.mxu0 }
 0x63e   : > { %v23392_v11 = vpop.f32.mrf.mxu1 }
 0x63f   : > { %v13223_v12 = vadd.f32 %v13222_v58, %v13144_v9  ;;  %v23407_v15 = vpop.f32.mrf.mxu0 }
 0x640   : > { %v13298_v2 = vpop.f32.mrf.mxu1 }
 0x641   : > { %v13299_v19 = vadd.f32 %v13298_v2, %v13223_v12 }
 0x642   : > { %v23402_v21 = vpop.f32.mrf.mxu1  ;;  %v13520_v16 = vpop.f32.mrf.mxu0 }
 0x643   : > { %v13373_v14 = vadd.f32 %v13372_v10, %v13299_v19 }
 0x644   : > { %v13446_v25 = vpop.f32.mrf.mxu1  ;;  %v23417_v27 = vpop.f32.mrf.mxu0 }
 0x645   : > { %v13447_v30 = vadd.f32 %v13446_v25, %v13373_v14 }
 0x646   : > { %v23412_v29 = vpop.f32.mrf.mxu1  ;;  %v13676_v33 = vpop.f32.mrf.mxu0 }
 0x647   : > { %v13521_v31 = vadd.f32 %v13520_v16, %v13447_v30 }
 0x648   : > { %v13592_v34 = vpop.f32.mrf.mxu1  ;;  %v23427_v36 = vpop.f32.mrf.mxu0 }
 0x649   : > { %v13593_v26 = vadd.f32 %v13592_v34, %v13521_v31 }
 0x64a   : > { %v23422_v39 = vpop.f32.mrf.mxu1  ;;  %v13824_v35 = vpop.f32.mrf.mxu0 }
 0x64b   : > { %21871 = vst.msk [vmem:[%s24675_s15 + $0x20] sm:$0xff] %vm2876_vm8, %v13593_v26 }
 0x64c   : > { %v13751_v41 = vpop.f32.mrf.mxu1  ;;  %v23437_v40 = vpop.f32.mrf.mxu0 }
 0x64d   : > { %v13752_v38 = vadd.f32 %v13751_v41, %v13676_v33 }
 0x64e   : > { %v23432_v42 = vpop.f32.mrf.mxu1  ;;  %v13970_v44 = vpop.f32.mrf.mxu0 }
 0x64f   : > { %v13825_v49 = vadd.f32 %v13824_v35, %v13752_v38 }
 0x650   : > { %v13897_v46 = vpop.f32.mrf.mxu1  ;;  %v23447_v43 = vpop.f32.mrf.mxu0 }
 0x651   : > { %v13898_v50 = vadd.f32 %v13897_v46, %v13825_v49 }
 0x652   : > { %v23442_v48 = vpop.f32.mrf.mxu1  ;;  %v14119_v47 = vpop.f32.mrf.mxu0 }
 0x653   : > { %v13971_v53 = vadd.f32 %v13970_v44, %v13898_v50 }
 0x654   : > { %v14041_v51 = vpop.f32.mrf.mxu1  ;;  %v23457_v45 = vpop.f32.mrf.mxu0 }
 0x655   : > { %v14042_v4 = vadd.f32 %v14041_v51, %v13971_v53 }
 0x656   : > { %v23452_v54 = vpop.f32.mrf.mxu1  ;;  %v14267_v55 = vpop.f32.mrf.mxu0 }
 0x657   : > { %v14120_v15 = vadd.f32 %v14119_v47, %v14042_v4 }
 0x658   : > { %v14194_v56 = vpop.f32.mrf.mxu1  ;;  %v23467_v57 = vpop.f32.mrf.mxu0 }
 0x659   : > { %v14195_v25 = vadd.f32 %v14194_v56, %v14120_v15 }
 0x65a   : > { %v23462_v59 = vpop.f32.mrf.mxu1  ;;  %v14413_v61 = vpop.f32.mrf.mxu0 }
 0x65b   : > { %v14268_v36 = vadd.f32 %v14267_v55, %v14195_v25 }
 0x65c   : > { %v14340_v58 = vpop.f32.mrf.mxu1  ;;  %v23477_v62 = vpop.f32.mrf.mxu0 }
 0x65d   : > { %v14341_v44 = vadd.f32 %v14340_v58, %v14268_v36 }
 0x65e   : > { %v23472_v63 = vpop.f32.mrf.mxu1  ;;  %v14566_v0 = vpop.f32.mrf.mxu0 }
 0x65f   : > { %v14414_v51 = vadd.f32 %v14413_v61, %v14341_v44  ;;  %v21896_v61 = vld [vmem:[%s24251_s5 + $0x1c] sm:$0xf] }
 0x660   : > { %v14484_v9 = vpop.f32.mrf.mxu1  ;;  %v23487_v10 = vpop.f32.mrf.mxu0 }
 0x661   : > { %v14485_v57 = vadd.f32 %v14484_v9, %v14414_v51 }
 0x662   : > { %v23482_v11 = vpop.f32.mrf.mxu1  ;;  %v14714_v12 = vpop.f32.mrf.mxu0 }
 0x663   : > { %v15828_v58 = vsel %vm1974_vm7, %v14485_v57, 0 }
 0x664   : > { %v14641_v2 = vpop.f32.mrf.mxu1  ;;  %v23497_v19 = vpop.f32.mrf.mxu0  ;;  %v25585_v10 = vand.u32 4294901760, %v15828_v58 }
 0x665   : > { %v14642_v21 = vadd.f32 %v14641_v2, %v14566_v0  ;;  %v16283_v2 = vsel %vm193_vm2, %v21896_v61, 0 }
 0x666   : > { %v23492_v16 = vpop.f32.mrf.mxu1  ;;  %v14860_v14 = vpop.f32.mrf.mxu0 }
 0x667   : > { %v14715_v27 = vadd.f32 %v14714_v12, %v14642_v21  ;;  %v15938_v12 = vsub.f32 %v15828_v58, %v25585_v10  ;;  %v25599_v21 = vand.u32 4294901760, %v16283_v2 }
 0x668   : > { %v14787_v30 = vpop.f32.mrf.mxu1  ;;  %v23507_v29 = vpop.f32.mrf.mxu0 }
 0x669   : > { %v14788_v33 = vadd.f32 %v14787_v30, %v14715_v27  ;;  %v15939_v16 = vand.u32 4294901760, %v15938_v12  ;;  %v21895_v27 = vld [vmem:[%s24251_s5 + $0xc] sm:$0xf] }
 0x66a   : > { %v23502_v31 = vpop.f32.mrf.mxu1  ;;  %v15009_v34 = vpop.f32.mrf.mxu0 }
 0x66b   : > { %v14861_v26 = vadd.f32 %v14860_v14, %v14788_v33  ;;  %v25610_v14 = vsub.f32 %v16283_v2, %v25599_v21  ;;  %v15940_v25 = vsub.f32 %v15938_v12, %v15939_v16  ;;  %v16726_v33 = vsel %vm193_vm2, %v21895_v27, 0 }
 0x66c   : > { %v14931_v39 = vpop.f32.mrf.mxu1  ;;  %v23517_v35 = vpop.f32.mrf.mxu0 }
 0x66d   : > { %v14932_v41 = vadd.f32 %v14931_v39, %v14861_v26  ;;  %v16352_v30 = vand.u32 4294901760, %v25610_v14  ;;  %v15941_v29 = vand.u32 4294901760, %v15940_v25  ;;  %v21904_v39 = vld [vmem:[%s24251_s5 + $0x3c] sm:$0xf] }
 0x66e   : > { %v23512_v40 = vpop.f32.mrf.mxu1  ;;  %v15157_v42 = vpop.f32.mrf.mxu0 }
 0x66f   : > { %v15010_v38 = vadd.f32 %v15009_v34, %v14932_v41  ;;  %v16353_v31 = vsub.f32 %v25610_v14, %v16352_v30  ;;  %v25633_v34 = vand.u32 4294901760, %v16726_v33  ;;  %v17173_v41 = vsel %vm193_vm2, %v21904_v39, 0 }
 0x670   : > { %v15084_v46 = vpop.f32.mrf.mxu1  ;;  %v23527_v43 = vpop.f32.mrf.mxu0 }
 0x671   : > { %v15085_v48 = vadd.f32 %v15084_v46, %v15010_v38  ;;  %v16354_v36 = vand.u32 4294901760, %v16353_v31  ;;  %v25648_v26 = vsub.f32 %v16726_v33, %v25633_v34  ;;  %v21903_v46 = vld [vmem:[%s24251_s5 + $0x2c] sm:$0xf] }
 0x672   : > { %v23522_v47 = vpop.f32.mrf.mxu1  ;;  %v15303_v49 = vpop.f32.mrf.mxu0 }
 0x673   : > { %v15158_v45 = vadd.f32 %v15157_v42, %v15085_v48  ;;  %v16795_v35 = vand.u32 4294901760, %v25648_v26  ;;  %v25676_v42 = vand.u32 4294901760, %v17173_v41  ;;  %v17616_v48 = vsel %vm193_vm2, %v21903_v46, 0 }
 0x674   : > { %v15230_v54 = vpop.f32.mrf.mxu1  ;;  %v23537_v50 = vpop.f32.mrf.mxu0 }
 0x675   : > { %v15231_v56 = vadd.f32 %v15230_v54, %v15158_v45  ;;  %v16796_v40 = vsub.f32 %v25648_v26, %v16795_v35  ;;  %v17241_v38 = vsub.f32 %v17173_v41, %v25676_v42 }
 0x676   : > { %v23532_v55 = vpop.f32.mrf.mxu1 }
 0x677   : > { %v15304_v59 = vadd.f32 %v15303_v49, %v15231_v56  ;;  %v16797_v44 = vand.u32 4294901760, %v16796_v40  ;;  %v17242_v43 = vand.u32 4294901760, %v17241_v38  ;;  %v25715_v49 = vand.u32 4294901760, %v17616_v48 }
 0x678   : > { %v15374_v53 = vpop.f32.mrf.mxu1 }
 0x679   : > { %v15375_v62 = vadd.f32 %v15374_v53, %v15304_v59  ;;  %v17243_v47 = vsub.f32 %v17241_v38, %v17242_v43  ;;  %v17684_v45 = vsub.f32 %v17616_v48, %v25715_v49 }
 0x67a   : > { %v23542_v63 = vpop.f32.mrf.mxu1 }
 0x67b   : > { %v15379_v0 = vsel %vm1974_vm7, %v15375_v62, 0  ;;  %v17244_v51 = vand.u32 4294901760, %v17243_v47  ;;  %v17685_v54 = vand.u32 4294901760, %v17684_v45 }
 0x67c   : > { %v15412_v4 = vand.u32 4294901760, %v15379_v0 }
 0x67d   : > { %v17686_v50 = vsub.f32 %v17684_v45, %v17685_v54 }
 0x67e   : > { %v15489_v11 = vsub.f32 %v15379_v0, %v15412_v4  ;;  %23544 = vmatpush3.msra.mxu0 %v15412_v4 }
 0x67f   : > { %23546 = vmatmul.mubr.f32.vlgmr.msra.gmra.mxu0 %v24439_v20  ;;  %23553 = vmatprep.subr.mxu0 %v24133_v1  ;;  %v17687_v56 = vand.u32 4294901760, %v17686_v50 }
 0x680   : > { %23554 = vmatpush3.msra.mxu0 %v15489_v11  ;;  %23555 = vmatprep.mubr.msk.f32.mxu0 %vm24134_vm0, %v24133_v1  ;;  %v15490_v9 = vand.u32 4294901760, %v15489_v11 }
 0x681   : > { %23563 = vmatprep.subr.mxu0 %v24133_v1 }
 0x682   : > { %v15491_v15 = vsub.f32 %v15489_v11, %v15490_v9 }
 0x683   : > { %23556 = vmatmul.mubr.f32.vlgmr.msra.gmra.mxu0 %v24424_v52 }
 0x684   : > { %23564 = vmatpush3.msra.mxu0 %v15490_v9  ;;  %v15492_v19 = vand.u32 4294901760, %v15491_v15  ;;  %23565 = vmatprep.mubr.msk.f32.mxu0 %vm24134_vm0, %v24133_v1 }
 0x685   : > { %23573 = vmatprep.subr.mxu0 %v24133_v1 }
 0x686   : > { %23549 = vmatpush3.msra.mxu1 %v15492_v19 }
 0x687   : > { %23551 = vmatmul.mubr.msk.f32.vlgmr.msra.gmra.mxu1 %vm1970_vm5, %v24420_v3  ;;  %23558 = vmatprep.subr.mxu1 %v24133_v1 }
 0x688   : > { %23566 = vmatmul.mubr.msk.f32.vlgmr.msra.gmra.mxu0 %vm1970_vm5, %v24420_v3  ;;  %23559 = vmatpush3.msra.mxu1 %v15412_v4 }
 0x689   : > { %23574 = vmatpush3.msra.mxu0 %v25585_v10  ;;  %23560 = vmatprep.mubr.msk.f32.mxu1 %vm24134_vm0, %v24133_v1 }
 0x68a   : > { %23568 = vmatprep.subr.mxu1 %v24133_v1  ;;  %23575 = vmatprep.mubr.msk.f32.mxu0 %vm24134_vm0, %v24133_v1 }
 0x68b   : > { %23583 = vmatprep.subr.mxu0 %v24133_v1  ;;  %23561 = vmatmul.mubr.f32.vlgmr.msra.gmra.mxu1 %v24427_v60 }
 0x68c   : > { %23569 = vmatpush3.msra.mxu1 %v15412_v4  ;;  %23576 = vmatmul.mubr.f32.vlgmr.msra.gmra.mxu0 %v24469_v37 }
 0x68d   : > { %23584 = vmatpush3.msra.mxu0 %v15938_v12  ;;  %23570 = vmatprep.mubr.msk.f32.mxu1 %vm24134_vm0, %v24133_v1 }
 0x68e   : > { %23578 = vmatprep.subr.mxu1 %v24133_v1  ;;  %23585 = vmatprep.mubr.msk.f32.mxu0 %vm24134_vm0, %v24133_v1 }
 0x68f   : > { %23593 = vmatprep.subr.mxu0 %v24133_v1  ;;  %23571 = vmatmul.mubr.msk.f32.vlgmr.msra.gmra.mxu1 %vm1970_vm5, %v24420_v3 }
 0x690   : > { %23579 = vmatpush3.msra.mxu1 %v15941_v29  ;;  %23586 = vmatmul.mubr.f32.vlgmr.msra.gmra.mxu0 %v24441_v22 }
 0x691   : > { %23594 = vmatpush3.msra.mxu0 %v15939_v16  ;;  %23580 = vmatprep.mubr.msk.f32.mxu1 %vm24134_vm0, %v24133_v1 }
 0x692   : > { %23588 = vmatprep.subr.mxu1 %v24133_v1  ;;  %23595 = vmatprep.mubr.msk.f32.mxu0 %vm24134_vm0, %v24133_v1 }
 0x693   : > { %23581 = vmatmul.mubr.msk.f32.vlgmr.msra.gmra.mxu1 %vm1970_vm5, %v24431_v5  ;;  %23603 = vmatprep.subr.mxu0 %v24133_v1 }
 0x694   : > { %23589 = vmatpush3.msra.mxu1 %v25585_v10  ;;  %23590 = vmatprep.mubr.msk.f32.mxu1 %vm24134_vm0, %v24133_v1 }
 0x695   : > { %23598 = vmatprep.subr.mxu1 %v24133_v1  ;;  %23596 = vmatmul.mubr.msk.f32.vlgmr.msra.gmra.mxu0 %vm1970_vm5, %v24431_v5 }
 0x696   : > { %23604 = vmatpush3.msk.msra.mxu0 %vm24244_vm3, %v24135_v8  ;;  %23605 = vmatprep.mubr.msk.f32.mxu0 %vm24134_vm0, %v24133_v1 }
 0x697   : > { %23591 = vmatmul.mubr.f32.vlgmr.msra.gmra.mxu1 %v24451_v28  ;;  %23613 = vmatprep.subr.mxu0 %v24133_v1 }
 0x698   : > { %23599 = vmatpush3.msra.mxu1 %v25585_v10  ;;  %23600 = vmatprep.mubr.msk.f32.mxu1 %vm24134_vm0, %v24133_v1 }
 0x699   : > { %23606 = vmatmul.mubr.f32.vlgmr.msra.gmra.mxu0 %v16354_v36  ;;  %23608 = vmatprep.subr.mxu1 %v24133_v1 }
 0x69a   : > { %23614 = vmatpush3.msra.mxu0 %v24264_v13  ;;  %23615 = vmatprep.mubr.msk.f32.mxu0 %vm24134_vm0, %v24133_v1 }
 0x69b   : > { %23601 = vmatmul.mubr.msk.f32.vlgmr.msra.gmra.mxu1 %vm1970_vm5, %v24431_v5  ;;  %23623 = vmatprep.subr.mxu0 %v24133_v1 }
 0x69c   : > { %23609 = vmatpush3.msra.mxu1 %v24278_v23  ;;  %23610 = vmatprep.mubr.msk.f32.mxu1 %vm24134_vm0, %v24133_v1 }
 0x69d   : > { %23616 = vmatmul.mubr.f32.vlgmr.msra.gmra.mxu0 %v25610_v14  ;;  %23618 = vmatprep.subr.mxu1 %v24133_v1 }
 0x69e   : > { %23624 = vmatpush3.msra.mxu0 %v24270_v17  ;;  %23625 = vmatprep.mubr.msk.f32.mxu0 %vm24134_vm0, %v24133_v1 }
 0x69f   : > { %23611 = vmatmul.mubr.f32.vlgmr.msra.gmra.mxu1 %v25599_v21  ;;  %23633 = vmatprep.subr.mxu0 %v24133_v1 }
 0x6a0   : > { %23619 = vmatpush3.msk.msra.mxu1 %vm24244_vm3, %v24135_v8  ;;  %23620 = vmatprep.mubr.msk.f32.mxu1 %vm24134_vm0, %v24133_v1 }
 0x6a1   : > { %23626 = vmatmul.mubr.f32.vlgmr.msra.gmra.mxu0 %v25599_v21  ;;  %23628 = vmatprep.subr.mxu1 %v24133_v1 }
 0x6a2   : > { %23634 = vmatpush3.msk.msra.mxu0 %vm24239_vm1, %v24135_v8  ;;  %23635 = vmatprep.mubr.msk.f32.mxu0 %vm24134_vm0, %v24133_v1 }
 0x6a3   : > { %23621 = vmatmul.mubr.f32.vlgmr.msra.gmra.mxu1 %v16352_v30  ;;  %23643 = vmatprep.subr.mxu0 %v24133_v1 }
 0x6a4   : > { %23629 = vmatpush3.msk.msra.mxu1 %vm24244_vm3, %v24135_v8  ;;  %23630 = vmatprep.mubr.msk.f32.mxu1 %vm24134_vm0, %v24133_v1 }
 0x6a5   : > { %23636 = vmatmul.mubr.f32.vlgmr.msra.gmra.mxu0 %v16797_v44  ;;  %23638 = vmatprep.subr.mxu1 %v24133_v1 }
 0x6a6   : > { %23644 = vmatpush3.msra.mxu0 %v24272_v18  ;;  %23645 = vmatprep.mubr.msk.f32.mxu0 %vm24134_vm0, %v24133_v1 }
 0x6a7   : > { %23631 = vmatmul.mubr.f32.vlgmr.msra.gmra.mxu1 %v25599_v21  ;;  %23653 = vmatprep.subr.mxu0 %v24133_v1 }
 0x6a8   : > { %23639 = vmatpush3.msra.mxu1 %v24305_v32  ;;  %23640 = vmatprep.mubr.msk.f32.mxu1 %vm24134_vm0, %v24133_v1 }
 0x6a9   : > { %23646 = vmatmul.mubr.f32.vlgmr.msra.gmra.mxu0 %v25648_v26  ;;  %23648 = vmatprep.subr.mxu1 %v24133_v1 }
 0x6aa   : > { %23654 = vmatpush3.msra.mxu0 %v24281_v24  ;;  %23655 = vmatprep.mubr.msk.f32.mxu0 %vm24134_vm0, %v24133_v1 }
 0x6ab   : > { %23641 = vmatmul.mubr.f32.vlgmr.msra.gmra.mxu1 %v25633_v34  ;;  %23663 = vmatprep.subr.mxu0 %v24133_v1 }
 0x6ac   : > { %23649 = vmatpush3.msk.msra.mxu1 %vm24239_vm1, %v24135_v8  ;;  %23650 = vmatprep.mubr.msk.f32.mxu1 %vm24134_vm0, %v24133_v1 }
 0x6ad   : > { %23656 = vmatmul.mubr.f32.vlgmr.msra.gmra.mxu0 %v25633_v34  ;;  %23658 = vmatprep.subr.mxu1 %v24133_v1 }
 0x6ae   : > { %23664 = vmatpush3.msk.msra.mxu0 %vm24244_vm3, %v24135_v8  ;;  %23665 = vmatprep.mubr.msk.f32.mxu0 %vm24134_vm0, %v24133_v1 }
 0x6af   : > { %23651 = vmatmul.mubr.f32.vlgmr.msra.gmra.mxu1 %v16795_v35  ;;  %23673 = vmatprep.subr.mxu0 %v24133_v1 }
 0x6b0   : > { %23659 = vmatpush3.msk.msra.mxu1 %vm24239_vm1, %v24135_v8  ;;  %23660 = vmatprep.mubr.msk.f32.mxu1 %vm24134_vm0, %v24133_v1 }
 0x6b1   : > { %23666 = vmatmul.mubr.f32.vlgmr.msra.gmra.mxu0 %v17244_v51  ;;  %23668 = vmatprep.subr.mxu1 %v24133_v1 }
 0x6b2   : > { %23674 = vmatpush3.msra.mxu0 %v24264_v13  ;;  %23675 = vmatprep.mubr.msk.f32.mxu0 %vm24134_vm0, %v24133_v1 }
 0x6b3   : > { %23661 = vmatmul.mubr.f32.vlgmr.msra.gmra.mxu1 %v25633_v34  ;;  %23683 = vmatprep.subr.mxu0 %v24133_v1 }
 0x6b4   : > { %23669 = vmatpush3.msra.mxu1 %v24278_v23  ;;  %23670 = vmatprep.mubr.msk.f32.mxu1 %vm24134_vm0, %v24133_v1 }
 0x6b5   : > { %23676 = vmatmul.mubr.f32.vlgmr.msra.gmra.mxu0 %v17241_v38  ;;  %23678 = vmatprep.subr.mxu1 %v24133_v1 }
 0x6b6   : > { %23684 = vmatpush3.msra.mxu0 %v24270_v17  ;;  %23685 = vmatprep.mubr.msk.f32.mxu0 %vm24134_vm0, %v24133_v1 }
 0x6b7   : > { %23671 = vmatmul.mubr.f32.vlgmr.msra.gmra.mxu1 %v25676_v42  ;;  %23693 = vmatprep.subr.mxu0 %v24133_v1 }
 0x6b8   : > { %23679 = vmatpush3.msk.msra.mxu1 %vm24244_vm3, %v24135_v8  ;;  %23680 = vmatprep.mubr.msk.f32.mxu1 %vm24134_vm0, %v24133_v1 }
 0x6b9   : > { %23686 = vmatmul.mubr.f32.vlgmr.msra.gmra.mxu0 %v25676_v42  ;;  %23688 = vmatprep.subr.mxu1 %v24133_v1 }
 0x6ba   : > { %23694 = vmatpush3.msk.msra.mxu0 %vm24239_vm1, %v24135_v8  ;;  %23695 = vmatprep.mubr.msk.f32.mxu0 %vm24134_vm0, %v24133_v1 }
 0x6bb   : > { %23681 = vmatmul.mubr.f32.vlgmr.msra.gmra.mxu1 %v17242_v43  ;;  %23703 = vmatprep.subr.mxu0 %v24133_v1 }
 0x6bc   : > { %23689 = vmatpush3.msk.msra.mxu1 %vm24244_vm3, %v24135_v8  ;;  %23690 = vmatprep.mubr.msk.f32.mxu1 %vm24134_vm0, %v24133_v1 }
 0x6bd   : > { %23696 = vmatmul.mubr.f32.vlgmr.msra.gmra.mxu0 %v17687_v56  ;;  %23698 = vmatprep.subr.mxu1 %v24133_v1 }
 0x6be   : > { %23704 = vmatpush3.msra.mxu0 %v24272_v18  ;;  %23705 = vmatprep.mubr.msk.f32.mxu0 %vm24134_vm0, %v24133_v1 }
 0x6bf   : > { %23691 = vmatmul.mubr.f32.vlgmr.msra.gmra.mxu1 %v25676_v42  ;;  %23713 = vmatprep.subr.mxu0 %v24133_v1 }
 0x6c0   : > { %23699 = vmatpush3.msra.mxu1 %v24305_v32  ;;  %23700 = vmatprep.mubr.msk.f32.mxu1 %vm24134_vm0, %v24133_v1 }
 0x6c1   : > { %23706 = vmatmul.mubr.f32.vlgmr.msra.gmra.mxu0 %v17684_v45  ;;  %23708 = vmatprep.subr.mxu1 %v24133_v1 }
 0x6c2   : > { %23714 = vmatpush3.msra.mxu0 %v24281_v24  ;;  %23715 = vmatprep.mubr.msk.f32.mxu0 %vm24134_vm0, %v24133_v1 }
 0x6c3   : > { %23701 = vmatmul.mubr.f32.vlgmr.msra.gmra.mxu1 %v25715_v49  ;;  %23723 = vmatprep.subr.mxu0 %v24133_v1 }
 0x6c4   : > { %23709 = vmatpush3.msk.msra.mxu1 %vm24239_vm1, %v24135_v8  ;;  %23710 = vmatprep.mubr.msk.f32.mxu1 %vm24134_vm0, %v24133_v1 }
 0x6c5   : > { %23716 = vmatmul.mubr.f32.vlgmr.msra.gmra.mxu0 %v25715_v49  ;;  %23718 = vmatprep.subr.mxu1 %v24133_v1 }
 0x6c6   : > { %23725 = vmatprep.mubr.msk.f32.mxu0 %vm24134_vm0, %v24133_v1 }
 0x6c7   : > { %23711 = vmatmul.mubr.f32.vlgmr.msra.gmra.mxu1 %v17685_v54 }
 0x6c8   : > { %23719 = vmatpush3.msk.msra.mxu1 %vm24239_vm1, %v24135_v8  ;;  %23720 = vmatprep.mubr.msk.f32.mxu1 %vm24134_vm0, %v24133_v1 }
 0x6c9   : > { %23728 = vmatprep.subr.mxu1 %v24133_v1 }
 0x6cb   : > { %23721 = vmatmul.mubr.f32.vlgmr.msra.gmra.mxu1 %v25715_v49 }
 0x6cc   : > { %23730 = vmatprep.mubr.msk.f32.mxu1 %vm24134_vm0, %v24133_v1 }
 0x73f   : > { %v15453_v55 = vpop.f32.mrf.mxu0 }
 0x741   : > { %v23547_v57 = vpop.f32.mrf.mxu0 }
 0x743   : > { %v15603_v59 = vpop.f32.mrf.mxu0 }
 0x745   : > { %v23557_v53 = vpop.f32.mrf.mxu0 }
 0x747   : > { %v15529_v62 = vpop.f32.mrf.mxu1 }
 0x748   : > { %v15530_v63 = vadd.f32 %v15529_v62, %v15453_v55  ;;  %v15751_v58 = vpop.f32.mrf.mxu0 }
 0x749   : > { %v23552_v0 = vpop.f32.mrf.mxu1 }
 0x74a   : > { %v15604_v4 = vadd.f32 %v15603_v59, %v15530_v63  ;;  %v23567_v10 = vpop.f32.mrf.mxu0 }
 0x74b   : > { %v15677_v11 = vpop.f32.mrf.mxu1 }
 0x74c   : > { %v15678_v61 = vadd.f32 %v15677_v11, %v15604_v4  ;;  %v15902_v9 = vpop.f32.mrf.mxu0 }
 0x74d   : > { %v23562_v12 = vpop.f32.mrf.mxu1 }
 0x74e   : > { %v15752_v15 = vadd.f32 %v15751_v58, %v15678_v61  ;;  %v23577_v2 = vpop.f32.mrf.mxu0 }
 0x74f   : > { %v15823_v19 = vpop.f32.mrf.mxu1 }
 0x750   : > { %v15824_v21 = vadd.f32 %v15823_v19, %v15752_v15  ;;  %v16052_v16 = vpop.f32.mrf.mxu0 }
 0x751   : > { %v23572_v14 = vpop.f32.mrf.mxu1 }
 0x752   : > { %v15903_v25 = vadd.f32 %v15902_v9, %v15824_v21  ;;  %v23587_v27 = vpop.f32.mrf.mxu0 }
 0x753   : > { %v15978_v30 = vpop.f32.mrf.mxu1 }
 0x754   : > { %v15979_v29 = vadd.f32 %v15978_v30, %v15903_v25 }
 0x755   : > { %v23582_v33 = vpop.f32.mrf.mxu1  ;;  %v16200_v31 = vpop.f32.mrf.mxu0 }
 0x756   : > { %v16053_v34 = vadd.f32 %v16052_v16, %v15979_v29 }
 0x757   : > { %v16126_v36 = vpop.f32.mrf.mxu1  ;;  %v23597_v26 = vpop.f32.mrf.mxu0 }
 0x758   : > { %v16127_v39 = vadd.f32 %v16126_v36, %v16053_v34 }
 0x759   : > { %v23592_v35 = vpop.f32.mrf.mxu1  ;;  %v16356_v41 = vpop.f32.mrf.mxu0 }
 0x75a   : > { %v16201_v40 = vadd.f32 %v16200_v31, %v16127_v39 }
 0x75b   : > { %v16272_v42 = vpop.f32.mrf.mxu1  ;;  %v23607_v44 = vpop.f32.mrf.mxu0 }
 0x75c   : > { %v16273_v38 = vadd.f32 %v16272_v42, %v16201_v40 }
 0x75d   : > { %v23602_v46 = vpop.f32.mrf.mxu1  ;;  %v16504_v43 = vpop.f32.mrf.mxu0 }
 0x75e   : > { %21894 = vst.msk [vmem:[%s24675_s15 + $0x28] sm:$0xff] %vm2876_vm8, %v16273_v38 }
 0x75f   : > { %v16431_v48 = vpop.f32.mrf.mxu1  ;;  %v23617_v47 = vpop.f32.mrf.mxu0 }
 0x760   : > { %v16432_v45 = vadd.f32 %v16431_v48, %v16356_v41 }
 0x761   : > { %v23612_v49 = vpop.f32.mrf.mxu1  ;;  %v16650_v51 = vpop.f32.mrf.mxu0 }
 0x762   : > { %v16505_v57 = vadd.f32 %v16504_v43, %v16432_v45 }
 0x763   : > { %v16577_v54 = vpop.f32.mrf.mxu1  ;;  %v23627_v50 = vpop.f32.mrf.mxu0 }
 0x764   : > { %v16578_v58 = vadd.f32 %v16577_v54, %v16505_v57 }
 0x765   : > { %v23622_v56 = vpop.f32.mrf.mxu1  ;;  %v16799_v55 = vpop.f32.mrf.mxu0 }
 0x766   : > { %v16651_v61 = vadd.f32 %v16650_v51, %v16578_v58 }
 0x767   : > { %v16721_v59 = vpop.f32.mrf.mxu1  ;;  %v23637_v53 = vpop.f32.mrf.mxu0 }
 0x768   : > { %v16722_v19 = vadd.f32 %v16721_v59, %v16651_v61 }
 0x769   : > { %v23632_v62 = vpop.f32.mrf.mxu1  ;;  %v16947_v63 = vpop.f32.mrf.mxu0 }
 0x76a   : > { %v16800_v27 = vadd.f32 %v16799_v55, %v16722_v19 }
 0x76b   : > { %v16874_v0 = vpop.f32.mrf.mxu1  ;;  %v23647_v4 = vpop.f32.mrf.mxu0 }
 0x76c   : > { %v16875_v36 = vadd.f32 %v16874_v0, %v16800_v27 }
 0x76d   : > { %v23642_v10 = vpop.f32.mrf.mxu1  ;;  %v17093_v11 = vpop.f32.mrf.mxu0 }
 0x76e   : > { %v16948_v44 = vadd.f32 %v16947_v63, %v16875_v36 }
 0x76f   : > { %v17020_v9 = vpop.f32.mrf.mxu1  ;;  %v23657_v12 = vpop.f32.mrf.mxu0 }
 0x770   : > { %v17021_v51 = vadd.f32 %v17020_v9, %v16948_v44 }
 0x771   : > { %v23652_v15 = vpop.f32.mrf.mxu1  ;;  %v17246_v2 = vpop.f32.mrf.mxu0 }
 0x772   : > { %v17094_v59 = vadd.f32 %v17093_v11, %v17021_v51  ;;  %v21919_v11 = vld [vmem:[%s24251_s5 + $0x5c] sm:$0xf] }
 0x773   : > { %v17164_v21 = vpop.f32.mrf.mxu1  ;;  %v23667_v16 = vpop.f32.mrf.mxu0 }
 0x774   : > { %v17165_v4 = vadd.f32 %v17164_v21, %v17094_v59 }
 0x775   : > { %v23662_v14 = vpop.f32.mrf.mxu1  ;;  %v17394_v25 = vpop.f32.mrf.mxu0 }
 0x776   : > { %v18508_v9 = vsel %vm1974_vm7, %v17165_v4, 0 }
 0x777   : > { %v17321_v30 = vpop.f32.mrf.mxu1  ;;  %v23677_v29 = vpop.f32.mrf.mxu0  ;;  %v25811_v16 = vand.u32 4294901760, %v18508_v9 }
 0x778   : > { %v17322_v33 = vadd.f32 %v17321_v30, %v17246_v2  ;;  %v18963_v30 = vsel %vm193_vm2, %v21919_v11, 0 }
 0x779   : > { %v23672_v31 = vpop.f32.mrf.mxu1  ;;  %v17540_v34 = vpop.f32.mrf.mxu0 }
 0x77a   : > { %v17395_v26 = vadd.f32 %v17394_v25, %v17322_v33  ;;  %v18618_v25 = vsub.f32 %v18508_v9, %v25811_v16  ;;  %v25825_v33 = vand.u32 4294901760, %v18963_v30 }
 0x77b   : > { %v17467_v39 = vpop.f32.mrf.mxu1  ;;  %v23687_v35 = vpop.f32.mrf.mxu0 }
 0x77c   : > { %v17468_v41 = vadd.f32 %v17467_v39, %v17395_v26  ;;  %v18619_v31 = vand.u32 4294901760, %v18618_v25  ;;  %v21918_v26 = vld [vmem:[%s24251_s5 + $0x4c] sm:$0xf] }
 0x77d   : > { %v23682_v40 = vpop.f32.mrf.mxu1  ;;  %v17689_v42 = vpop.f32.mrf.mxu0 }
 0x77e   : > { %v17541_v38 = vadd.f32 %v17540_v34, %v17468_v41  ;;  %v25836_v34 = vsub.f32 %v18963_v30, %v25825_v33  ;;  %v18620_v36 = vsub.f32 %v18618_v25, %v18619_v31  ;;  %v19406_v41 = vsel %vm193_vm2, %v21918_v26, 0 }
 0x77f   : > { %v17611_v46 = vpop.f32.mrf.mxu1  ;;  %v23697_v43 = vpop.f32.mrf.mxu0 }
 0x780   : > { %v17612_v48 = vadd.f32 %v17611_v46, %v17541_v38  ;;  %v19032_v39 = vand.u32 4294901760, %v25836_v34  ;;  %v18621_v35 = vand.u32 4294901760, %v18620_v36  ;;  %v21927_v46 = vld [vmem:[%s24251_s5 + $0x7c] sm:$0xf] }
 0x781   : > { %v23692_v47 = vpop.f32.mrf.mxu1  ;;  %v17837_v49 = vpop.f32.mrf.mxu0 }
 0x782   : > { %v17690_v45 = vadd.f32 %v17689_v42, %v17612_v48  ;;  %v19033_v40 = vsub.f32 %v25836_v34, %v19032_v39  ;;  %v25859_v42 = vand.u32 4294901760, %v19406_v41  ;;  %v19853_v48 = vsel %vm193_vm2, %v21927_v46, 0 }
 0x783   : > { %v17764_v54 = vpop.f32.mrf.mxu1  ;;  %v23707_v50 = vpop.f32.mrf.mxu0 }
 0x784   : > { %v17765_v56 = vadd.f32 %v17764_v54, %v17690_v45  ;;  %v19034_v44 = vand.u32 4294901760, %v19033_v40  ;;  %v25874_v38 = vsub.f32 %v19406_v41, %v25859_v42  ;;  %v21926_v54 = vld [vmem:[%s24251_s5 + $0x6c] sm:$0xf] }
 0x785   : > { %v23702_v55 = vpop.f32.mrf.mxu1  ;;  %v17983_v57 = vpop.f32.mrf.mxu0 }
 0x786   : > { %v17838_v53 = vadd.f32 %v17837_v49, %v17765_v56  ;;  %v19475_v43 = vand.u32 4294901760, %v25874_v38  ;;  %v25902_v49 = vand.u32 4294901760, %v19853_v48  ;;  %v20296_v56 = vsel %vm193_vm2, %v21926_v54, 0 }
 0x787   : > { %v17910_v62 = vpop.f32.mrf.mxu1  ;;  %v23717_v58 = vpop.f32.mrf.mxu0 }
 0x788   : > { %v17911_v0 = vadd.f32 %v17910_v62, %v17838_v53  ;;  %v19476_v47 = vsub.f32 %v25874_v38, %v19475_v43  ;;  %v19921_v45 = vsub.f32 %v19853_v48, %v25902_v49 }
 0x789   : > { %v23712_v63 = vpop.f32.mrf.mxu1 }
 0x78a   : > { %v17984_v10 = vadd.f32 %v17983_v57, %v17911_v0  ;;  %v19477_v51 = vand.u32 4294901760, %v19476_v47  ;;  %v19922_v50 = vand.u32 4294901760, %v19921_v45  ;;  %v25941_v57 = vand.u32 4294901760, %v20296_v56 }
 0x78b   : > { %v18054_v61 = vpop.f32.mrf.mxu1 }
 0x78c   : > { %v18055_v12 = vadd.f32 %v18054_v61, %v17984_v10  ;;  %v19923_v55 = vsub.f32 %v19921_v45, %v19922_v50  ;;  %v20364_v53 = vsub.f32 %v20296_v56, %v25941_v57 }
 0x78d   : > { %v23722_v15 = vpop.f32.mrf.mxu1 }
 0x78e   : > { %v18059_v2 = vsel %vm1974_vm7, %v18055_v12, 0  ;;  %v19924_v59 = vand.u32 4294901760, %v19923_v55  ;;  %v20365_v62 = vand.u32 4294901760, %v20364_v53 }
 0x78f   : > { %v18092_v19 = vand.u32 4294901760, %v18059_v2 }
 0x790   : > { %v20366_v58 = vsub.f32 %v20364_v53, %v20365_v62 }
 0x791   : > { %v18169_v14 = vsub.f32 %v18059_v2, %v18092_v19  ;;  %23724 = vmatpush3.msra.mxu0 %v18092_v19 }
 0x792   : > { %23726 = vmatmul.mubr.f32.vlgmr.msra.gmra.mxu0 %v24439_v20  ;;  %23733 = vmatprep.subr.mxu0 %v24133_v1 }
 0x793   : > { %23734 = vmatpush3.msra.mxu0 %v18169_v14  ;;  %23735 = vmatprep.mubr.msk.f32.mxu0 %vm24134_vm0, %v24133_v1  ;;  %v18170_v21 = vand.u32 4294901760, %v18169_v14 }
 0x794   : > { %23743 = vmatprep.subr.mxu0 %v24133_v1 }
 0x795   : > { %v18171_v27 = vsub.f32 %v18169_v14, %v18170_v21 }
 0x796   : > { %23736 = vmatmul.mubr.f32.vlgmr.msra.gmra.mxu0 %v24424_v52 }
 0x797   : > { %23744 = vmatpush3.msra.mxu0 %v18170_v21  ;;  %v18172_v29 = vand.u32 4294901760, %v18171_v27  ;;  %23745 = vmatprep.mubr.msk.f32.mxu0 %vm24134_vm0, %v24133_v1 }
 0x798   : > { %23753 = vmatprep.subr.mxu0 %v24133_v1 }
 0x799   : > { %23729 = vmatpush3.msra.mxu1 %v18172_v29 }
 0x79a   : > { %23731 = vmatmul.mubr.msk.f32.vlgmr.msra.gmra.mxu1 %vm1970_vm5, %v24420_v3  ;;  %23738 = vmatprep.subr.mxu1 %v24133_v1 }
 0x79b   : > { %23746 = vmatmul.mubr.msk.f32.vlgmr.msra.gmra.mxu0 %vm1970_vm5, %v24420_v3  ;;  %23739 = vmatpush3.msra.mxu1 %v18092_v19 }
 0x79c   : > { %23754 = vmatpush3.msra.mxu0 %v25811_v16  ;;  %23740 = vmatprep.mubr.msk.f32.mxu1 %vm24134_vm0, %v24133_v1 }
 0x79d   : > { %23748 = vmatprep.subr.mxu1 %v24133_v1  ;;  %23755 = vmatprep.mubr.msk.f32.mxu0 %vm24134_vm0, %v24133_v1 }
 0x79e   : > { %23763 = vmatprep.subr.mxu0 %v24133_v1  ;;  %23741 = vmatmul.mubr.f32.vlgmr.msra.gmra.mxu1 %v24427_v60 }
 0x79f   : > { %23749 = vmatpush3.msra.mxu1 %v18092_v19  ;;  %23756 = vmatmul.mubr.f32.vlgmr.msra.gmra.mxu0 %v24469_v37 }
 0x7a0   : > { %23764 = vmatpush3.msra.mxu0 %v18618_v25  ;;  %23750 = vmatprep.mubr.msk.f32.mxu1 %vm24134_vm0, %v24133_v1 }
 0x7a1   : > { %23758 = vmatprep.subr.mxu1 %v24133_v1  ;;  %23765 = vmatprep.mubr.msk.f32.mxu0 %vm24134_vm0, %v24133_v1 }
 0x7a2   : > { %23773 = vmatprep.subr.mxu0 %v24133_v1  ;;  %23751 = vmatmul.mubr.msk.f32.vlgmr.msra.gmra.mxu1 %vm1970_vm5, %v24420_v3 }
 0x7a3   : > { %23759 = vmatpush3.msra.mxu1 %v18621_v35  ;;  %23766 = vmatmul.mubr.f32.vlgmr.msra.gmra.mxu0 %v24441_v22 }
 0x7a4   : > { %23774 = vmatpush3.msra.mxu0 %v18619_v31  ;;  %23760 = vmatprep.mubr.msk.f32.mxu1 %vm24134_vm0, %v24133_v1 }
 0x7a5   : > { %23768 = vmatprep.subr.mxu1 %v24133_v1  ;;  %23775 = vmatprep.mubr.msk.f32.mxu0 %vm24134_vm0, %v24133_v1 }
 0x7a6   : > { %23761 = vmatmul.mubr.msk.f32.vlgmr.msra.gmra.mxu1 %vm1970_vm5, %v24431_v5  ;;  %23783 = vmatprep.subr.mxu0 %v24133_v1 }
 0x7a7   : > { %23769 = vmatpush3.msra.mxu1 %v25811_v16  ;;  %23770 = vmatprep.mubr.msk.f32.mxu1 %vm24134_vm0, %v24133_v1 }
 0x7a8   : > { %23778 = vmatprep.subr.mxu1 %v24133_v1  ;;  %23776 = vmatmul.mubr.msk.f32.vlgmr.msra.gmra.mxu0 %vm1970_vm5, %v24431_v5 }
 0x7a9   : > { %23784 = vmatpush3.msk.msra.mxu0 %vm24244_vm3, %v24135_v8  ;;  %23785 = vmatprep.mubr.msk.f32.mxu0 %vm24134_vm0, %v24133_v1 }
 0x7aa   : > { %23771 = vmatmul.mubr.f32.vlgmr.msra.gmra.mxu1 %v24451_v28  ;;  %23793 = vmatprep.subr.mxu0 %v24133_v1 }
 0x7ab   : > { %23779 = vmatpush3.msra.mxu1 %v25811_v16  ;;  %23780 = vmatprep.mubr.msk.f32.mxu1 %vm24134_vm0, %v24133_v1 }
 0x7ac   : > { %23786 = vmatmul.mubr.f32.vlgmr.msra.gmra.mxu0 %v19034_v44  ;;  %23788 = vmatprep.subr.mxu1 %v24133_v1 }
 0x7ad   : > { %23794 = vmatpush3.msra.mxu0 %v24264_v13  ;;  %23795 = vmatprep.mubr.msk.f32.mxu0 %vm24134_vm0, %v24133_v1 }
 0x7ae   : > { %23781 = vmatmul.mubr.msk.f32.vlgmr.msra.gmra.mxu1 %vm1970_vm5, %v24431_v5  ;;  %23803 = vmatprep.subr.mxu0 %v24133_v1 }
 0x7af   : > { %23789 = vmatpush3.msra.mxu1 %v24278_v23  ;;  %23790 = vmatprep.mubr.msk.f32.mxu1 %vm24134_vm0, %v24133_v1 }
 0x7b0   : > { %23796 = vmatmul.mubr.f32.vlgmr.msra.gmra.mxu0 %v25836_v34  ;;  %23798 = vmatprep.subr.mxu1 %v24133_v1 }
 0x7b1   : > { %23804 = vmatpush3.msra.mxu0 %v24270_v17  ;;  %23805 = vmatprep.mubr.msk.f32.mxu0 %vm24134_vm0, %v24133_v1 }
 0x7b2   : > { %23791 = vmatmul.mubr.f32.vlgmr.msra.gmra.mxu1 %v25825_v33  ;;  %23813 = vmatprep.subr.mxu0 %v24133_v1 }
 0x7b3   : > { %23799 = vmatpush3.msk.msra.mxu1 %vm24244_vm3, %v24135_v8  ;;  %23800 = vmatprep.mubr.msk.f32.mxu1 %vm24134_vm0, %v24133_v1 }
 0x7b4   : > { %23806 = vmatmul.mubr.f32.vlgmr.msra.gmra.mxu0 %v25825_v33  ;;  %23808 = vmatprep.subr.mxu1 %v24133_v1 }
 0x7b5   : > { %23814 = vmatpush3.msk.msra.mxu0 %vm24239_vm1, %v24135_v8  ;;  %23815 = vmatprep.mubr.msk.f32.mxu0 %vm24134_vm0, %v24133_v1 }
 0x7b6   : > { %23801 = vmatmul.mubr.f32.vlgmr.msra.gmra.mxu1 %v19032_v39  ;;  %23823 = vmatprep.subr.mxu0 %v24133_v1 }
 0x7b7   : > { %23809 = vmatpush3.msk.msra.mxu1 %vm24244_vm3, %v24135_v8  ;;  %23810 = vmatprep.mubr.msk.f32.mxu1 %vm24134_vm0, %v24133_v1 }
 0x7b8   : > { %23816 = vmatmul.mubr.f32.vlgmr.msra.gmra.mxu0 %v19477_v51  ;;  %23818 = vmatprep.subr.mxu1 %v24133_v1 }
 0x7b9   : > { %23824 = vmatpush3.msra.mxu0 %v24272_v18  ;;  %23825 = vmatprep.mubr.msk.f32.mxu0 %vm24134_vm0, %v24133_v1 }
 0x7ba   : > { %23811 = vmatmul.mubr.f32.vlgmr.msra.gmra.mxu1 %v25825_v33  ;;  %23833 = vmatprep.subr.mxu0 %v24133_v1 }
 0x7bb   : > { %23819 = vmatpush3.msra.mxu1 %v24305_v32  ;;  %23820 = vmatprep.mubr.msk.f32.mxu1 %vm24134_vm0, %v24133_v1 }
 0x7bc   : > { %23826 = vmatmul.mubr.f32.vlgmr.msra.gmra.mxu0 %v25874_v38  ;;  %23828 = vmatprep.subr.mxu1 %v24133_v1 }
 0x7bd   : > { %23834 = vmatpush3.msra.mxu0 %v24281_v24  ;;  %23835 = vmatprep.mubr.msk.f32.mxu0 %vm24134_vm0, %v24133_v1 }
 0x7be   : > { %23821 = vmatmul.mubr.f32.vlgmr.msra.gmra.mxu1 %v25859_v42  ;;  %23843 = vmatprep.subr.mxu0 %v24133_v1 }
 0x7bf   : > { %23829 = vmatpush3.msk.msra.mxu1 %vm24239_vm1, %v24135_v8  ;;  %23830 = vmatprep.mubr.msk.f32.mxu1 %vm24134_vm0, %v24133_v1 }
 0x7c0   : > { %23836 = vmatmul.mubr.f32.vlgmr.msra.gmra.mxu0 %v25859_v42  ;;  %23838 = vmatprep.subr.mxu1 %v24133_v1 }
 0x7c1   : > { %23844 = vmatpush3.msk.msra.mxu0 %vm24244_vm3, %v24135_v8  ;;  %23845 = vmatprep.mubr.msk.f32.mxu0 %vm24134_vm0, %v24133_v1 }
 0x7c2   : > { %23831 = vmatmul.mubr.f32.vlgmr.msra.gmra.mxu1 %v19475_v43  ;;  %23853 = vmatprep.subr.mxu0 %v24133_v1 }
 0x7c3   : > { %23839 = vmatpush3.msk.msra.mxu1 %vm24239_vm1, %v24135_v8  ;;  %23840 = vmatprep.mubr.msk.f32.mxu1 %vm24134_vm0, %v24133_v1 }
 0x7c4   : > { %23846 = vmatmul.mubr.f32.vlgmr.msra.gmra.mxu0 %v19924_v59  ;;  %23848 = vmatprep.subr.mxu1 %v24133_v1 }
 0x7c5   : > { %23854 = vmatpush3.msra.mxu0 %v24264_v13  ;;  %23855 = vmatprep.mubr.msk.f32.mxu0 %vm24134_vm0, %v24133_v1  ;;  %v20367_v13 = vand.u32 4294901760, %v20366_v58 }
 0x7c6   : > { %23841 = vmatmul.mubr.f32.vlgmr.msra.gmra.mxu1 %v25859_v42  ;;  %23863 = vmatprep.subr.mxu0 %v24133_v1 }
 0x7c7   : > { %23849 = vmatpush3.msra.mxu1 %v24278_v23  ;;  %23850 = vmatprep.mubr.msk.f32.mxu1 %vm24134_vm0, %v24133_v1 }
 0x7c8   : > { %23856 = vmatmul.mubr.f32.vlgmr.msra.gmra.mxu0 %v19921_v45  ;;  %23858 = vmatprep.subr.mxu1 %v24133_v1 }
 0x7c9   : > { %23864 = vmatpush3.msra.mxu0 %v24270_v17  ;;  %23865 = vmatprep.mubr.msk.f32.mxu0 %vm24134_vm0, %v24133_v1 }
 0x7ca   : > { %23851 = vmatmul.mubr.f32.vlgmr.msra.gmra.mxu1 %v25902_v49  ;;  %23873 = vmatprep.subr.mxu0 %v24133_v1 }
 0x7cb   : > { %23859 = vmatpush3.msk.msra.mxu1 %vm24244_vm3, %v24135_v8  ;;  %23860 = vmatprep.mubr.msk.f32.mxu1 %vm24134_vm0, %v24133_v1 }
 0x7cc   : > { %23866 = vmatmul.mubr.f32.vlgmr.msra.gmra.mxu0 %v25902_v49  ;;  %23868 = vmatprep.subr.mxu1 %v24133_v1 }
 0x7cd   : > { %23874 = vmatpush3.msk.msra.mxu0 %vm24239_vm1, %v24135_v8  ;;  %23875 = vmatprep.mubr.msk.f32.mxu0 %vm24134_vm0, %v24133_v1 }
 0x7ce   : > { %23861 = vmatmul.mubr.f32.vlgmr.msra.gmra.mxu1 %v19922_v50  ;;  %23883 = vmatprep.subr.mxu0 %v24133_v1 }
 0x7cf   : > { %23869 = vmatpush3.msk.msra.mxu1 %vm24244_vm3, %v24135_v8  ;;  %23870 = vmatprep.mubr.msk.f32.mxu1 %vm24134_vm0, %v24133_v1 }
 0x7d0   : > { %23876 = vmatmul.mubr.f32.vlgmr.msra.gmra.mxu0 %v20367_v13  ;;  %23878 = vmatprep.subr.mxu1 %v24133_v1 }
 0x7d1   : > { %23884 = vmatpush3.msra.mxu0 %v24272_v18  ;;  %23885 = vmatprep.mubr.msk.f32.mxu0 %vm24134_vm0, %v24133_v1 }
 0x7d2   : > { %23871 = vmatmul.mubr.f32.vlgmr.msra.gmra.mxu1 %v25902_v49  ;;  %23893 = vmatprep.subr.mxu0 %v24133_v1 }
 0x7d3   : > { %23879 = vmatpush3.msra.mxu1 %v24305_v32  ;;  %23880 = vmatprep.mubr.msk.f32.mxu1 %vm24134_vm0, %v24133_v1 }
 0x7d4   : > { %23886 = vmatmul.mubr.f32.vlgmr.msra.gmra.mxu0 %v20364_v53  ;;  %23888 = vmatprep.subr.mxu1 %v24133_v1 }
 0x7d5   : > { %23894 = vmatpush3.msra.mxu0 %v24281_v24  ;;  %23895 = vmatprep.mubr.msk.f32.mxu0 %vm24134_vm0, %v24133_v1 }
 0x7d6   : > { %23881 = vmatmul.mubr.f32.vlgmr.msra.gmra.mxu1 %v25941_v57  ;;  %23903 = vmatprep.subr.mxu0 %v24133_v1 }
 0x7d7   : > { %23889 = vmatpush3.msk.msra.mxu1 %vm24239_vm1, %v24135_v8  ;;  %23890 = vmatprep.mubr.msk.f32.mxu1 %vm24134_vm0, %v24133_v1 }
 0x7d8   : > { %23896 = vmatmul.mubr.f32.vlgmr.msra.gmra.mxu0 %v25941_v57  ;;  %23898 = vmatprep.subr.mxu1 %v24133_v1 }
 0x7d9   : > { %23905 = vmatprep.mubr.msk.f32.mxu0 %vm24134_vm0, %v24133_v1 }
 0x7da   : > { %23891 = vmatmul.mubr.f32.vlgmr.msra.gmra.mxu1 %v20365_v62 }
 0x7db   : > { %23899 = vmatpush3.msk.msra.mxu1 %vm24239_vm1, %v24135_v8  ;;  %23900 = vmatprep.mubr.msk.f32.mxu1 %vm24134_vm0, %v24133_v1 }
 0x7dc   : > { %23908 = vmatprep.subr.mxu1 %v24133_v1 }
 0x7de   : > { %23901 = vmatmul.mubr.f32.vlgmr.msra.gmra.mxu1 %v25941_v57 }
 0x7df   : > { %23910 = vmatprep.mubr.msk.f32.mxu1 %vm24134_vm0, %v24133_v1 }
 0x852   : > { %v18133_v7 = vpop.f32.mrf.mxu0 }
 0x854   : > { %v23727_v17 = vpop.f32.mrf.mxu0 }
 0x856   : > { %v18283_v18 = vpop.f32.mrf.mxu0 }
 0x858   : > { %v23737_v23 = vpop.f32.mrf.mxu0 }
 0x85a   : > { %v18209_v24 = vpop.f32.mrf.mxu1 }
 0x85b   : > { %v18210_v32 = vadd.f32 %v18209_v24, %v18133_v7  ;;  %v18431_v0 = vpop.f32.mrf.mxu0 }
 0x85c   : > { %v23732_v63 = vpop.f32.mrf.mxu1 }
 0x85d   : > { %v18284_v6 = vadd.f32 %v18283_v18, %v18210_v32  ;;  %v23747_v8 = vpop.f32.mrf.mxu0 }
 0x85e   : > { %v18357_v4 = vpop.f32.mrf.mxu1 }
 0x85f   : > { %v18358_v10 = vadd.f32 %v18357_v4, %v18284_v6  ;;  %v18582_v61 = vpop.f32.mrf.mxu0 }
 0x860   : > { %v23742_v12 = vpop.f32.mrf.mxu1 }
 0x861   : > { %v18432_v15 = vadd.f32 %v18431_v0, %v18358_v10  ;;  %v23757_v9 = vpop.f32.mrf.mxu0 }
 0x862   : > { %v18503_v2 = vpop.f32.mrf.mxu1 }
 0x863   : > { %v18504_v19 = vadd.f32 %v18503_v2, %v18432_v15  ;;  %v18732_v16 = vpop.f32.mrf.mxu0 }
 0x864   : > { %v23752_v14 = vpop.f32.mrf.mxu1 }
 0x865   : > { %v18583_v11 = vadd.f32 %v18582_v61, %v18504_v19  ;;  %v23767_v21 = vpop.f32.mrf.mxu0 }
 0x866   : > { %v18658_v25 = vpop.f32.mrf.mxu1 }
 0x867   : > { %v18659_v27 = vadd.f32 %v18658_v25, %v18583_v11 }
 0x868   : > { %v23762_v30 = vpop.f32.mrf.mxu1  ;;  %v18880_v29 = vpop.f32.mrf.mxu0 }
 0x869   : > { %v18733_v33 = vadd.f32 %v18732_v16, %v18659_v27 }
 0x86a   : > { %v18806_v31 = vpop.f32.mrf.mxu1  ;;  %v23777_v34 = vpop.f32.mrf.mxu0 }
 0x86b   : > { %v18807_v36 = vadd.f32 %v18806_v31, %v18733_v33 }
 0x86c   : > { %v23772_v26 = vpop.f32.mrf.mxu1  ;;  %v19036_v39 = vpop.f32.mrf.mxu0 }
 0x86d   : > { %v18881_v35 = vadd.f32 %v18880_v29, %v18807_v36 }
 0x86e   : > { %v18952_v41 = vpop.f32.mrf.mxu1  ;;  %v23787_v40 = vpop.f32.mrf.mxu0 }
 0x86f   : > { %v18953_v42 = vadd.f32 %v18952_v41, %v18881_v35 }
 0x870   : > { %v23782_v44 = vpop.f32.mrf.mxu1  ;;  %v19184_v38 = vpop.f32.mrf.mxu0 }
 0x871   : > { %21917 = vst.msk [vmem:[%s24675_s15 + $0x30] sm:$0xff] %vm2876_vm8, %v18953_v42 }
 0x872   : > { %v19111_v46 = vpop.f32.mrf.mxu1  ;;  %v23797_v43 = vpop.f32.mrf.mxu0 }
 0x873   : > { %v19112_v49 = vadd.f32 %v19111_v46, %v19036_v39 }
 0x874   : > { %v23792_v48 = vpop.f32.mrf.mxu1  ;;  %v19330_v47 = vpop.f32.mrf.mxu0 }
 0x875   : > { %v19185_v56 = vadd.f32 %v19184_v38, %v19112_v49 }
 0x876   : > { %v19257_v51 = vpop.f32.mrf.mxu1  ;;  %v23807_v45 = vpop.f32.mrf.mxu0 }
 0x877   : > { %v19258_v62 = vadd.f32 %v19257_v51, %v19185_v56 }
 0x878   : > { %v23802_v54 = vpop.f32.mrf.mxu1  ;;  %v19479_v50 = vpop.f32.mrf.mxu0 }
 0x879   : > { %v19331_v18 = vadd.f32 %v19330_v47, %v19258_v62 }
 0x87a   : > { %v19401_v55 = vpop.f32.mrf.mxu1  ;;  %v23817_v57 = vpop.f32.mrf.mxu0 }
 0x87b   : > { %v19402_v63 = vadd.f32 %v19401_v55, %v19331_v18 }
 0x87c   : > { %v23812_v59 = vpop.f32.mrf.mxu1  ;;  %v19627_v53 = vpop.f32.mrf.mxu0 }
 0x87d   : > { %v19480_v61 = vadd.f32 %v19479_v50, %v19402_v63 }
 0x87e   : > { %v19554_v58 = vpop.f32.mrf.mxu1  ;;  %v23827_v13 = vpop.f32.mrf.mxu0 }
 0x87f   : > { %v19555_v16 = vadd.f32 %v19554_v58, %v19480_v61 }
 0x880   : > { %v23822_v7 = vpop.f32.mrf.mxu1  ;;  %v19773_v17 = vpop.f32.mrf.mxu0 }
 0x881   : > { %v19628_v29 = vadd.f32 %v19627_v53, %v19555_v16 }
 0x882   : > { %v19700_v23 = vpop.f32.mrf.mxu1  ;;  %v23837_v24 = vpop.f32.mrf.mxu0 }
 0x883   : > { %v19701_v35 = vadd.f32 %v19700_v23, %v19628_v29 }
 0x884   : > { %v23832_v32 = vpop.f32.mrf.mxu1  ;;  %v19926_v0 = vpop.f32.mrf.mxu0 }
 0x885   : > { %v19774_v43 = vadd.f32 %v19773_v17, %v19701_v35 }
 0x886   : > { %v19844_v6 = vpop.f32.mrf.mxu1  ;;  %v23847_v8 = vpop.f32.mrf.mxu0 }
 0x887   : > { %v19845_v54 = vadd.f32 %v19844_v6, %v19774_v43 }
 0x888   : > { %v23842_v4 = vpop.f32.mrf.mxu1  ;;  %v20074_v10 = vpop.f32.mrf.mxu0 }
 0x889   : > { %v21188_v59 = vsel %vm1974_vm7, %v19845_v54, 0 }
 0x88a   : > { %v20001_v12 = vpop.f32.mrf.mxu1  ;;  %v23857_v15 = vpop.f32.mrf.mxu0  ;;  %v21221_v58 = vand.u32 4294901760, %v21188_v59 }
 0x88b   : > { %v20002_v9 = vadd.f32 %v20001_v12, %v19926_v0 }
 0x88c   : > { %v23852_v2 = vpop.f32.mrf.mxu1  ;;  %v20220_v19 = vpop.f32.mrf.mxu0  ;;  %v21298_v17 = vsub.f32 %v21188_v59, %v21221_v58 }
 0x88d   : > { %v20075_v14 = vadd.f32 %v20074_v10, %v20002_v9 }
 0x88e   : > { %v20147_v11 = vpop.f32.mrf.mxu1  ;;  %v23867_v21 = vpop.f32.mrf.mxu0 }
 0x88f   : > { %v20148_v25 = vadd.f32 %v20147_v11, %v20075_v14 }
 0x890   : > { %v23862_v27 = vpop.f32.mrf.mxu1  ;;  %v20369_v30 = vpop.f32.mrf.mxu0 }
 0x891   : > { %v20221_v33 = vadd.f32 %v20220_v19, %v20148_v25 }
 0x892   : > { %v20291_v31 = vpop.f32.mrf.mxu1  ;;  %v23877_v34 = vpop.f32.mrf.mxu0 }
 0x893   : > { %v20292_v36 = vadd.f32 %v20291_v31, %v20221_v33 }
 0x894   : > { %v23872_v26 = vpop.f32.mrf.mxu1  ;;  %v20517_v39 = vpop.f32.mrf.mxu0 }
 0x895   : > { %v20370_v41 = vadd.f32 %v20369_v30, %v20292_v36 }
 0x896   : > { %v20444_v40 = vpop.f32.mrf.mxu1  ;;  %v23887_v42 = vpop.f32.mrf.mxu0 }
 0x897   : > { %v20445_v44 = vadd.f32 %v20444_v40, %v20370_v41 }
 0x898   : > { %v23882_v38 = vpop.f32.mrf.mxu1  ;;  %v20663_v46 = vpop.f32.mrf.mxu0 }
 0x899   : > { %v20518_v48 = vadd.f32 %v20517_v39, %v20445_v44 }
 0x89a   : > { %v20590_v47 = vpop.f32.mrf.mxu1  ;;  %v23897_v49 = vpop.f32.mrf.mxu0 }
 0x89b   : > { %v20591_v51 = vadd.f32 %v20590_v47, %v20518_v48 }
 0x89c   : > { %v23892_v45 = vpop.f32.mrf.mxu1 }
 0x89d   : > { %v20664_v50 = vadd.f32 %v20663_v46, %v20591_v51 }
 0x89e   : > { %v20734_v56 = vpop.f32.mrf.mxu1 }
 0x89f   : > { %v20735_v55 = vadd.f32 %v20734_v56, %v20664_v50 }
 0x8a0   : > { %v23902_v57 = vpop.f32.mrf.mxu1 }
 0x8a1   : > { %v20739_v53 = vsel %vm1974_vm7, %v20735_v55, 0 }
 0x8a2   : > { %v20772_v62 = vand.u32 4294901760, %v20739_v53 }
 0x8a4   : > { %v20849_v13 = vsub.f32 %v20739_v53, %v20772_v62  ;;  %23904 = vmatpush3.msra.mxu0 %v20772_v62 }
 0x8a5   : > { %23906 = vmatmul.mubr.f32.vlgmr.msra.gmra.mxu0 %v24439_v20  ;;  %23913 = vmatprep.subr.mxu0 %v24133_v1  ;;  %v21299_v20 = vand.u32 4294901760, %v21298_v17 }
 0x8a6   : > { %23914 = vmatpush3.msra.mxu0 %v20849_v13  ;;  %23915 = vmatprep.mubr.msk.f32.mxu0 %vm24134_vm0, %v24133_v1  ;;  %v20850_v7 = vand.u32 4294901760, %v20849_v13 }
 0x8a7   : > { %23923 = vmatprep.subr.mxu0 %v24133_v1 }
 0x8a8   : > { %v20851_v18 = vsub.f32 %v20849_v13, %v20850_v7 }
 0x8a9   : > { %23916 = vmatmul.mubr.f32.vlgmr.msra.gmra.mxu0 %v24424_v52  ;;  %v21300_v52 = vsub.f32 %v21298_v17, %v21299_v20 }
 0x8aa   : > { %23924 = vmatpush3.msra.mxu0 %v20850_v7  ;;  %v20852_v23 = vand.u32 4294901760, %v20851_v18  ;;  %23925 = vmatprep.mubr.msk.f32.mxu0 %vm24134_vm0, %v24133_v1 }
 0x8ab   : > { %23933 = vmatprep.subr.mxu0 %v24133_v1  ;;  %v21301_v24 = vand.u32 4294901760, %v21300_v52 }
 0x8ac   : > { %23909 = vmatpush3.msra.mxu1 %v20852_v23 }
 0x8ad   : > { %23911 = vmatmul.mubr.msk.f32.vlgmr.msra.gmra.mxu1 %vm1970_vm5, %v24420_v3  ;;  %23918 = vmatprep.subr.mxu1 %v24133_v1 }
 0x8ae   : > { %23926 = vmatmul.mubr.msk.f32.vlgmr.msra.gmra.mxu0 %vm1970_vm5, %v24420_v3  ;;  %23919 = vmatpush3.msra.mxu1 %v20772_v62 }
 0x8af   : > { %23934 = vmatpush3.msra.mxu0 %v21221_v58  ;;  %23920 = vmatprep.mubr.msk.f32.mxu1 %vm24134_vm0, %v24133_v1 }
 0x8b0   : > { %23928 = vmatprep.subr.mxu1 %v24133_v1  ;;  %23935 = vmatprep.mubr.msk.f32.mxu0 %vm24134_vm0, %v24133_v1 }
 0x8b1   : > { %23943 = vmatprep.subr.mxu0 %v24133_v1  ;;  %23921 = vmatmul.mubr.f32.vlgmr.msra.gmra.mxu1 %v24427_v60 }
 0x8b2   : > { %23929 = vmatpush3.msra.mxu1 %v20772_v62  ;;  %23936 = vmatmul.mubr.f32.vlgmr.msra.gmra.mxu0 %v24469_v37 }
 0x8b3   : > { %23944 = vmatpush3.msra.mxu0 %v21298_v17  ;;  %23930 = vmatprep.mubr.msk.f32.mxu1 %vm24134_vm0, %v24133_v1 }
 0x8b4   : > { %23938 = vmatprep.subr.mxu1 %v24133_v1  ;;  %23945 = vmatprep.mubr.msk.f32.mxu0 %vm24134_vm0, %v24133_v1 }
 0x8b5   : > { %23953 = vmatprep.subr.mxu0 %v24133_v1  ;;  %23931 = vmatmul.mubr.msk.f32.vlgmr.msra.gmra.mxu1 %vm1970_vm5, %v24420_v3 }
 0x8b6   : > { %23939 = vmatpush3.msra.mxu1 %v21301_v24  ;;  %23946 = vmatmul.mubr.f32.vlgmr.msra.gmra.mxu0 %v24441_v22 }
 0x8b7   : > { %23954 = vmatpush3.msra.mxu0 %v21299_v20  ;;  %23940 = vmatprep.mubr.msk.f32.mxu1 %vm24134_vm0, %v24133_v1 }
 0x8b8   : > { %23948 = vmatprep.subr.mxu1 %v24133_v1  ;;  %23955 = vmatprep.mubr.msk.f32.mxu0 %vm24134_vm0, %v24133_v1 }
 0x8b9   : > { %23941 = vmatmul.mubr.msk.f32.vlgmr.msra.gmra.mxu1 %vm1970_vm5, %v24431_v5 }
 0x8ba   : > { %23949 = vmatpush3.msra.mxu1 %v21221_v58  ;;  %23950 = vmatprep.mubr.msk.f32.mxu1 %vm24134_vm0, %v24133_v1 }
 0x8bb   : > { %23958 = vmatprep.subr.mxu1 %v24133_v1  ;;  %23956 = vmatmul.mubr.msk.f32.vlgmr.msra.gmra.mxu0 %vm1970_vm5, %v24431_v5 }
 0x8bd   : > { %23951 = vmatmul.mubr.f32.vlgmr.msra.gmra.mxu1 %v24451_v28 }
 0x8be   : > { %23959 = vmatpush3.msra.mxu1 %v21221_v58  ;;  %23960 = vmatprep.mubr.msk.f32.mxu1 %vm24134_vm0, %v24133_v1 }
 0x8c1   : > { %23961 = vmatmul.mubr.msk.f32.vlgmr.msra.gmra.mxu1 %vm1970_vm5, %v24431_v5 }
 0x965   : > { %v20813_v3 = vpop.f32.mrf.mxu0 }
 0x967   : > { %v23907_v60 = vpop.f32.mrf.mxu0 }
 0x969   : > { %v20963_v22 = vpop.f32.mrf.mxu0 }
 0x96b   : > { %v23917_v37 = vpop.f32.mrf.mxu0 }
 0x96d   : > { %v20889_v32 = vpop.f32.mrf.mxu1 }
 0x96e   : > { %v20890_v0 = vadd.f32 %v20889_v32, %v20813_v3  ;;  %v21111_v63 = vpop.f32.mrf.mxu0 }
 0x96f   : > { %v23912_v6 = vpop.f32.mrf.mxu1 }
 0x970   : > { %v20964_v8 = vadd.f32 %v20963_v22, %v20890_v0  ;;  %v23927_v4 = vpop.f32.mrf.mxu0 }
 0x971   : > { %v21037_v10 = vpop.f32.mrf.mxu1 }
 0x972   : > { %v21038_v28 = vadd.f32 %v21037_v10, %v20964_v8  ;;  %v21262_v61 = vpop.f32.mrf.mxu0 }
 0x973   : > { %v23922_v12 = vpop.f32.mrf.mxu1 }
 0x974   : > { %v21112_v1 = vadd.f32 %v21111_v63, %v21038_v28  ;;  %v23937_v15 = vpop.f32.mrf.mxu0 }
 0x975   : > { %v21183_v9 = vpop.f32.mrf.mxu1 }
 0x976   : > { %v21184_v5 = vadd.f32 %v21183_v9, %v21112_v1  ;;  %v21412_v2 = vpop.f32.mrf.mxu0 }
 0x977   : > { %v23932_v19 = vpop.f32.mrf.mxu1 }
 0x978   : > { %v21263_v16 = vadd.f32 %v21262_v61, %v21184_v5  ;;  %v23947_v14 = vpop.f32.mrf.mxu0 }
 0x979   : > { %v21338_v11 = vpop.f32.mrf.mxu1 }
 0x97a   : > { %v21339_v21 = vadd.f32 %v21338_v11, %v21263_v16 }
 0x97b   : > { %v23942_v25 = vpop.f32.mrf.mxu1  ;;  %v21560_v27 = vpop.f32.mrf.mxu0 }
 0x97c   : > { %v21413_v30 = vadd.f32 %v21412_v2, %v21339_v21 }
 0x97d   : > { %v21486_v29 = vpop.f32.mrf.mxu1  ;;  %v23957_v33 = vpop.f32.mrf.mxu0 }
 0x97e   : > { %v21487_v31 = vadd.f32 %v21486_v29, %v21413_v30 }
 0x97f   : > { %v23952_v34 = vpop.f32.mrf.mxu1 }
 0x980   : > { %v21561_v36 = vadd.f32 %v21560_v27, %v21487_v31 }
 0x981   : > { %v21632_v26 = vpop.f32.mrf.mxu1 }
 0x982   : > { %v21633_v39 = vadd.f32 %v21632_v26, %v21561_v36 }
 0x983   : > { %v23962_v35 = vpop.f32.mrf.mxu1 }
 0x984   : > { %21940 = vst.msk [vmem:[%s24675_s15 + $0x38] sm:$0xff] %vm2876_vm8, %v21633_v39 }
 0x985   : > { %24052 = shalt.err (!%p24049_p7)
}
 0x986   : > { %s24053_s3 = scalar_lea.hbm %s26091_s10, 1024  ;;  %s24057_s9 = scalar_lea.hbm %s26151_s1, 4096 }
 0x987   : > { %p24054_p9 = scmp.ne.s32.totalorder %s26091_s10, %s24053_s3  ;;  %p24058_p12 = scmp.lt.s32.totalorder %s26091_s10, %s26151_s1 }
 0x988   : > { %p24059_p13 = scmp.lt.s32.totalorder %s24057_s9, %s24053_s3 }
 0x989   : > { %p24055_p10 = pnand %p24054_p9, %p24200_p3 }
 0x98a   : > { %p24060_p0 = por %p24059_p13, %p24058_p12 }
 0x98b   : > { %p24056_p11 = pneg %p24055_p10 }
 0x98d   : > { %p24061_p1 = pnand %p24060_p0, %p24056_p11 }
 0x98f   : > { %24064 = shalt.err (!%p24061_p1)
}
 0x990   : > { %s24137_s18 = smov 128   ;;  %s24138_s21 = smov 8  }
 0x991   : > { %23963 = dma.vmem_to_hbm [thread:$0]  (%p24200_p3), %s26093_s23, 1024, %s26091_s10, %s26099_s25, %s24137_s18, %s24137_s18, %s24138_s21  }
 0x992 PF: > { %p23969_p2 = scmp.ge.s32.totalorder %s24131_s13, 2  ;;  %s21671_s22 = sand.u32 1, %s24103_s6  }
 0x993   : > { %s21672_s26 = scalar_lea.sflag [#allocation3], %s21671_s22 }
 0x994   : > { %p23966_p4 = pnand %p23969_p2, %p24209_p8 }
 0x996   : > { %p23967_p5 = pneg %p23966_p4 }
 0x998   : > { %24098 = dma.done.wait (%p23967_p5), %s21672_s26, 1024  }
 0x999   : > { %24100 = vsyncadd (%p23967_p5), %s21672_s26, 4294966272  ;;  %s14_s13 = sadd.s32 1, %s24131_s13   ;;  %s26158_s6 = smov %s24107_s7 }
 0x99a   : > { %p11_p6 = scmp.ge.s32.totalorder %s14_s13, 6   ;;  %s26159_s7 = smov %s24111_s8 }
 0x99b   : > { %s26160_s8 = smov %s24218_s24  ;;  %s26161_s9 = smov %s24123_s11 }
 0x99c   : > { %s26162_s10 = smov %s24127_s12  ;;  %s26163_s11 = smov %s26166_s16 }
 0x99d   : > { %s26164_s12 = smov %s26170_s17  ;;  %13 = sbr.rel (!%p11_p6) target bundleno = 5 (0x5), region = 97 }
 0x9a2   :  { %21677 = vsyncpa [#allocation3], 1 }
 0x9a3   :  { %21679 = vsyncpa [#allocation3 + $0x1], 1 }

</bundles_post_ra>
